<compile_context>
chip_gen: v7x
topology: tpu7x:2x2x1
jax: 0.10.0
libtpu: 0.0.40
codegen_flags: <defaults>
</compile_context>

<pallas_src>
import numpy as np
import jax
import jax.numpy as jnp
from jax.experimental import pallas as pl
from jax.experimental.pallas import tpu as pltpu

START_TAG = "<START>"
STOP_TAG = "<STOP>"
TAG_TO_IX = {"B": 0, "I": 1, "O": 2, START_TAG: 3, STOP_TAG: 4}

VOCAB_SIZE = 20
EMBEDDING_DIM = 16
HIDDEN_DIM = 32            # bidirectional: H = HIDDEN_DIM // 2 per direction
SEQ_LEN = 8
TAGSET_SIZE = len(TAG_TO_IX)

H = HIDDEN_DIM // 2        # 16  (per direction)
H2 = 2 * H                 # 32  (both directions)
G = 4 * H2                 # 128 (4 gates x 2 dirs x H)  -> exactly one vreg row
E = EMBEDDING_DIM          # 16
E2 = 2 * E                 # 32  (embeds || reversed embeds)
TP = 8                     # tagset padded 5 -> 8 (full sublane tile)

# ---- packed parameter slab row offsets (single (SLAB_ROWS, 128) f32 input) ----
R_WIN = 0                  # (E2, G)   fused input->gates weight
R_WHH = R_WIN + E2         # (H2, G)   fused recurrent weight
R_WTAG = R_WHH + H2        # (H2, TP)  hidden2tag weight      (cols 0:TP)
R_TRANS = R_WTAG + H2      # (TP, TP)  padded CRF transitions (cols 0:TP)
R_BIAS = R_TRANS + TP      # (1, G)    fused gate bias (b_ih + b_hh, both dirs)
R_H0 = R_BIAS + 1          # (1, H2)
R_C0 = R_H0 + 1            # (1, H2)
R_BTAG = R_C0 + 1          # (1, TP)
R_GSCALE = R_BTAG + 1      # (1, G)    gate-activation scale (2.0 on g cols, else 1.0)
R_GSHIFT = R_GSCALE + 1    # (1, G)    gate-activation shift (-1.0 on g cols, else 0.0)
SLAB_ROWS = ((R_GSHIFT + 1 + 7) // 8) * 8   # 112


def _sigmoid(x):
    # single transcendental pass on the EUP
    return jax.nn.sigmoid(x)


def make_bilstm_crf_kernel(S, start_idx, stop_idx):
    def kernel(emb_ref,        # (1, S, E2)       embeds || reversed embeds (one sentence)
               slab_ref,       # (SLAB_ROWS, G)   packed parameters (shared, resident)
               out_ref):       # (1, 1, 128) i32  [path(0:S) | START tag | bitcast score]

        emb = emb_ref[0]                                       # (S, E2)

        # ---- fused bidirectional input projection: ONE MXU push, kept as a value ----
        w_in = slab_ref[R_WIN:R_WIN + E2, :]                   # (E2, G)
        bias = slab_ref[R_BIAS:R_BIAS + 1, :]                  # (1, G)
        xw = jnp.dot(emb, w_in, preferred_element_type=jnp.float32) + bias   # (S, G)

        # gate-activation constants from spare slab rows (no iota/compares in-kernel)
        g_scale = slab_ref[R_GSCALE:R_GSCALE + 1, :]           # (1, G)
        g_shift = slab_ref[R_GSHIFT:R_GSHIFT + 1, :]           # (1, G)

        whh = slab_ref[R_WHH:R_WHH + H2, :]                    # (H2, G), loaded once
        h = slab_ref[R_H0:R_H0 + 1, 0:H2]                      # (1, H2)
        c = slab_ref[R_C0:R_C0 + 1, 0:H2]                      # (1, H2)

        # hidden-state assembly stays in vregs (no masked scratch stores)
        row_iota = jax.lax.broadcasted_iota(jnp.int32, (S, H2), 0)
        col_iota = jax.lax.broadcasted_iota(jnp.int32, (S, H2), 1)
        fwd_col = col_iota < H
        bwd_col = jnp.logical_not(fwd_col)
        hall = jnp.zeros((S, H2), jnp.float32)                 # [h_fwd(t) || h_bwd(t)]

        # ---- fused fwd+bwd LSTM recurrence, statically unrolled (S = 8) ----
        for s in range(S):
            gates = xw[s:s + 1, :] + jnp.dot(
                h, whh, preferred_element_type=jnp.float32)    # (1, G)
            # one sigmoid over the full 128-lane row; g-gate columns were pre-scaled by 2
            # in the wrapper so: 2*sigmoid(2g) - 1 == tanh(g)   (i/f/o stay sigmoid)
            act = _sigmoid(gates) * g_scale + g_shift
            i_g = act[:, 0 * H2:1 * H2]
            f_g = act[:, 1 * H2:2 * H2]
            g_g = act[:, 2 * H2:3 * H2]
            o_g = act[:, 3 * H2:4 * H2]
            c = f_g * c + i_g * g_g
            h = o_g * jnp.tanh(c)
            # forward half of h is time s, backward half is time S-1-s
            hall = jnp.where((row_iota == s) & fwd_col, h, hall)
            hall = jnp.where((row_iota == (S - 1 - s)) & bwd_col, h, hall)

        # ---- hidden2tag + tanh: single (S, 2H) @ (2H, TP) dot ----
        wtag = slab_ref[R_WTAG:R_WTAG + H2, 0:TP]              # (H2, TP)
        btag = slab_ref[R_BTAG:R_BTAG + 1, 0:TP]               # (1, TP)
        feats = jnp.tanh(jnp.dot(hall, wtag,
                                 preferred_element_type=jnp.float32) + btag)   # (S, TP)

        # ---- Viterbi forward pass over the padded tag set (statically unrolled) ----
        trans = slab_ref[R_TRANS:R_TRANS + TP, 0:TP]           # (TP, TP)
        tag_iota = jax.lax.broadcasted_iota(jnp.int32, (1, TP), 1)
        iota_mat = jax.lax.broadcasted_iota(jnp.int32, (TP, TP), 1)
        fv = jnp.where(tag_iota == start_idx, 0.0, -10000.0).astype(jnp.float32)  # (1,TP)

        bp_rows = []                                           # backpointers stay in vregs
        for s in range(S):
            ntv = fv + trans                                   # (TP, TP): [next, prev]
            maxv = jnp.max(ntv, axis=1, keepdims=True)         # (TP, 1)
            # first-occurrence argmax over prev tags (torch.max index semantics)
            bptr = jnp.min(jnp.where(ntv == maxv, iota_mat, TP), axis=1)   # (TP,)
            bp_rows.append(bptr[None, :].astype(jnp.int32))    # (1, TP)
            fv = jnp.max(ntv, axis=1)[None, :] + feats[s:s + 1, :]         # (1, TP)

        terminal = fv + trans[stop_idx:stop_idx + 1, :]        # (1, TP)
        best_score = jnp.max(terminal, axis=1, keepdims=True)  # (1, 1) f32
        best_tag = jnp.min(jnp.where(terminal == best_score, tag_iota, TP),
                           axis=1, keepdims=True)              # (1, 1) int32

        # ---- Viterbi back-tracking in-kernel, assembled into ONE lane-dense row ----
        # TODO(synk): SMEM scalar pointer-chase alternative skipped (epilogue not on the
        #             measured critical path for S=8).
        out_iota = jax.lax.broadcasted_iota(jnp.int32, (1, 128), 1)
        row = jnp.zeros((1, 128), jnp.int32)
        tag = best_tag                                         # (1, 1) int32
        for k in range(S):
            s = S - 1 - k
            row = jnp.where(out_iota == s, tag, row)
            tag = jnp.max(jnp.where(tag_iota == tag, bp_rows[s], -1),
                          axis=1, keepdims=True)               # previous tag
        row = jnp.where(out_iota == S, tag, row)               # slot S: chased START tag
        score_bits = pltpu.bitcast(best_score, jnp.int32)      # (1, 1) i32 bit-pattern
        row = jnp.where(out_iota == S + 1, score_bits, row)    # slot S+1: bitcast score
        out_ref[0] = row                                       # single unmasked store

    return kernel


def pack_params(P):
    """Re-layout all module parameters into one (SLAB_ROWS, 128) f32 slab.

    Call ONCE per parameter set (host-side NumPy + one H2D upload); the jitted forward
    takes the resulting slab as a plain device array.
    """
    slab = np.zeros((SLAB_ROWS, G), np.float32)

    w_ih_f = np.asarray(P["w_ih_f"], np.float32)               # (4H, E)
    w_ih_b = np.asarray(P["w_ih_b"], np.float32)
    w_hh_f = np.asarray(P["w_hh_f"], np.float32)               # (4H, H)
    w_hh_b = np.asarray(P["w_hh_b"], np.float32)
    b_f = np.asarray(P["b_ih_f"], np.float32) + np.asarray(P["b_hh_f"], np.float32)
    b_b = np.asarray(P["b_ih_b"], np.float32) + np.asarray(P["b_hh_b"], np.float32)

    # gate column layout: [i | f | g | o], each H2=32 wide; inside a block [fwd H | bwd H]
    for gate in range(4):
        c0 = gate * H2
        rows = slice(gate * H, (gate + 1) * H)
        slab[R_WIN:R_WIN + E, c0:c0 + H] = w_ih_f[rows].T
        slab[R_WIN + E:R_WIN + E2, c0 + H:c0 + H2] = w_ih_b[rows].T
        slab[R_WHH:R_WHH + H, c0:c0 + H] = w_hh_f[rows].T
        slab[R_WHH + H:R_WHH + H2, c0 + H:c0 + H2] = w_hh_b[rows].T
        slab[R_BIAS, c0:c0 + H] = b_f[rows]
        slab[R_BIAS, c0 + H:c0 + H2] = b_b[rows]

    # 2x pre-scale of the g-gate (cell candidate) columns: tanh(x) = 2*sigmoid(2x) - 1
    gl, gh = 2 * H2, 3 * H2
    slab[R_WIN:R_WHH + H2, gl:gh] *= 2.0
    slab[R_BIAS, gl:gh] *= 2.0

    # gate-activation scale/shift rows (spare slab rows; no in-kernel iota/select build)
    slab[R_GSCALE, :] = 1.0
    slab[R_GSCALE, gl:gh] = 2.0
    slab[R_GSHIFT, gl:gh] = -1.0

    h0 = np.asarray(P["h0"], np.float32)
    c0_ = np.asarray(P["c0"], np.float32)
    slab[R_H0, 0:H] = h0[0, 0]
    slab[R_H0, H:H2] = h0[1, 0]
    slab[R_C0, 0:H] = c0_[0, 0]
    slab[R_C0, H:H2] = c0_[1, 0]

    slab[R_WTAG:R_WTAG + H2, 0:TAGSET_SIZE] = np.asarray(P["w_tag"], np.float32).T
    slab[R_BTAG, 0:TAGSET_SIZE] = np.asarray(P["b_tag"], np.float32)

    trans_pad = np.full((TP, TP), -10000.0, np.float32)        # padded tags can never win
    trans_pad[:TAGSET_SIZE, :TAGSET_SIZE] = np.asarray(P["trans"], np.float32)
    slab[R_TRANS:R_TRANS + TP, 0:TP] = trans_pad

    return jnp.asarray(slab)


@jax.jit
def bilstm_crf_forward_batched(sentences, emb_table, slab):
    """Batched forward: sentences (B, S) int32 -> (scores (B,), paths (B,S), first (B,)).

    Each sentence is one grid step on a "parallel" axis (megacore / second TC on v7x).
    """
    B, S = sentences.shape

    # glue kept in plain JAX (all under jit): embedding gather + fused-direction assembly
    embeds = emb_table[sentences].astype(jnp.float32)                    # (B, S, E)
    emb_cat = jnp.concatenate([embeds, embeds[:, ::-1, :]], axis=2)      # (B, S, 2E)

    kernel = make_bilstm_crf_kernel(S, TAG_TO_IX[START_TAG], TAG_TO_IX[STOP_TAG])

    out = pl.pallas_call(
        kernel,
        out_shape=jax.ShapeDtypeStruct((B, 1, 128), jnp.int32),
        grid=(B,),
        in_specs=[
            pl.BlockSpec((1, S, E2), lambda b: (b, 0, 0)),          # per-sentence embeds
            pl.BlockSpec((SLAB_ROWS, G), lambda b: (0, 0)),         # shared param slab
        ],
        out_specs=pl.BlockSpec((1, 1, 128), lambda b: (b, 0, 0)),   # lane-dense result row
        compiler_params=pltpu.CompilerParams(
            dimension_semantics=("parallel",)),
    )(emb_cat, slab)

    out = out[:, 0, :]                                               # (B, 128)
    paths = out[:, :S]                                               # (B, S)
    first_tags = out[:, S]                                           # (B,)  chased START
    scores = jax.lax.bitcast_convert_type(out[:, S + 1], jnp.float32)  # (B,)
    return scores, paths, first_tags


def bilstm_crf_forward(sentence, emb_table, slab):
    """Single-sentence API matching BiLSTM_CRF.forward (+ chased START tag)."""
    scores, paths, firsts = bilstm_crf_forward_batched(sentence[None], emb_table, slab)
    return scores[0], paths[0], firsts[0]


def reference_forward(sentence, P):
    """Pure-JAX reference mirroring the PyTorch module."""
    emb = P["emb"][sentence]
    T = TAGSET_SIZE

    def run_lstm(xs, w_ih, w_hh, b_ih, b_hh, h0, c0):
        def step(carry, x):
            h, c = carry
            g = w_ih @ x + b_ih + w_hh @ h + b_hh
            i, f, gg, o = jnp.split(g, 4)
            i, f, o = _sigmoid(i), _sigmoid(f), _sigmoid(o)
            gg = jnp.tanh(gg)
            c = f * c + i * gg
            h = o * jnp.tanh(c)
            return (h, c), h
        _, hs = jax.lax.scan(step, (h0, c0), xs)
        return hs

    hf = run_lstm(emb, P["w_ih_f"], P["w_hh_f"], P["b_ih_f"], P["b_hh_f"],
                  P["h0"][0, 0], P["c0"][0, 0])
    hb = run_lstm(emb[::-1], P["w_ih_b"], P["w_hh_b"], P["b_ih_b"], P["b_hh_b"],
                  P["h0"][1, 0], P["c0"][1, 0])[::-1]
    feats = jnp.tanh(jnp.concatenate([hf, hb], axis=1) @ P["w_tag"].T + P["b_tag"])

    fv = jnp.full((T,), -10000.0).at[TAG_TO_IX[START_TAG]].set(0.0)

    def vstep(fv, feat):
        ntv = fv[None, :] + P["trans"]
        bptr = jnp.argmax(ntv, axis=1).astype(jnp.int32)
        return jnp.max(ntv, axis=1) + feat, bptr

    fv, bptrs = jax.lax.scan(vstep, fv, feats)
    terminal = (fv + P["trans"][TAG_TO_IX[STOP_TAG]])[None, :]

    best_last = jnp.argmax(terminal[0]).astype(jnp.int32)
    score = terminal[0, best_last]

    def back_step(tag, bp_row):
        return bp_row[tag], tag

    first_tag, path = jax.lax.scan(back_step, best_last, bptrs, reverse=True)
    return score, path, first_tag


def init_params(key):
    Hd = HIDDEN_DIM // 2
    T = TAGSET_SIZE
    ks = jax.random.split(key, 16)

    def uniform(k, shape, fan):
        bound = 1.0 / np.sqrt(fan)
        return jax.random.uniform(k, shape, jnp.float32, -bound, bound)

    trans = jax.random.normal(ks[12], (T, T), jnp.float32)
    trans = trans.at[TAG_TO_IX[START_TAG], :].set(-10000.0)
    trans = trans.at[:, TAG_TO_IX[STOP_TAG]].set(-10000.0)

    return {
        "emb": jax.random.normal(ks[0], (VOCAB_SIZE, EMBEDDING_DIM), jnp.float32),
        "w_ih_f": uniform(ks[1], (4 * Hd, EMBEDDING_DIM), Hd),
        "w_hh_f": uniform(ks[2], (4 * Hd, Hd), Hd),
        "b_ih_f": uniform(ks[3], (4 * Hd,), Hd),
        "b_hh_f": uniform(ks[4], (4 * Hd,), Hd),
        "w_ih_b": uniform(ks[5], (4 * Hd, EMBEDDING_DIM), Hd),
        "w_hh_b": uniform(ks[6], (4 * Hd, Hd), Hd),
        "b_ih_b": uniform(ks[7], (4 * Hd,), Hd),
        "b_hh_b": uniform(ks[8], (4 * Hd,), Hd),
        "w_tag": uniform(ks[9], (T, HIDDEN_DIM), HIDDEN_DIM),
        "b_tag": uniform(ks[10], (T,), HIDDEN_DIM),
        "trans": trans,
        # init_hidden(): torch.randn(2, 1, hidden_dim // 2) for h0 and c0
        "h0": jax.random.normal(ks[13], (2, 1, Hd), jnp.float32),
        "c0": jax.random.normal(ks[14], (2, 1, Hd), jnp.float32),
    }


if __name__ == "__main__":
    key = jax.random.PRNGKey(0)
    pkey, skey = jax.random.split(key)
    params = init_params(pkey)

    # pack the parameter slab ONCE (host pack + single H2D upload), reuse every call
    slab = pack_params(params)
    emb_table = params["emb"]

    B = 2
    sentences = jax.random.randint(skey, (B, SEQ_LEN), 0, VOCAB_SIZE, dtype=jnp.int32)

    scores, paths, first_tags = bilstm_crf_forward_batched(sentences, emb_table, slab)
    jax.block_until_ready((scores, paths, first_tags))

    # sanity check each sentence against a pure-JAX reference of the PyTorch forward
    for b in range(B):
        ref_score, ref_path, ref_first = reference_forward(sentences[b], params)
        assert int(first_tags[b]) == TAG_TO_IX[START_TAG], "backtrack did not end at START"
        assert np.array_equal(np.asarray(paths[b]), np.asarray(ref_path)), \
            "tag sequence mismatch"
        assert abs(float(scores[b]) - float(ref_score)) < 1e-2, "path score mismatch"

    print("KERNEL_OK")
</pallas_src>

<mosaic_0001>
module attributes {stable_mosaic.version = 11 : i64} {
  func.func @kernel(%arg0: i32, %arg1: memref<1x8x32xf32, #tpu.memory_space<vmem>>, %arg2: memref<112x128xf32, #tpu.memory_space<vmem>>, %arg3: memref<1x1x128xi32, #tpu.memory_space<vmem>>) attributes {dimension_semantics = [#tpu.dimension_semantics<parallel>], iteration_bounds = array<i64: 2>, scalar_prefetch = 0 : i64, scratch_operands = 0 : i64, tpu.core_type = #tpu.core_type<tc>, window_params = [{transform_indices = @transform_0, window_bounds = array<i64: 1, 8, 32>}, {pipeline_mode = #tpu.pipeline_mode<synchronous>, transform_indices = @transform_1, window_bounds = array<i64: 112, 128>}, {transform_indices = @transform_2, window_bounds = array<i64: 1, 1, 128>}]} {
    %c0 = arith.constant 0 : index
    %c0_0 = arith.constant 0 : index
    %c0_1 = arith.constant 0 : index
    %0 = vector.load %arg1[%c0, %c0_0, %c0_1] : memref<1x8x32xf32, #tpu.memory_space<vmem>>, vector<1x8x32xf32>
    %1 = vector.shape_cast %0 : vector<1x8x32xf32> to vector<8x32xf32>
    %c0_2 = arith.constant 0 : index
    %c0_3 = arith.constant 0 : index
    %2 = vector.load %arg2[%c0_2, %c0_3] : memref<112x128xf32, #tpu.memory_space<vmem>>, vector<32x128xf32>
    %c104 = arith.constant 104 : index
    %c0_4 = arith.constant 0 : index
    %3 = vector.load %arg2[%c104, %c0_4] : memref<112x128xf32, #tpu.memory_space<vmem>>, vector<1x128xf32>
    %cst = arith.constant dense<0.000000e+00> : vector<8x128xf32>
    %4 = tpu.matmul %1, %2, %cst {dimension_numbers = #tpu.dot_dimension_numbers<[1], [0], [0], [1], [0, 0, 1, 1], [], []>} : vector<8x32xf32>, vector<32x128xf32>, vector<8x128xf32> -> vector<8x128xf32>
    %5 = vector.broadcast %3 : vector<1x128xf32> to vector<8x128xf32>
    %6 = arith.addf %4, %5 : vector<8x128xf32>
    %c108 = arith.constant 108 : index
    %c0_5 = arith.constant 0 : index
    %7 = vector.load %arg2[%c108, %c0_5] : memref<112x128xf32, #tpu.memory_space<vmem>>, vector<1x128xf32>
    %c109 = arith.constant 109 : index
    %c0_6 = arith.constant 0 : index
    %8 = vector.load %arg2[%c109, %c0_6] : memref<112x128xf32, #tpu.memory_space<vmem>>, vector<1x128xf32>
    %c32 = arith.constant 32 : index
    %c0_7 = arith.constant 0 : index
    %9 = vector.load %arg2[%c32, %c0_7] : memref<112x128xf32, #tpu.memory_space<vmem>>, vector<32x128xf32>
    %c105 = arith.constant 105 : index
    %c0_8 = arith.constant 0 : index
    %10 = vector.load %arg2[%c105, %c0_8] : memref<112x128xf32, #tpu.memory_space<vmem>>, vector<1x32xf32>
    %c106 = arith.constant 106 : index
    %c0_9 = arith.constant 0 : index
    %11 = vector.load %arg2[%c106, %c0_9] : memref<112x128xf32, #tpu.memory_space<vmem>>, vector<1x32xf32>
    %12 = tpu.iota {dimensions = array<i32: 0>} : vector<8x32xi32>
    %13 = tpu.iota {dimensions = array<i32: 1>} : vector<8x32xi32>
    %c16_i32 = arith.constant 16 : i32
    %14 = vector.broadcast %c16_i32 : i32 to vector<8x32xi32>
    %15 = arith.cmpi slt, %13, %14 : vector<8x32xi32>
    %cst_10 = arith.constant dense<true> : vector<8x32xi1>
    %16 = arith.xori %15, %cst_10 : vector<8x32xi1>
    %cst_11 = arith.constant 0.000000e+00 : f32
    %17 = vector.broadcast %cst_11 : f32 to vector<8x32xf32>
    %18 = vector.extract_strided_slice %6 {offsets = [0, 0], sizes = [1, 128], strides = [1, 1]} : vector<8x128xf32> to vector<1x128xf32>
    %cst_12 = arith.constant dense<0.000000e+00> : vector<1x128xf32>
    %19 = tpu.matmul %10, %9, %cst_12 {dimension_numbers = #tpu.dot_dimension_numbers<[1], [0], [0], [1], [0, 0, 1, 1], [], []>} : vector<1x32xf32>, vector<32x128xf32>, vector<1x128xf32> -> vector<1x128xf32>
    %20 = arith.addf %18, %19 : vector<1x128xf32>
    %21 = arith.negf %20 : vector<1x128xf32>
    %22 = math.exp %21 : vector<1x128xf32>
    %cst_13 = arith.constant 1.000000e+00 : f32
    %23 = vector.broadcast %cst_13 : f32 to vector<1x128xf32>
    %24 = arith.addf %23, %22 : vector<1x128xf32>
    %25 = arith.divf %23, %24 : vector<1x128xf32>
    %26 = arith.mulf %25, %7 : vector<1x128xf32>
    %27 = arith.addf %26, %8 : vector<1x128xf32>
    %28 = vector.extract_strided_slice %27 {offsets = [0, 0], sizes = [1, 32], strides = [1, 1]} : vector<1x128xf32> to vector<1x32xf32>
    %29 = vector.extract_strided_slice %27 {offsets = [0, 32], sizes = [1, 32], strides = [1, 1]} : vector<1x128xf32> to vector<1x32xf32>
    %30 = vector.extract_strided_slice %27 {offsets = [0, 64], sizes = [1, 32], strides = [1, 1]} : vector<1x128xf32> to vector<1x32xf32>
    %31 = vector.extract_strided_slice %27 {offsets = [0, 96], sizes = [1, 32], strides = [1, 1]} : vector<1x128xf32> to vector<1x32xf32>
    %32 = arith.mulf %29, %11 : vector<1x32xf32>
    %33 = arith.mulf %28, %30 : vector<1x32xf32>
    %34 = arith.addf %32, %33 : vector<1x32xf32>
    %35 = math.tanh %34 : vector<1x32xf32>
    %36 = arith.mulf %31, %35 : vector<1x32xf32>
    %c0_i32 = arith.constant 0 : i32
    %37 = vector.broadcast %c0_i32 : i32 to vector<8x32xi32>
    %38 = arith.cmpi eq, %12, %37 : vector<8x32xi32>
    %39 = arith.andi %38, %15 : vector<8x32xi1>
    %40 = vector.shape_cast %36 : vector<1x32xf32> to vector<1x32xf32>
    %41 = vector.broadcast %40 : vector<1x32xf32> to vector<8x32xf32>
    %42 = arith.select %39, %41, %17 : vector<8x32xi1>, vector<8x32xf32>
    %c7_i32 = arith.constant 7 : i32
    %43 = vector.broadcast %c7_i32 : i32 to vector<8x32xi32>
    %44 = arith.cmpi eq, %12, %43 : vector<8x32xi32>
    %45 = arith.andi %44, %16 : vector<8x32xi1>
    %46 = vector.shape_cast %36 : vector<1x32xf32> to vector<1x32xf32>
    %47 = vector.broadcast %46 : vector<1x32xf32> to vector<8x32xf32>
    %48 = arith.select %45, %47, %42 : vector<8x32xi1>, vector<8x32xf32>
    %49 = vector.extract_strided_slice %6 {offsets = [1, 0], sizes = [1, 128], strides = [1, 1]} : vector<8x128xf32> to vector<1x128xf32>
    %cst_14 = arith.constant dense<0.000000e+00> : vector<1x128xf32>
    %50 = tpu.matmul %36, %9, %cst_14 {dimension_numbers = #tpu.dot_dimension_numbers<[1], [0], [0], [1], [0, 0, 1, 1], [], []>} : vector<1x32xf32>, vector<32x128xf32>, vector<1x128xf32> -> vector<1x128xf32>
    %51 = arith.addf %49, %50 : vector<1x128xf32>
    %52 = arith.negf %51 : vector<1x128xf32>
    %53 = math.exp %52 : vector<1x128xf32>
    %cst_15 = arith.constant 1.000000e+00 : f32
    %54 = vector.broadcast %cst_15 : f32 to vector<1x128xf32>
    %55 = arith.addf %54, %53 : vector<1x128xf32>
    %56 = arith.divf %54, %55 : vector<1x128xf32>
    %57 = arith.mulf %56, %7 : vector<1x128xf32>
    %58 = arith.addf %57, %8 : vector<1x128xf32>
    %59 = vector.extract_strided_slice %58 {offsets = [0, 0], sizes = [1, 32], strides = [1, 1]} : vector<1x128xf32> to vector<1x32xf32>
    %60 = vector.extract_strided_slice %58 {offsets = [0, 32], sizes = [1, 32], strides = [1, 1]} : vector<1x128xf32> to vector<1x32xf32>
    %61 = vector.extract_strided_slice %58 {offsets = [0, 64], sizes = [1, 32], strides = [1, 1]} : vector<1x128xf32> to vector<1x32xf32>
    %62 = vector.extract_strided_slice %58 {offsets = [0, 96], sizes = [1, 32], strides = [1, 1]} : vector<1x128xf32> to vector<1x32xf32>
    %63 = arith.mulf %60, %34 : vector<1x32xf32>
    %64 = arith.mulf %59, %61 : vector<1x32xf32>
    %65 = arith.addf %63, %64 : vector<1x32xf32>
    %66 = math.tanh %65 : vector<1x32xf32>
    %67 = arith.mulf %62, %66 : vector<1x32xf32>
    %c1_i32 = arith.constant 1 : i32
    %68 = vector.broadcast %c1_i32 : i32 to vector<8x32xi32>
    %69 = arith.cmpi eq, %12, %68 : vector<8x32xi32>
    %70 = arith.andi %69, %15 : vector<8x32xi1>
    %71 = vector.shape_cast %67 : vector<1x32xf32> to vector<1x32xf32>
    %72 = vector.broadcast %71 : vector<1x32xf32> to vector<8x32xf32>
    %73 = arith.select %70, %72, %48 : vector<8x32xi1>, vector<8x32xf32>
    %c6_i32 = arith.constant 6 : i32
    %74 = vector.broadcast %c6_i32 : i32 to vector<8x32xi32>
    %75 = arith.cmpi eq, %12, %74 : vector<8x32xi32>
    %76 = arith.andi %75, %16 : vector<8x32xi1>
    %77 = vector.shape_cast %67 : vector<1x32xf32> to vector<1x32xf32>
    %78 = vector.broadcast %77 : vector<1x32xf32> to vector<8x32xf32>
    %79 = arith.select %76, %78, %73 : vector<8x32xi1>, vector<8x32xf32>
    %80 = vector.extract_strided_slice %6 {offsets = [2, 0], sizes = [1, 128], strides = [1, 1]} : vector<8x128xf32> to vector<1x128xf32>
    %cst_16 = arith.constant dense<0.000000e+00> : vector<1x128xf32>
    %81 = tpu.matmul %67, %9, %cst_16 {dimension_numbers = #tpu.dot_dimension_numbers<[1], [0], [0], [1], [0, 0, 1, 1], [], []>} : vector<1x32xf32>, vector<32x128xf32>, vector<1x128xf32> -> vector<1x128xf32>
    %82 = arith.addf %80, %81 : vector<1x128xf32>
    %83 = arith.negf %82 : vector<1x128xf32>
    %84 = math.exp %83 : vector<1x128xf32>
    %cst_17 = arith.constant 1.000000e+00 : f32
    %85 = vector.broadcast %cst_17 : f32 to vector<1x128xf32>
    %86 = arith.addf %85, %84 : vector<1x128xf32>
    %87 = arith.divf %85, %86 : vector<1x128xf32>
    %88 = arith.mulf %87, %7 : vector<1x128xf32>
    %89 = arith.addf %88, %8 : vector<1x128xf32>
    %90 = vector.extract_strided_slice %89 {offsets = [0, 0], sizes = [1, 32], strides = [1, 1]} : vector<1x128xf32> to vector<1x32xf32>
    %91 = vector.extract_strided_slice %89 {offsets = [0, 32], sizes = [1, 32], strides = [1, 1]} : vector<1x128xf32> to vector<1x32xf32>
    %92 = vector.extract_strided_slice %89 {offsets = [0, 64], sizes = [1, 32], strides = [1, 1]} : vector<1x128xf32> to vector<1x32xf32>
    %93 = vector.extract_strided_slice %89 {offsets = [0, 96], sizes = [1, 32], strides = [1, 1]} : vector<1x128xf32> to vector<1x32xf32>
    %94 = arith.mulf %91, %65 : vector<1x32xf32>
    %95 = arith.mulf %90, %92 : vector<1x32xf32>
    %96 = arith.addf %94, %95 : vector<1x32xf32>
    %97 = math.tanh %96 : vector<1x32xf32>
    %98 = arith.mulf %93, %97 : vector<1x32xf32>
    %c2_i32 = arith.constant 2 : i32
    %99 = vector.broadcast %c2_i32 : i32 to vector<8x32xi32>
    %100 = arith.cmpi eq, %12, %99 : vector<8x32xi32>
    %101 = arith.andi %100, %15 : vector<8x32xi1>
    %102 = vector.shape_cast %98 : vector<1x32xf32> to vector<1x32xf32>
    %103 = vector.broadcast %102 : vector<1x32xf32> to vector<8x32xf32>
    %104 = arith.select %101, %103, %79 : vector<8x32xi1>, vector<8x32xf32>
    %c5_i32 = arith.constant 5 : i32
    %105 = vector.broadcast %c5_i32 : i32 to vector<8x32xi32>
    %106 = arith.cmpi eq, %12, %105 : vector<8x32xi32>
    %107 = arith.andi %106, %16 : vector<8x32xi1>
    %108 = vector.shape_cast %98 : vector<1x32xf32> to vector<1x32xf32>
    %109 = vector.broadcast %108 : vector<1x32xf32> to vector<8x32xf32>
    %110 = arith.select %107, %109, %104 : vector<8x32xi1>, vector<8x32xf32>
    %111 = vector.extract_strided_slice %6 {offsets = [3, 0], sizes = [1, 128], strides = [1, 1]} : vector<8x128xf32> to vector<1x128xf32>
    %cst_18 = arith.constant dense<0.000000e+00> : vector<1x128xf32>
    %112 = tpu.matmul %98, %9, %cst_18 {dimension_numbers = #tpu.dot_dimension_numbers<[1], [0], [0], [1], [0, 0, 1, 1], [], []>} : vector<1x32xf32>, vector<32x128xf32>, vector<1x128xf32> -> vector<1x128xf32>
    %113 = arith.addf %111, %112 : vector<1x128xf32>
    %114 = arith.negf %113 : vector<1x128xf32>
    %115 = math.exp %114 : vector<1x128xf32>
    %cst_19 = arith.constant 1.000000e+00 : f32
    %116 = vector.broadcast %cst_19 : f32 to vector<1x128xf32>
    %117 = arith.addf %116, %115 : vector<1x128xf32>
    %118 = arith.divf %116, %117 : vector<1x128xf32>
    %119 = arith.mulf %118, %7 : vector<1x128xf32>
    %120 = arith.addf %119, %8 : vector<1x128xf32>
    %121 = vector.extract_strided_slice %120 {offsets = [0, 0], sizes = [1, 32], strides = [1, 1]} : vector<1x128xf32> to vector<1x32xf32>
    %122 = vector.extract_strided_slice %120 {offsets = [0, 32], sizes = [1, 32], strides = [1, 1]} : vector<1x128xf32> to vector<1x32xf32>
    %123 = vector.extract_strided_slice %120 {offsets = [0, 64], sizes = [1, 32], strides = [1, 1]} : vector<1x128xf32> to vector<1x32xf32>
    %124 = vector.extract_strided_slice %120 {offsets = [0, 96], sizes = [1, 32], strides = [1, 1]} : vector<1x128xf32> to vector<1x32xf32>
    %125 = arith.mulf %122, %96 : vector<1x32xf32>
    %126 = arith.mulf %121, %123 : vector<1x32xf32>
    %127 = arith.addf %125, %126 : vector<1x32xf32>
    %128 = math.tanh %127 : vector<1x32xf32>
    %129 = arith.mulf %124, %128 : vector<1x32xf32>
    %c3_i32 = arith.constant 3 : i32
    %130 = vector.broadcast %c3_i32 : i32 to vector<8x32xi32>
    %131 = arith.cmpi eq, %12, %130 : vector<8x32xi32>
    %132 = arith.andi %131, %15 : vector<8x32xi1>
    %133 = vector.shape_cast %129 : vector<1x32xf32> to vector<1x32xf32>
    %134 = vector.broadcast %133 : vector<1x32xf32> to vector<8x32xf32>
    %135 = arith.select %132, %134, %110 : vector<8x32xi1>, vector<8x32xf32>
    %c4_i32 = arith.constant 4 : i32
    %136 = vector.broadcast %c4_i32 : i32 to vector<8x32xi32>
    %137 = arith.cmpi eq, %12, %136 : vector<8x32xi32>
    %138 = arith.andi %137, %16 : vector<8x32xi1>
    %139 = vector.shape_cast %129 : vector<1x32xf32> to vector<1x32xf32>
    %140 = vector.broadcast %139 : vector<1x32xf32> to vector<8x32xf32>
    %141 = arith.select %138, %140, %135 : vector<8x32xi1>, vector<8x32xf32>
    %142 = vector.extract_strided_slice %6 {offsets = [4, 0], sizes = [1, 128], strides = [1, 1]} : vector<8x128xf32> to vector<1x128xf32>
    %cst_20 = arith.constant dense<0.000000e+00> : vector<1x128xf32>
    %143 = tpu.matmul %129, %9, %cst_20 {dimension_numbers = #tpu.dot_dimension_numbers<[1], [0], [0], [1], [0, 0, 1, 1], [], []>} : vector<1x32xf32>, vector<32x128xf32>, vector<1x128xf32> -> vector<1x128xf32>
    %144 = arith.addf %142, %143 : vector<1x128xf32>
    %145 = arith.negf %144 : vector<1x128xf32>
    %146 = math.exp %145 : vector<1x128xf32>
    %cst_21 = arith.constant 1.000000e+00 : f32
    %147 = vector.broadcast %cst_21 : f32 to vector<1x128xf32>
    %148 = arith.addf %147, %146 : vector<1x128xf32>
    %149 = arith.divf %147, %148 : vector<1x128xf32>
    %150 = arith.mulf %149, %7 : vector<1x128xf32>
    %151 = arith.addf %150, %8 : vector<1x128xf32>
    %152 = vector.extract_strided_slice %151 {offsets = [0, 0], sizes = [1, 32], strides = [1, 1]} : vector<1x128xf32> to vector<1x32xf32>
    %153 = vector.extract_strided_slice %151 {offsets = [0, 32], sizes = [1, 32], strides = [1, 1]} : vector<1x128xf32> to vector<1x32xf32>
    %154 = vector.extract_strided_slice %151 {offsets = [0, 64], sizes = [1, 32], strides = [1, 1]} : vector<1x128xf32> to vector<1x32xf32>
    %155 = vector.extract_strided_slice %151 {offsets = [0, 96], sizes = [1, 32], strides = [1, 1]} : vector<1x128xf32> to vector<1x32xf32>
    %156 = arith.mulf %153, %127 : vector<1x32xf32>
    %157 = arith.mulf %152, %154 : vector<1x32xf32>
    %158 = arith.addf %156, %157 : vector<1x32xf32>
    %159 = math.tanh %158 : vector<1x32xf32>
    %160 = arith.mulf %155, %159 : vector<1x32xf32>
    %c4_i32_22 = arith.constant 4 : i32
    %161 = vector.broadcast %c4_i32_22 : i32 to vector<8x32xi32>
    %162 = arith.cmpi eq, %12, %161 : vector<8x32xi32>
    %163 = arith.andi %162, %15 : vector<8x32xi1>
    %164 = vector.shape_cast %160 : vector<1x32xf32> to vector<1x32xf32>
    %165 = vector.broadcast %164 : vector<1x32xf32> to vector<8x32xf32>
    %166 = arith.select %163, %165, %141 : vector<8x32xi1>, vector<8x32xf32>
    %c3_i32_23 = arith.constant 3 : i32
    %167 = vector.broadcast %c3_i32_23 : i32 to vector<8x32xi32>
    %168 = arith.cmpi eq, %12, %167 : vector<8x32xi32>
    %169 = arith.andi %168, %16 : vector<8x32xi1>
    %170 = vector.shape_cast %160 : vector<1x32xf32> to vector<1x32xf32>
    %171 = vector.broadcast %170 : vector<1x32xf32> to vector<8x32xf32>
    %172 = arith.select %169, %171, %166 : vector<8x32xi1>, vector<8x32xf32>
    %173 = vector.extract_strided_slice %6 {offsets = [5, 0], sizes = [1, 128], strides = [1, 1]} : vector<8x128xf32> to vector<1x128xf32>
    %cst_24 = arith.constant dense<0.000000e+00> : vector<1x128xf32>
    %174 = tpu.matmul %160, %9, %cst_24 {dimension_numbers = #tpu.dot_dimension_numbers<[1], [0], [0], [1], [0, 0, 1, 1], [], []>} : vector<1x32xf32>, vector<32x128xf32>, vector<1x128xf32> -> vector<1x128xf32>
    %175 = arith.addf %173, %174 : vector<1x128xf32>
    %176 = arith.negf %175 : vector<1x128xf32>
    %177 = math.exp %176 : vector<1x128xf32>
    %cst_25 = arith.constant 1.000000e+00 : f32
    %178 = vector.broadcast %cst_25 : f32 to vector<1x128xf32>
    %179 = arith.addf %178, %177 : vector<1x128xf32>
    %180 = arith.divf %178, %179 : vector<1x128xf32>
    %181 = arith.mulf %180, %7 : vector<1x128xf32>
    %182 = arith.addf %181, %8 : vector<1x128xf32>
    %183 = vector.extract_strided_slice %182 {offsets = [0, 0], sizes = [1, 32], strides = [1, 1]} : vector<1x128xf32> to vector<1x32xf32>
    %184 = vector.extract_strided_slice %182 {offsets = [0, 32], sizes = [1, 32], strides = [1, 1]} : vector<1x128xf32> to vector<1x32xf32>
    %185 = vector.extract_strided_slice %182 {offsets = [0, 64], sizes = [1, 32], strides = [1, 1]} : vector<1x128xf32> to vector<1x32xf32>
    %186 = vector.extract_strided_slice %182 {offsets = [0, 96], sizes = [1, 32], strides = [1, 1]} : vector<1x128xf32> to vector<1x32xf32>
    %187 = arith.mulf %184, %158 : vector<1x32xf32>
    %188 = arith.mulf %183, %185 : vector<1x32xf32>
    %189 = arith.addf %187, %188 : vector<1x32xf32>
    %190 = math.tanh %189 : vector<1x32xf32>
    %191 = arith.mulf %186, %190 : vector<1x32xf32>
    %c5_i32_26 = arith.constant 5 : i32
    %192 = vector.broadcast %c5_i32_26 : i32 to vector<8x32xi32>
    %193 = arith.cmpi eq, %12, %192 : vector<8x32xi32>
    %194 = arith.andi %193, %15 : vector<8x32xi1>
    %195 = vector.shape_cast %191 : vector<1x32xf32> to vector<1x32xf32>
    %196 = vector.broadcast %195 : vector<1x32xf32> to vector<8x32xf32>
    %197 = arith.select %194, %196, %172 : vector<8x32xi1>, vector<8x32xf32>
    %c2_i32_27 = arith.constant 2 : i32
    %198 = vector.broadcast %c2_i32_27 : i32 to vector<8x32xi32>
    %199 = arith.cmpi eq, %12, %198 : vector<8x32xi32>
    %200 = arith.andi %199, %16 : vector<8x32xi1>
    %201 = vector.shape_cast %191 : vector<1x32xf32> to vector<1x32xf32>
    %202 = vector.broadcast %201 : vector<1x32xf32> to vector<8x32xf32>
    %203 = arith.select %200, %202, %197 : vector<8x32xi1>, vector<8x32xf32>
    %204 = vector.extract_strided_slice %6 {offsets = [6, 0], sizes = [1, 128], strides = [1, 1]} : vector<8x128xf32> to vector<1x128xf32>
    %cst_28 = arith.constant dense<0.000000e+00> : vector<1x128xf32>
    %205 = tpu.matmul %191, %9, %cst_28 {dimension_numbers = #tpu.dot_dimension_numbers<[1], [0], [0], [1], [0, 0, 1, 1], [], []>} : vector<1x32xf32>, vector<32x128xf32>, vector<1x128xf32> -> vector<1x128xf32>
    %206 = arith.addf %204, %205 : vector<1x128xf32>
    %207 = arith.negf %206 : vector<1x128xf32>
    %208 = math.exp %207 : vector<1x128xf32>
    %cst_29 = arith.constant 1.000000e+00 : f32
    %209 = vector.broadcast %cst_29 : f32 to vector<1x128xf32>
    %210 = arith.addf %209, %208 : vector<1x128xf32>
    %211 = arith.divf %209, %210 : vector<1x128xf32>
    %212 = arith.mulf %211, %7 : vector<1x128xf32>
    %213 = arith.addf %212, %8 : vector<1x128xf32>
    %214 = vector.extract_strided_slice %213 {offsets = [0, 0], sizes = [1, 32], strides = [1, 1]} : vector<1x128xf32> to vector<1x32xf32>
    %215 = vector.extract_strided_slice %213 {offsets = [0, 32], sizes = [1, 32], strides = [1, 1]} : vector<1x128xf32> to vector<1x32xf32>
    %216 = vector.extract_strided_slice %213 {offsets = [0, 64], sizes = [1, 32], strides = [1, 1]} : vector<1x128xf32> to vector<1x32xf32>
    %217 = vector.extract_strided_slice %213 {offsets = [0, 96], sizes = [1, 32], strides = [1, 1]} : vector<1x128xf32> to vector<1x32xf32>
    %218 = arith.mulf %215, %189 : vector<1x32xf32>
    %219 = arith.mulf %214, %216 : vector<1x32xf32>
    %220 = arith.addf %218, %219 : vector<1x32xf32>
    %221 = math.tanh %220 : vector<1x32xf32>
    %222 = arith.mulf %217, %221 : vector<1x32xf32>
    %c6_i32_30 = arith.constant 6 : i32
    %223 = vector.broadcast %c6_i32_30 : i32 to vector<8x32xi32>
    %224 = arith.cmpi eq, %12, %223 : vector<8x32xi32>
    %225 = arith.andi %224, %15 : vector<8x32xi1>
    %226 = vector.shape_cast %222 : vector<1x32xf32> to vector<1x32xf32>
    %227 = vector.broadcast %226 : vector<1x32xf32> to vector<8x32xf32>
    %228 = arith.select %225, %227, %203 : vector<8x32xi1>, vector<8x32xf32>
    %c1_i32_31 = arith.constant 1 : i32
    %229 = vector.broadcast %c1_i32_31 : i32 to vector<8x32xi32>
    %230 = arith.cmpi eq, %12, %229 : vector<8x32xi32>
    %231 = arith.andi %230, %16 : vector<8x32xi1>
    %232 = vector.shape_cast %222 : vector<1x32xf32> to vector<1x32xf32>
    %233 = vector.broadcast %232 : vector<1x32xf32> to vector<8x32xf32>
    %234 = arith.select %231, %233, %228 : vector<8x32xi1>, vector<8x32xf32>
    %235 = vector.extract_strided_slice %6 {offsets = [7, 0], sizes = [1, 128], strides = [1, 1]} : vector<8x128xf32> to vector<1x128xf32>
    %cst_32 = arith.constant dense<0.000000e+00> : vector<1x128xf32>
    %236 = tpu.matmul %222, %9, %cst_32 {dimension_numbers = #tpu.dot_dimension_numbers<[1], [0], [0], [1], [0, 0, 1, 1], [], []>} : vector<1x32xf32>, vector<32x128xf32>, vector<1x128xf32> -> vector<1x128xf32>
    %237 = arith.addf %235, %236 : vector<1x128xf32>
    %238 = arith.negf %237 : vector<1x128xf32>
    %239 = math.exp %238 : vector<1x128xf32>
    %cst_33 = arith.constant 1.000000e+00 : f32
    %240 = vector.broadcast %cst_33 : f32 to vector<1x128xf32>
    %241 = arith.addf %240, %239 : vector<1x128xf32>
    %242 = arith.divf %240, %241 : vector<1x128xf32>
    %243 = arith.mulf %242, %7 : vector<1x128xf32>
    %244 = arith.addf %243, %8 : vector<1x128xf32>
    %245 = vector.extract_strided_slice %244 {offsets = [0, 0], sizes = [1, 32], strides = [1, 1]} : vector<1x128xf32> to vector<1x32xf32>
    %246 = vector.extract_strided_slice %244 {offsets = [0, 32], sizes = [1, 32], strides = [1, 1]} : vector<1x128xf32> to vector<1x32xf32>
    %247 = vector.extract_strided_slice %244 {offsets = [0, 64], sizes = [1, 32], strides = [1, 1]} : vector<1x128xf32> to vector<1x32xf32>
    %248 = vector.extract_strided_slice %244 {offsets = [0, 96], sizes = [1, 32], strides = [1, 1]} : vector<1x128xf32> to vector<1x32xf32>
    %249 = arith.mulf %246, %220 : vector<1x32xf32>
    %250 = arith.mulf %245, %247 : vector<1x32xf32>
    %251 = arith.addf %249, %250 : vector<1x32xf32>
    %252 = math.tanh %251 : vector<1x32xf32>
    %253 = arith.mulf %248, %252 : vector<1x32xf32>
    %c7_i32_34 = arith.constant 7 : i32
    %254 = vector.broadcast %c7_i32_34 : i32 to vector<8x32xi32>
    %255 = arith.cmpi eq, %12, %254 : vector<8x32xi32>
    %256 = arith.andi %255, %15 : vector<8x32xi1>
    %257 = vector.shape_cast %253 : vector<1x32xf32> to vector<1x32xf32>
    %258 = vector.broadcast %257 : vector<1x32xf32> to vector<8x32xf32>
    %259 = arith.select %256, %258, %234 : vector<8x32xi1>, vector<8x32xf32>
    %c0_i32_35 = arith.constant 0 : i32
    %260 = vector.broadcast %c0_i32_35 : i32 to vector<8x32xi32>
    %261 = arith.cmpi eq, %12, %260 : vector<8x32xi32>
    %262 = arith.andi %261, %16 : vector<8x32xi1>
    %263 = vector.shape_cast %253 : vector<1x32xf32> to vector<1x32xf32>
    %264 = vector.broadcast %263 : vector<1x32xf32> to vector<8x32xf32>
    %265 = arith.select %262, %264, %259 : vector<8x32xi1>, vector<8x32xf32>
    %c64 = arith.constant 64 : index
    %c0_36 = arith.constant 0 : index
    %266 = vector.load %arg2[%c64, %c0_36] : memref<112x128xf32, #tpu.memory_space<vmem>>, vector<32x8xf32>
    %c107 = arith.constant 107 : index
    %c0_37 = arith.constant 0 : index
    %267 = vector.load %arg2[%c107, %c0_37] : memref<112x128xf32, #tpu.memory_space<vmem>>, vector<1x8xf32>
    %cst_38 = arith.constant dense<0.000000e+00> : vector<8x8xf32>
    %268 = tpu.matmul %265, %266, %cst_38 {dimension_numbers = #tpu.dot_dimension_numbers<[1], [0], [0], [1], [0, 0, 1, 1], [], []>} : vector<8x32xf32>, vector<32x8xf32>, vector<8x8xf32> -> vector<8x8xf32>
    %269 = vector.broadcast %267 : vector<1x8xf32> to vector<8x8xf32>
    %270 = arith.addf %268, %269 : vector<8x8xf32>
    %271 = math.tanh %270 : vector<8x8xf32>
    %c96 = arith.constant 96 : index
    %c0_39 = arith.constant 0 : index
    %272 = vector.load %arg2[%c96, %c0_39] : memref<112x128xf32, #tpu.memory_space<vmem>>, vector<8x8xf32>
    %273 = tpu.iota {dimensions = array<i32: 1>} : vector<1x8xi32>
    %274 = tpu.iota {dimensions = array<i32: 1>} : vector<8x8xi32>
    %c3_i32_40 = arith.constant 3 : i32
    %275 = vector.broadcast %c3_i32_40 : i32 to vector<1x8xi32>
    %276 = arith.cmpi eq, %273, %275 : vector<1x8xi32>
    %cst_41 = arith.constant 0.000000e+00 : f32
    %cst_42 = arith.constant -1.000000e+04 : f32
    %277 = vector.broadcast %cst_41 : f32 to vector<1x8xf32>
    %278 = vector.broadcast %cst_42 : f32 to vector<1x8xf32>
    %279 = arith.select %276, %277, %278 : vector<1x8xi1>, vector<1x8xf32>
    %280 = vector.broadcast %279 : vector<1x8xf32> to vector<8x8xf32>
    %281 = arith.addf %280, %272 : vector<8x8xf32>
    %cst_43 = arith.constant dense<0xFF800000> : vector<8xf32>
    %282 = vector.multi_reduction <maximumf>, %281, %cst_43 [1] : vector<8x8xf32> to vector<8xf32>
    %283 = vector.shape_cast %282 : vector<8xf32> to vector<8x1xf32>
    %284 = vector.broadcast %283 : vector<8x1xf32> to vector<8x8xf32>
    %285 = arith.cmpf oeq, %281, %284 : vector<8x8xf32>
    %c8_i32 = arith.constant 8 : i32
    %286 = vector.broadcast %c8_i32 : i32 to vector<8x8xi32>
    %287 = arith.select %285, %274, %286 : vector<8x8xi1>, vector<8x8xi32>
    %cst_44 = arith.constant dense<2147483647> : vector<8xi32>
    %288 = vector.multi_reduction <minsi>, %287, %cst_44 [1] : vector<8x8xi32> to vector<8xi32>
    %289 = vector.shape_cast %288 : vector<8xi32> to vector<1x8xi32>
    %cst_45 = arith.constant dense<0xFF800000> : vector<8xf32>
    %290 = vector.multi_reduction <maximumf>, %281, %cst_45 [1] : vector<8x8xf32> to vector<8xf32>
    %291 = vector.shape_cast %290 : vector<8xf32> to vector<1x8xf32>
    %292 = vector.extract_strided_slice %271 {offsets = [0, 0], sizes = [1, 8], strides = [1, 1]} : vector<8x8xf32> to vector<1x8xf32>
    %293 = arith.addf %291, %292 : vector<1x8xf32>
    %294 = vector.broadcast %293 : vector<1x8xf32> to vector<8x8xf32>
    %295 = arith.addf %294, %272 : vector<8x8xf32>
    %cst_46 = arith.constant dense<0xFF800000> : vector<8xf32>
    %296 = vector.multi_reduction <maximumf>, %295, %cst_46 [1] : vector<8x8xf32> to vector<8xf32>
    %297 = vector.shape_cast %296 : vector<8xf32> to vector<8x1xf32>
    %298 = vector.broadcast %297 : vector<8x1xf32> to vector<8x8xf32>
    %299 = arith.cmpf oeq, %295, %298 : vector<8x8xf32>
    %c8_i32_47 = arith.constant 8 : i32
    %300 = vector.broadcast %c8_i32_47 : i32 to vector<8x8xi32>
    %301 = arith.select %299, %274, %300 : vector<8x8xi1>, vector<8x8xi32>
    %cst_48 = arith.constant dense<2147483647> : vector<8xi32>
    %302 = vector.multi_reduction <minsi>, %301, %cst_48 [1] : vector<8x8xi32> to vector<8xi32>
    %303 = vector.shape_cast %302 : vector<8xi32> to vector<1x8xi32>
    %cst_49 = arith.constant dense<0xFF800000> : vector<8xf32>
    %304 = vector.multi_reduction <maximumf>, %295, %cst_49 [1] : vector<8x8xf32> to vector<8xf32>
    %305 = vector.shape_cast %304 : vector<8xf32> to vector<1x8xf32>
    %306 = vector.extract_strided_slice %271 {offsets = [1, 0], sizes = [1, 8], strides = [1, 1]} : vector<8x8xf32> to vector<1x8xf32>
    %307 = arith.addf %305, %306 : vector<1x8xf32>
    %308 = vector.broadcast %307 : vector<1x8xf32> to vector<8x8xf32>
    %309 = arith.addf %308, %272 : vector<8x8xf32>
    %cst_50 = arith.constant dense<0xFF800000> : vector<8xf32>
    %310 = vector.multi_reduction <maximumf>, %309, %cst_50 [1] : vector<8x8xf32> to vector<8xf32>
    %311 = vector.shape_cast %310 : vector<8xf32> to vector<8x1xf32>
    %312 = vector.broadcast %311 : vector<8x1xf32> to vector<8x8xf32>
    %313 = arith.cmpf oeq, %309, %312 : vector<8x8xf32>
    %c8_i32_51 = arith.constant 8 : i32
    %314 = vector.broadcast %c8_i32_51 : i32 to vector<8x8xi32>
    %315 = arith.select %313, %274, %314 : vector<8x8xi1>, vector<8x8xi32>
    %cst_52 = arith.constant dense<2147483647> : vector<8xi32>
    %316 = vector.multi_reduction <minsi>, %315, %cst_52 [1] : vector<8x8xi32> to vector<8xi32>
    %317 = vector.shape_cast %316 : vector<8xi32> to vector<1x8xi32>
    %cst_53 = arith.constant dense<0xFF800000> : vector<8xf32>
    %318 = vector.multi_reduction <maximumf>, %309, %cst_53 [1] : vector<8x8xf32> to vector<8xf32>
    %319 = vector.shape_cast %318 : vector<8xf32> to vector<1x8xf32>
    %320 = vector.extract_strided_slice %271 {offsets = [2, 0], sizes = [1, 8], strides = [1, 1]} : vector<8x8xf32> to vector<1x8xf32>
    %321 = arith.addf %319, %320 : vector<1x8xf32>
    %322 = vector.broadcast %321 : vector<1x8xf32> to vector<8x8xf32>
    %323 = arith.addf %322, %272 : vector<8x8xf32>
    %cst_54 = arith.constant dense<0xFF800000> : vector<8xf32>
    %324 = vector.multi_reduction <maximumf>, %323, %cst_54 [1] : vector<8x8xf32> to vector<8xf32>
    %325 = vector.shape_cast %324 : vector<8xf32> to vector<8x1xf32>
    %326 = vector.broadcast %325 : vector<8x1xf32> to vector<8x8xf32>
    %327 = arith.cmpf oeq, %323, %326 : vector<8x8xf32>
    %c8_i32_55 = arith.constant 8 : i32
    %328 = vector.broadcast %c8_i32_55 : i32 to vector<8x8xi32>
    %329 = arith.select %327, %274, %328 : vector<8x8xi1>, vector<8x8xi32>
    %cst_56 = arith.constant dense<2147483647> : vector<8xi32>
    %330 = vector.multi_reduction <minsi>, %329, %cst_56 [1] : vector<8x8xi32> to vector<8xi32>
    %331 = vector.shape_cast %330 : vector<8xi32> to vector<1x8xi32>
    %cst_57 = arith.constant dense<0xFF800000> : vector<8xf32>
    %332 = vector.multi_reduction <maximumf>, %323, %cst_57 [1] : vector<8x8xf32> to vector<8xf32>
    %333 = vector.shape_cast %332 : vector<8xf32> to vector<1x8xf32>
    %334 = vector.extract_strided_slice %271 {offsets = [3, 0], sizes = [1, 8], strides = [1, 1]} : vector<8x8xf32> to vector<1x8xf32>
    %335 = arith.addf %333, %334 : vector<1x8xf32>
    %336 = vector.broadcast %335 : vector<1x8xf32> to vector<8x8xf32>
    %337 = arith.addf %336, %272 : vector<8x8xf32>
    %cst_58 = arith.constant dense<0xFF800000> : vector<8xf32>
    %338 = vector.multi_reduction <maximumf>, %337, %cst_58 [1] : vector<8x8xf32> to vector<8xf32>
    %339 = vector.shape_cast %338 : vector<8xf32> to vector<8x1xf32>
    %340 = vector.broadcast %339 : vector<8x1xf32> to vector<8x8xf32>
    %341 = arith.cmpf oeq, %337, %340 : vector<8x8xf32>
    %c8_i32_59 = arith.constant 8 : i32
    %342 = vector.broadcast %c8_i32_59 : i32 to vector<8x8xi32>
    %343 = arith.select %341, %274, %342 : vector<8x8xi1>, vector<8x8xi32>
    %cst_60 = arith.constant dense<2147483647> : vector<8xi32>
    %344 = vector.multi_reduction <minsi>, %343, %cst_60 [1] : vector<8x8xi32> to vector<8xi32>
    %345 = vector.shape_cast %344 : vector<8xi32> to vector<1x8xi32>
    %cst_61 = arith.constant dense<0xFF800000> : vector<8xf32>
    %346 = vector.multi_reduction <maximumf>, %337, %cst_61 [1] : vector<8x8xf32> to vector<8xf32>
    %347 = vector.shape_cast %346 : vector<8xf32> to vector<1x8xf32>
    %348 = vector.extract_strided_slice %271 {offsets = [4, 0], sizes = [1, 8], strides = [1, 1]} : vector<8x8xf32> to vector<1x8xf32>
    %349 = arith.addf %347, %348 : vector<1x8xf32>
    %350 = vector.broadcast %349 : vector<1x8xf32> to vector<8x8xf32>
    %351 = arith.addf %350, %272 : vector<8x8xf32>
    %cst_62 = arith.constant dense<0xFF800000> : vector<8xf32>
    %352 = vector.multi_reduction <maximumf>, %351, %cst_62 [1] : vector<8x8xf32> to vector<8xf32>
    %353 = vector.shape_cast %352 : vector<8xf32> to vector<8x1xf32>
    %354 = vector.broadcast %353 : vector<8x1xf32> to vector<8x8xf32>
    %355 = arith.cmpf oeq, %351, %354 : vector<8x8xf32>
    %c8_i32_63 = arith.constant 8 : i32
    %356 = vector.broadcast %c8_i32_63 : i32 to vector<8x8xi32>
    %357 = arith.select %355, %274, %356 : vector<8x8xi1>, vector<8x8xi32>
    %cst_64 = arith.constant dense<2147483647> : vector<8xi32>
    %358 = vector.multi_reduction <minsi>, %357, %cst_64 [1] : vector<8x8xi32> to vector<8xi32>
    %359 = vector.shape_cast %358 : vector<8xi32> to vector<1x8xi32>
    %cst_65 = arith.constant dense<0xFF800000> : vector<8xf32>
    %360 = vector.multi_reduction <maximumf>, %351, %cst_65 [1] : vector<8x8xf32> to vector<8xf32>
    %361 = vector.shape_cast %360 : vector<8xf32> to vector<1x8xf32>
    %362 = vector.extract_strided_slice %271 {offsets = [5, 0], sizes = [1, 8], strides = [1, 1]} : vector<8x8xf32> to vector<1x8xf32>
    %363 = arith.addf %361, %362 : vector<1x8xf32>
    %364 = vector.broadcast %363 : vector<1x8xf32> to vector<8x8xf32>
    %365 = arith.addf %364, %272 : vector<8x8xf32>
    %cst_66 = arith.constant dense<0xFF800000> : vector<8xf32>
    %366 = vector.multi_reduction <maximumf>, %365, %cst_66 [1] : vector<8x8xf32> to vector<8xf32>
    %367 = vector.shape_cast %366 : vector<8xf32> to vector<8x1xf32>
    %368 = vector.broadcast %367 : vector<8x1xf32> to vector<8x8xf32>
    %369 = arith.cmpf oeq, %365, %368 : vector<8x8xf32>
    %c8_i32_67 = arith.constant 8 : i32
    %370 = vector.broadcast %c8_i32_67 : i32 to vector<8x8xi32>
    %371 = arith.select %369, %274, %370 : vector<8x8xi1>, vector<8x8xi32>
    %cst_68 = arith.constant dense<2147483647> : vector<8xi32>
    %372 = vector.multi_reduction <minsi>, %371, %cst_68 [1] : vector<8x8xi32> to vector<8xi32>
    %373 = vector.shape_cast %372 : vector<8xi32> to vector<1x8xi32>
    %cst_69 = arith.constant dense<0xFF800000> : vector<8xf32>
    %374 = vector.multi_reduction <maximumf>, %365, %cst_69 [1] : vector<8x8xf32> to vector<8xf32>
    %375 = vector.shape_cast %374 : vector<8xf32> to vector<1x8xf32>
    %376 = vector.extract_strided_slice %271 {offsets = [6, 0], sizes = [1, 8], strides = [1, 1]} : vector<8x8xf32> to vector<1x8xf32>
    %377 = arith.addf %375, %376 : vector<1x8xf32>
    %378 = vector.broadcast %377 : vector<1x8xf32> to vector<8x8xf32>
    %379 = arith.addf %378, %272 : vector<8x8xf32>
    %cst_70 = arith.constant dense<0xFF800000> : vector<8xf32>
    %380 = vector.multi_reduction <maximumf>, %379, %cst_70 [1] : vector<8x8xf32> to vector<8xf32>
    %381 = vector.shape_cast %380 : vector<8xf32> to vector<8x1xf32>
    %382 = vector.broadcast %381 : vector<8x1xf32> to vector<8x8xf32>
    %383 = arith.cmpf oeq, %379, %382 : vector<8x8xf32>
    %c8_i32_71 = arith.constant 8 : i32
    %384 = vector.broadcast %c8_i32_71 : i32 to vector<8x8xi32>
    %385 = arith.select %383, %274, %384 : vector<8x8xi1>, vector<8x8xi32>
    %cst_72 = arith.constant dense<2147483647> : vector<8xi32>
    %386 = vector.multi_reduction <minsi>, %385, %cst_72 [1] : vector<8x8xi32> to vector<8xi32>
    %387 = vector.shape_cast %386 : vector<8xi32> to vector<1x8xi32>
    %cst_73 = arith.constant dense<0xFF800000> : vector<8xf32>
    %388 = vector.multi_reduction <maximumf>, %379, %cst_73 [1] : vector<8x8xf32> to vector<8xf32>
    %389 = vector.shape_cast %388 : vector<8xf32> to vector<1x8xf32>
    %390 = vector.extract_strided_slice %271 {offsets = [7, 0], sizes = [1, 8], strides = [1, 1]} : vector<8x8xf32> to vector<1x8xf32>
    %391 = arith.addf %389, %390 : vector<1x8xf32>
    %392 = vector.extract_strided_slice %272 {offsets = [4, 0], sizes = [1, 8], strides = [1, 1]} : vector<8x8xf32> to vector<1x8xf32>
    %393 = arith.addf %391, %392 : vector<1x8xf32>
    %cst_74 = arith.constant dense<0xFF800000> : vector<1xf32>
    %394 = vector.multi_reduction <maximumf>, %393, %cst_74 [1] : vector<1x8xf32> to vector<1xf32>
    %395 = vector.shape_cast %394 : vector<1xf32> to vector<1x1xf32>
    %396 = vector.broadcast %395 : vector<1x1xf32> to vector<1x8xf32>
    %397 = arith.cmpf oeq, %393, %396 : vector<1x8xf32>
    %c8_i32_75 = arith.constant 8 : i32
    %398 = vector.broadcast %c8_i32_75 : i32 to vector<1x8xi32>
    %399 = arith.select %397, %273, %398 : vector<1x8xi1>, vector<1x8xi32>
    %cst_76 = arith.constant dense<2147483647> : vector<1xi32>
    %400 = vector.multi_reduction <minsi>, %399, %cst_76 [1] : vector<1x8xi32> to vector<1xi32>
    %401 = vector.shape_cast %400 : vector<1xi32> to vector<1x1xi32>
    %402 = tpu.iota {dimensions = array<i32: 1>} : vector<1x128xi32>
    %c0_i32_77 = arith.constant 0 : i32
    %403 = vector.broadcast %c0_i32_77 : i32 to vector<1x128xi32>
    %c7_i32_78 = arith.constant 7 : i32
    %404 = vector.broadcast %c7_i32_78 : i32 to vector<1x128xi32>
    %405 = arith.cmpi eq, %402, %404 : vector<1x128xi32>
    %406 = vector.shape_cast %401 : vector<1x1xi32> to vector<1x1xi32>
    %407 = vector.broadcast %406 : vector<1x1xi32> to vector<1x128xi32>
    %408 = arith.select %405, %407, %403 : vector<1x128xi1>, vector<1x128xi32>
    %409 = vector.broadcast %401 : vector<1x1xi32> to vector<1x8xi32>
    %410 = arith.cmpi eq, %273, %409 : vector<1x8xi32>
    %c-1_i32 = arith.constant -1 : i32
    %411 = vector.broadcast %c-1_i32 : i32 to vector<1x8xi32>
    %412 = arith.select %410, %387, %411 : vector<1x8xi1>, vector<1x8xi32>
    %cst_79 = arith.constant dense<-2147483648> : vector<1xi32>
    %413 = vector.multi_reduction <maxsi>, %412, %cst_79 [1] : vector<1x8xi32> to vector<1xi32>
    %414 = vector.shape_cast %413 : vector<1xi32> to vector<1x1xi32>
    %c6_i32_80 = arith.constant 6 : i32
    %415 = vector.broadcast %c6_i32_80 : i32 to vector<1x128xi32>
    %416 = arith.cmpi eq, %402, %415 : vector<1x128xi32>
    %417 = vector.shape_cast %414 : vector<1x1xi32> to vector<1x1xi32>
    %418 = vector.broadcast %417 : vector<1x1xi32> to vector<1x128xi32>
    %419 = arith.select %416, %418, %408 : vector<1x128xi1>, vector<1x128xi32>
    %420 = vector.broadcast %414 : vector<1x1xi32> to vector<1x8xi32>
    %421 = arith.cmpi eq, %273, %420 : vector<1x8xi32>
    %c-1_i32_81 = arith.constant -1 : i32
    %422 = vector.broadcast %c-1_i32_81 : i32 to vector<1x8xi32>
    %423 = arith.select %421, %373, %422 : vector<1x8xi1>, vector<1x8xi32>
    %cst_82 = arith.constant dense<-2147483648> : vector<1xi32>
    %424 = vector.multi_reduction <maxsi>, %423, %cst_82 [1] : vector<1x8xi32> to vector<1xi32>
    %425 = vector.shape_cast %424 : vector<1xi32> to vector<1x1xi32>
    %c5_i32_83 = arith.constant 5 : i32
    %426 = vector.broadcast %c5_i32_83 : i32 to vector<1x128xi32>
    %427 = arith.cmpi eq, %402, %426 : vector<1x128xi32>
    %428 = vector.shape_cast %425 : vector<1x1xi32> to vector<1x1xi32>
    %429 = vector.broadcast %428 : vector<1x1xi32> to vector<1x128xi32>
    %430 = arith.select %427, %429, %419 : vector<1x128xi1>, vector<1x128xi32>
    %431 = vector.broadcast %425 : vector<1x1xi32> to vector<1x8xi32>
    %432 = arith.cmpi eq, %273, %431 : vector<1x8xi32>
    %c-1_i32_84 = arith.constant -1 : i32
    %433 = vector.broadcast %c-1_i32_84 : i32 to vector<1x8xi32>
    %434 = arith.select %432, %359, %433 : vector<1x8xi1>, vector<1x8xi32>
    %cst_85 = arith.constant dense<-2147483648> : vector<1xi32>
    %435 = vector.multi_reduction <maxsi>, %434, %cst_85 [1] : vector<1x8xi32> to vector<1xi32>
    %436 = vector.shape_cast %435 : vector<1xi32> to vector<1x1xi32>
    %c4_i32_86 = arith.constant 4 : i32
    %437 = vector.broadcast %c4_i32_86 : i32 to vector<1x128xi32>
    %438 = arith.cmpi eq, %402, %437 : vector<1x128xi32>
    %439 = vector.shape_cast %436 : vector<1x1xi32> to vector<1x1xi32>
    %440 = vector.broadcast %439 : vector<1x1xi32> to vector<1x128xi32>
    %441 = arith.select %438, %440, %430 : vector<1x128xi1>, vector<1x128xi32>
    %442 = vector.broadcast %436 : vector<1x1xi32> to vector<1x8xi32>
    %443 = arith.cmpi eq, %273, %442 : vector<1x8xi32>
    %c-1_i32_87 = arith.constant -1 : i32
    %444 = vector.broadcast %c-1_i32_87 : i32 to vector<1x8xi32>
    %445 = arith.select %443, %345, %444 : vector<1x8xi1>, vector<1x8xi32>
    %cst_88 = arith.constant dense<-2147483648> : vector<1xi32>
    %446 = vector.multi_reduction <maxsi>, %445, %cst_88 [1] : vector<1x8xi32> to vector<1xi32>
    %447 = vector.shape_cast %446 : vector<1xi32> to vector<1x1xi32>
    %c3_i32_89 = arith.constant 3 : i32
    %448 = vector.broadcast %c3_i32_89 : i32 to vector<1x128xi32>
    %449 = arith.cmpi eq, %402, %448 : vector<1x128xi32>
    %450 = vector.shape_cast %447 : vector<1x1xi32> to vector<1x1xi32>
    %451 = vector.broadcast %450 : vector<1x1xi32> to vector<1x128xi32>
    %452 = arith.select %449, %451, %441 : vector<1x128xi1>, vector<1x128xi32>
    %453 = vector.broadcast %447 : vector<1x1xi32> to vector<1x8xi32>
    %454 = arith.cmpi eq, %273, %453 : vector<1x8xi32>
    %c-1_i32_90 = arith.constant -1 : i32
    %455 = vector.broadcast %c-1_i32_90 : i32 to vector<1x8xi32>
    %456 = arith.select %454, %331, %455 : vector<1x8xi1>, vector<1x8xi32>
    %cst_91 = arith.constant dense<-2147483648> : vector<1xi32>
    %457 = vector.multi_reduction <maxsi>, %456, %cst_91 [1] : vector<1x8xi32> to vector<1xi32>
    %458 = vector.shape_cast %457 : vector<1xi32> to vector<1x1xi32>
    %c2_i32_92 = arith.constant 2 : i32
    %459 = vector.broadcast %c2_i32_92 : i32 to vector<1x128xi32>
    %460 = arith.cmpi eq, %402, %459 : vector<1x128xi32>
    %461 = vector.shape_cast %458 : vector<1x1xi32> to vector<1x1xi32>
    %462 = vector.broadcast %461 : vector<1x1xi32> to vector<1x128xi32>
    %463 = arith.select %460, %462, %452 : vector<1x128xi1>, vector<1x128xi32>
    %464 = vector.broadcast %458 : vector<1x1xi32> to vector<1x8xi32>
    %465 = arith.cmpi eq, %273, %464 : vector<1x8xi32>
    %c-1_i32_93 = arith.constant -1 : i32
    %466 = vector.broadcast %c-1_i32_93 : i32 to vector<1x8xi32>
    %467 = arith.select %465, %317, %466 : vector<1x8xi1>, vector<1x8xi32>
    %cst_94 = arith.constant dense<-2147483648> : vector<1xi32>
    %468 = vector.multi_reduction <maxsi>, %467, %cst_94 [1] : vector<1x8xi32> to vector<1xi32>
    %469 = vector.shape_cast %468 : vector<1xi32> to vector<1x1xi32>
    %c1_i32_95 = arith.constant 1 : i32
    %470 = vector.broadcast %c1_i32_95 : i32 to vector<1x128xi32>
    %471 = arith.cmpi eq, %402, %470 : vector<1x128xi32>
    %472 = vector.shape_cast %469 : vector<1x1xi32> to vector<1x1xi32>
    %473 = vector.broadcast %472 : vector<1x1xi32> to vector<1x128xi32>
    %474 = arith.select %471, %473, %463 : vector<1x128xi1>, vector<1x128xi32>
    %475 = vector.broadcast %469 : vector<1x1xi32> to vector<1x8xi32>
    %476 = arith.cmpi eq, %273, %475 : vector<1x8xi32>
    %c-1_i32_96 = arith.constant -1 : i32
    %477 = vector.broadcast %c-1_i32_96 : i32 to vector<1x8xi32>
    %478 = arith.select %476, %303, %477 : vector<1x8xi1>, vector<1x8xi32>
    %cst_97 = arith.constant dense<-2147483648> : vector<1xi32>
    %479 = vector.multi_reduction <maxsi>, %478, %cst_97 [1] : vector<1x8xi32> to vector<1xi32>
    %480 = vector.shape_cast %479 : vector<1xi32> to vector<1x1xi32>
    %c0_i32_98 = arith.constant 0 : i32
    %481 = vector.broadcast %c0_i32_98 : i32 to vector<1x128xi32>
    %482 = arith.cmpi eq, %402, %481 : vector<1x128xi32>
    %483 = vector.shape_cast %480 : vector<1x1xi32> to vector<1x1xi32>
    %484 = vector.broadcast %483 : vector<1x1xi32> to vector<1x128xi32>
    %485 = arith.select %482, %484, %474 : vector<1x128xi1>, vector<1x128xi32>
    %486 = vector.broadcast %480 : vector<1x1xi32> to vector<1x8xi32>
    %487 = arith.cmpi eq, %273, %486 : vector<1x8xi32>
    %c-1_i32_99 = arith.constant -1 : i32
    %488 = vector.broadcast %c-1_i32_99 : i32 to vector<1x8xi32>
    %489 = arith.select %487, %289, %488 : vector<1x8xi1>, vector<1x8xi32>
    %cst_100 = arith.constant dense<-2147483648> : vector<1xi32>
    %490 = vector.multi_reduction <maxsi>, %489, %cst_100 [1] : vector<1x8xi32> to vector<1xi32>
    %491 = vector.shape_cast %490 : vector<1xi32> to vector<1x1xi32>
    %c8_i32_101 = arith.constant 8 : i32
    %492 = vector.broadcast %c8_i32_101 : i32 to vector<1x128xi32>
    %493 = arith.cmpi eq, %402, %492 : vector<1x128xi32>
    %494 = vector.shape_cast %491 : vector<1x1xi32> to vector<1x1xi32>
    %495 = vector.broadcast %494 : vector<1x1xi32> to vector<1x128xi32>
    %496 = arith.select %493, %495, %485 : vector<1x128xi1>, vector<1x128xi32>
    %497 = tpu.bitcast %395 : vector<1x1xf32> -> vector<1x1xi32>
    %c9_i32 = arith.constant 9 : i32
    %498 = vector.broadcast %c9_i32 : i32 to vector<1x128xi32>
    %499 = arith.cmpi eq, %402, %498 : vector<1x128xi32>
    %500 = vector.shape_cast %497 : vector<1x1xi32> to vector<1x1xi32>
    %501 = vector.broadcast %500 : vector<1x1xi32> to vector<1x128xi32>
    %502 = arith.select %499, %501, %496 : vector<1x128xi1>, vector<1x128xi32>
    %c0_102 = arith.constant 0 : index
    %c0_103 = arith.constant 0 : index
    %c0_104 = arith.constant 0 : index
    %503 = vector.load %arg3[%c0_102, %c0_103, %c0_104] : memref<1x1x128xi32, #tpu.memory_space<vmem>>, vector<1x1x128xi32>
    %504 = vector.shape_cast %503 : vector<1x1x128xi32> to vector<1x128xi32>
    %505 = vector.shape_cast %502 : vector<1x128xi32> to vector<1x1x128xi32>
    tpu.vector_store %arg3[%c0_102, %c0_103, %c0_104], %505 {strides = array<i32>} : memref<1x1x128xi32, #tpu.memory_space<vmem>>, vector<1x1x128xi32>,
    return
  }
  func.func @transform_0(%arg0: i32) -> (i32, i32, i32) {
    %c0_i32 = arith.constant 0 : i32
    %c0_i32_0 = arith.constant 0 : i32
    %c0_i32_1 = arith.constant 0 : i32
    return %arg0, %c0_i32, %c0_i32_0 : i32, i32, i32
  }
  func.func @transform_1(%arg0: i32) -> (i32, i32) {
    %c0_i32 = arith.constant 0 : i32
    %c0_i32_0 = arith.constant 0 : i32
    %c0_i32_1 = arith.constant 0 : i32
    return %c0_i32, %c0_i32_0 : i32, i32
  }
  func.func @transform_2(%arg0: i32) -> (i32, i32, i32) {
    %c0_i32 = arith.constant 0 : i32
    %c0_i32_0 = arith.constant 0 : i32
    %c0_i32_1 = arith.constant 0 : i32
    return %arg0, %c0_i32, %c0_i32_0 : i32, i32, i32
  }
}

</mosaic_0001>

<bundles_post_ra>
// kernel: bilstm_crf_forward_batched.1
= control target key start
LH: loop header
LB: loop body
LE: loop exit
PB: predicated region body
PF: predicated region fallthrough
CT: control target
= control target key end

     0   :  { %s3621_s9 = smov 0   ;;  %s4758_s0 = inlined_call_operand.vmem [shape: f32[2,8,32], index: 0, kind: input, shape index: {}]   ;;  %s4759_s1 = inlined_call_operand.vmem [shape: f32[112,128], index: 1, kind: input, shape index: {}]   ;;  %s4760_s2 = inlined_call_operand.vmem [shape: s32[2,1,128], index: 2, kind: output, shape index: {}]  }
   0x1 LB: > { %s3274_s10 = sadd.s32 4294967295, %s3596_s9   ;;  %p3278_p0 = scmp.ge.s32.totalorder %s3596_s9, 1  ;;  %s3596_s9 = sphi %s3621_s9, %s12_s9  }
   0x2   : > { %p111_p1 = scmp.lt.s32.totalorder %s3596_s9, 3 }
   0x4   : > { %p112_p2 = pnand %p3278_p0, %p111_p1 }
   0x6   : > { %115 = sbr.rel (%p112_p2) target bundleno = 11435 (0x2cab), region = 28 }
   0xd   : > { %v138_v0 = vld [vmem:[%s4759_s1] sm:$0xff]  ;;  %v139_v1 = vld [vmem:[%s4759_s1 + $0x8] sm:$0xff]  ;;  %v3598_v3 = vmov 0.0|0.0   ;;  %v140_v6 = vld [vmem:[%s4759_s1 + $0x10] sm:$0xff]  ;;  %p130_p3 = scmp.lt.s32.totalorder %s3274_s10, 1  ;;  %vm3599_vm0 = vmmov 0  }
   0xe   : > { %v223_v2 = vld [vmem:[%s4759_s1 + $0x20] sm:$0xff]  ;;  %3462 = vmatprep.subr.bf16.mxu0 %v3598_v3  ;;  %v3463_v4 = vpack.c.bf16 %v139_v1, %v138_v0  ;;  %3468 = vmatprep.subr.bf16.mxu1 %v3598_v3  ;;  %v224_v5 = vld [vmem:[%s4759_s1 + $0x28] sm:$0xff]  ;;  %v141_v7 = vld [vmem:[%s4759_s1 + $0x18] sm:$0xff]  ;;  %v3600_v11 = vmov 0.0   ;;  %vm147_vm1 = vcmask 261120   ;;  %s3601_s13 = smov 64  }
   0xf   : > { %v3649_v8 = vpack.c.bf16 %v224_v5, %v223_v2  ;;  %v225_v9 = vld [vmem:[%s4759_s1 + $0x30] sm:$0xff]  ;;  %v226_v10 = vld [vmem:[%s4759_s1 + $0x38] sm:$0xff]  ;;  %3360 = vmatprep.mubr.msk.f32.mxu0 %vm3599_vm0, %v3600_v11  ;;  %3371 = vmatprep.mubr.msk.f32.mxu1 %vm3599_vm0, %v3600_v11  ;;  %v3466_v12 = vpack.c.bf16 %v141_v7, %v140_v6  ;;  %s4871_s10 = smov (!%p130_p3, %s3274_s10), 1  ;;  %v227_v15 = vld [vmem:[%s4759_s1 + $0x69] sm:$0x1]  ;;  %s3602_s16 = smov 32  }
  0x10   : > { %3464 = vmatpush3.bf16.msra.mxu0 %v3463_v4  ;;  %v3665_v13 = vpack.c.bf16 %v226_v10, %v225_v9  ;;  %s3279_s27 = sshll.u32 %s4871_s10, 3  ;;  %v3280_v16 = vld [vmem:[%s4759_s1 + $0x68] ss:$0 sm:$0xff]  ;;  %v3701_v26 = vld [vmem:[%s4759_s1 + $0x6c] sm:$0x1]  ;;  %vm4762_vm3 = vcmask 64512   ;;  %s136_s3 = scalar_lea.vmem %s4760_s2, %s4871_s10 }
  0x11   : > { %3470 = vmatpush3.bf16.msra.mxu1 %v3649_v8  ;;  %3465 = vmatprep.subr.bf16.mxu0 %v3598_v3  ;;  %s133_s30 = scalar_lea.vmem %s4758_s0, %s3279_s27  ;;  %v3706_v28 = vld [vmem:[%s4759_s1 + $0x6d] sm:$0x1]  ;;  %v228_v31 = vld [vmem:[%s4759_s1 + $0x6a] sm:$0x1]  ;;  %v438_v49 = vrot.slane %v3701_v26, 7  ;;  %v565_v10 = vrot.slane %v3701_v26, 6 }
  0x12   : > { %3471 = vmatprep.subr.bf16.mxu1 %v3598_v3  ;;  %v137_v14 = vld [vmem:[%s133_s30] sm:$0xff]  ;;  %v442_v50 = vrot.slane %v3706_v28, 7  ;;  %vm3604_vm6 = vmmov 1  }
  0x14   : > { %3467 = vmatpush3.bf16.msra.mxu0 %v3466_v12  ;;  %v568_v12 = vrot.slane %v3706_v28, 6 }
  0x15   : > { %3473 = vmatpush3.bf16.msra.mxu1 %v3665_v13  ;;  %3474 = vmatprep.subr.bf16.mxu0 %v3598_v3 }
  0x16   : > { %3480 = vmatprep.subr.bf16.mxu1 %v3598_v3 }
  0x17   : > { %3361 = vmatmul.mubr.msk.f32.vlgmr.msra.gmra.mrb[0].mxu0 %vm147_vm1, %v137_v14 }
  0x18   : > { %3372 = vmatmul.mubr.msk.f32.vlgmr.msra.gmra.mrb[0].mxu1 %vm147_vm1, %v227_v15  ;;  %3476 = vmatpush3.bf16.msra.mxu0 %v3649_v8 }
  0x19   : > { %3477 = vmatprep.subr.bf16.mxu0 %v3598_v3  ;;  %3382 = vmatprep.mubr.msk.f32.mxu0 %vm3599_vm0, %v3600_v11 }
  0x1a   : > { %3482 = vmatpush3.bf16.msra.mxu1 %v3649_v8  ;;  %3393 = vmatprep.mubr.msk.f32.mxu1 %vm3599_vm0, %v3600_v11 }
  0x1b   : > { %3483 = vmatprep.subr.bf16.mxu1 %v3598_v3 }
  0x1c   : > { %3479 = vmatpush3.bf16.msra.mxu0 %v3665_v13 }
  0x1d   : > { %3486 = vmatprep.subr.bf16.mxu0 %v3598_v3 }
  0x1e   : > { %3485 = vmatpush3.bf16.msra.mxu1 %v3665_v13 }
  0x1f   : > { %3492 = vmatprep.subr.bf16.mxu1 %v3598_v3 }
  0xea   : > { %v217_v17 = vpop.f32.mrb[0].mxu0 }
  0xeb   : > { %v3695_v18 = vadd.f32 %v3280_v16, %v217_v17  ;;  %v3362_v19 = vpop.f32.mrb[1].mxu0  ;;  %v304_v20 = vpop.f32.mrb[0].mxu1 }
  0xec   : > { %v3373_v21 = vpop.f32.mrb[1].mxu1 }
  0xed   : > { %v308_v22 = vadd.f32 %v304_v20, %v3695_v18 }
  0xef   : > { %v3283_v23 = vmul.f32 -1.442695, %v308_v22 }
  0xf1   : > { %3540 = vpow2.f32 %v3283_v23 }
  0xfb   : > { %v3541_v24 = vpop.eup %3540 }
  0xfc   : > { %v312_v25 = vadd.f32 1.0, %v3541_v24 }
  0xfe   : > { %3542 = vrcp.f32 %v312_v25 }
 0x108   : > { %v3543_v27 = vpop.eup %3542 }
 0x109   : > { %v315_v29 = vmul.f32 %v3543_v27, %v3701_v26 }
 0x10b   : > { %v316_v30 = vadd.f32 %v315_v29, %v3706_v28 }
 0x10d   : > { %323 = vrot.lane.b32.xlu0 %v316_v30, %s3601_s13 }
 0x111   : > { %318 = vrot.lane.b32.xlu0 %v228_v31, %s3602_s16 }
 0x17f   : > { %v324_v32 = vpop.permute.xlu0 %323 }
 0x180   : > { %v326_v33 = vmul.f32 %v324_v32, %v316_v30 }
 0x182   : > { %328 = vrot.lane.b32.xlu1 %v326_v33, %s3602_s16 }
 0x183   : > { %v319_v34 = vpop.permute.xlu0 %318 }
 0x184   : > { %v321_v35 = vmul.f32 %v319_v34, %v316_v30 }
 0x1f4   : > { %v329_v36 = vpop.permute.xlu1 %328 }
 0x1f5   : > { %v331_v37 = vadd.f32 %v329_v36, %v321_v35 }
 0x1f7   : > { %3544 = vtanh.f32 %v331_v37  ;;  %v446_v56 = vrot.slane %v331_v37, 7 }
 0x201   : > { %v3545_v38 = vpop.eup %3544 }
 0x202   : > { %334 = vrot.lane.b32.xlu1 %v3545_v38, %s3601_s13  ;;  %v691_v38 = vrot.slane %v3701_v26, 5 }
 0x274   : > { %v335_v39 = vpop.permute.xlu1 %334 }
 0x275   : > { %v3717_v40 = vmul.f32 %v335_v39, %v316_v30  ;;  %v694_v39 = vrot.slane %v3706_v28, 5 }
 0x277   : > { %353 = vrot.lane.b32.xlu0 %v3717_v40, %s3602_s16 }
 0x2e9   : > { %v354_v41 = vpop.permute.xlu0 %353 }
 0x2ea   : > { %3383 = vmatmul.mubr.msk.f32.vlgmr.msra.gmra.mrb[2].mxu0 %vm147_vm1, %v354_v41 }
 0x2eb   : > { %3488 = vmatpush3.bf16.msra.mxu0 %v3649_v8  ;;  %3404 = vmatprep.mubr.msk.f32.mxu0 %vm3599_vm0, %v3600_v11 }
 0x2ec   : > { %3489 = vmatprep.subr.bf16.mxu0 %v3598_v3 }
 0x2ef   : > { %3491 = vmatpush3.bf16.msra.mxu0 %v3665_v13 }
 0x2f0   : > { %3498 = vmatprep.subr.bf16.mxu0 %v3598_v3 }
 0x3bd   : > { %v423_v42 = vpop.f32.mrb[2].mxu0 }
 0x3be   : > { %v428_v43 = vrot.slane %v423_v42, 7  ;;  %v3384_v44 = vpop.f32.mrb[3].mxu0 }
 0x3c0   : > { %v430_v45 = vadd.f32 %v428_v43, %v3695_v18 }
 0x3c2   : > { %v3285_v46 = vmul.f32 -1.442695, %v430_v45 }
 0x3c4   : > { %3546 = vpow2.f32 %v3285_v46 }
 0x3ce   : > { %v3547_v47 = vpop.eup %3546 }
 0x3cf   : > { %v434_v48 = vadd.f32 1.0, %v3547_v47 }
 0x3d1   : > { %3548 = vrcp.f32 %v434_v48 }
 0x3db   : > { %v3549_v51 = vpop.eup %3548 }
 0x3dc   : > { %v440_v52 = vmul.f32 %v3549_v51, %v438_v49 }
 0x3de   : > { %v444_v53 = vadd.f32 %v442_v50, %v440_v52 }
 0x3e0   : > { %450 = vrot.lane.b32.xlu1 %v444_v53, %s3601_s13  ;;  %v448_v57 = vmul.f32 %v446_v56, %v444_v53 }
 0x452   : > { %v451_v54 = vpop.permute.xlu1 %450 }
 0x453   : > { %v453_v55 = vmul.f32 %v451_v54, %v444_v53 }
 0x455   : > { %455 = vrot.lane.b32.xlu0 %v453_v55, %s3602_s16 }
 0x4c7   : > { %v456_v58 = vpop.permute.xlu0 %455 }
 0x4c8   : > { %v458_v59 = vadd.f32 %v456_v58, %v448_v57 }
 0x4ca   : > { %3550 = vtanh.f32 %v458_v59  ;;  %v572_v20 = vrot.slane %v458_v59, 7 }
 0x4d4   : > { %v3551_v60 = vpop.eup %3550 }
 0x4d5   : > { %461 = vrot.lane.b32.xlu1 %v3551_v60, %s3601_s13 }
 0x547   : > { %v462_v61 = vpop.permute.xlu1 %461 }
 0x548   : > { %v3734_v62 = vmul.f32 %v462_v61, %v444_v53 }
 0x54a   : > { %v480_v63 = vrot.slane %v3734_v62, 1 }
 0x54c   : > { %481 = vrot.lane.b32.xlu0 %v480_v63, %s3602_s16  ;;  %v817_v63 = vrot.slane %v3701_v26, 4 }
 0x5be   : > { %v482_v0 = vpop.permute.xlu0 %481 }
 0x5bf   : > { %3394 = vmatmul.mubr.msk.f32.vlgmr.msra.gmra.mrb[2].mxu1 %vm147_vm1, %v482_v0  ;;  %v820_v0 = vrot.slane %v3706_v28, 4 }
 0x5c0   : > { %3494 = vmatpush3.bf16.msra.mxu1 %v3649_v8  ;;  %3415 = vmatprep.mubr.msk.f32.mxu1 %vm3599_vm0, %v3600_v11 }
 0x5c1   : > { %3495 = vmatprep.subr.bf16.mxu1 %v3598_v3 }
 0x5c4   : > { %3497 = vmatpush3.bf16.msra.mxu1 %v3665_v13 }
 0x5c5   : > { %3504 = vmatprep.subr.bf16.mxu1 %v3598_v3 }
 0x692   : > { %v551_v1 = vpop.f32.mrb[2].mxu1 }
 0x693   : > { %v556_v2 = vrot.slane %v551_v1, 6  ;;  %v3395_v4 = vpop.f32.mrb[3].mxu1 }
 0x695   : > { %v558_v5 = vadd.f32 %v556_v2, %v3695_v18 }
 0x697   : > { %v3287_v6 = vmul.f32 -1.442695, %v558_v5 }
 0x699   : > { %3552 = vpow2.f32 %v3287_v6 }
 0x6a3   : > { %v3553_v7 = vpop.eup %3552 }
 0x6a4   : > { %v562_v9 = vadd.f32 1.0, %v3553_v7 }
 0x6a6   : > { %3554 = vrcp.f32 %v562_v9 }
 0x6b0   : > { %v3555_v14 = vpop.eup %3554 }
 0x6b1   : > { %v567_v15 = vmul.f32 %v3555_v14, %v565_v10 }
 0x6b3   : > { %v570_v16 = vadd.f32 %v568_v12, %v567_v15 }
 0x6b5   : > { %576 = vrot.lane.b32.xlu1 %v570_v16, %s3601_s13  ;;  %v574_v21 = vmul.f32 %v572_v20, %v570_v16 }
 0x727   : > { %v577_v17 = vpop.permute.xlu1 %576 }
 0x728   : > { %v579_v19 = vmul.f32 %v577_v17, %v570_v16 }
 0x72a   : > { %581 = vrot.lane.b32.xlu0 %v579_v19, %s3602_s16 }
 0x79c   : > { %v582_v22 = vpop.permute.xlu0 %581 }
 0x79d   : > { %v584_v23 = vadd.f32 %v582_v22, %v574_v21 }
 0x79f   : > { %3556 = vtanh.f32 %v584_v23  ;;  %v698_v46 = vrot.slane %v584_v23, 7 }
 0x7a9   : > { %v3557_v24 = vpop.eup %3556 }
 0x7aa   : > { %587 = vrot.lane.b32.xlu1 %v3557_v24, %s3601_s13 }
 0x81c   : > { %v588_v25 = vpop.permute.xlu1 %587 }
 0x81d   : > { %v3751_v27 = vmul.f32 %v588_v25, %v570_v16 }
 0x81f   : > { %v606_v29 = vrot.slane %v3751_v27, 2 }
 0x821   : > { %607 = vrot.lane.b32.xlu0 %v606_v29, %s3602_s16 }
 0x893   : > { %v608_v30 = vpop.permute.xlu0 %607 }
 0x894   : > { %3405 = vmatmul.mubr.msk.f32.vlgmr.msra.gmra.mrb[4].mxu0 %vm147_vm1, %v608_v30  ;;  %v941_v30 = vrot.slane %v3701_v26, 3 }
 0x895   : > { %3500 = vmatpush3.bf16.msra.mxu0 %v3649_v8  ;;  %3426 = vmatprep.mubr.msk.f32.mxu0 %vm3599_vm0, %v3600_v11 }
 0x896   : > { %3501 = vmatprep.subr.bf16.mxu0 %v3598_v3 }
 0x899   : > { %3503 = vmatpush3.bf16.msra.mxu0 %v3665_v13 }
 0x89a   : > { %3510 = vmatprep.subr.bf16.mxu0 %v3598_v3 }
 0x967   : > { %v677_v31 = vpop.f32.mrb[4].mxu0 }
 0x968   : > { %v682_v32 = vrot.slane %v677_v31, 5  ;;  %v3406_v33 = vpop.f32.mrb[5].mxu0 }
 0x96a   : > { %v684_v34 = vadd.f32 %v682_v32, %v3695_v18 }
 0x96c   : > { %v3289_v35 = vmul.f32 -1.442695, %v684_v34 }
 0x96e   : > { %3558 = vpow2.f32 %v3289_v35 }
 0x978   : > { %v3559_v36 = vpop.eup %3558 }
 0x979   : > { %v688_v37 = vadd.f32 1.0, %v3559_v36 }
 0x97b   : > { %3560 = vrcp.f32 %v688_v37 }
 0x985   : > { %v3561_v41 = vpop.eup %3560 }
 0x986   : > { %v693_v42 = vmul.f32 %v3561_v41, %v691_v38 }
 0x988   : > { %v696_v43 = vadd.f32 %v694_v39, %v693_v42 }
 0x98a   : > { %702 = vrot.lane.b32.xlu1 %v696_v43, %s3601_s13  ;;  %v700_v47 = vmul.f32 %v698_v46, %v696_v43 }
 0x9fc   : > { %v703_v44 = vpop.permute.xlu1 %702 }
 0x9fd   : > { %v705_v45 = vmul.f32 %v703_v44, %v696_v43 }
 0x9ff   : > { %707 = vrot.lane.b32.xlu0 %v705_v45, %s3602_s16 }
 0xa71   : > { %v708_v48 = vpop.permute.xlu0 %707 }
 0xa72   : > { %v710_v49 = vadd.f32 %v708_v48, %v700_v47 }
 0xa74   : > { %3562 = vtanh.f32 %v710_v49  ;;  %v824_v7 = vrot.slane %v710_v49, 7 }
 0xa7e   : > { %v3563_v50 = vpop.eup %3562 }
 0xa7f   : > { %713 = vrot.lane.b32.xlu1 %v3563_v50, %s3601_s13 }
 0xaf1   : > { %v714_v51 = vpop.permute.xlu1 %713 }
 0xaf2   : > { %v3768_v52 = vmul.f32 %v714_v51, %v696_v43 }
 0xaf4   : > { %v732_v53 = vrot.slane %v3768_v52, 3 }
 0xaf6   : > { %733 = vrot.lane.b32.xlu0 %v732_v53, %s3602_s16  ;;  %v1065_v53 = vrot.slane %v3701_v26, 2 }
 0xb68   : > { %v734_v54 = vpop.permute.xlu0 %733 }
 0xb69   : > { %3416 = vmatmul.mubr.msk.f32.vlgmr.msra.gmra.mrb[4].mxu1 %vm147_vm1, %v734_v54  ;;  %v1068_v54 = vrot.slane %v3706_v28, 2 }
 0xb6a   : > { %3506 = vmatpush3.bf16.msra.mxu1 %v3649_v8  ;;  %3437 = vmatprep.mubr.msk.f32.mxu1 %vm3599_vm0, %v3600_v11 }
 0xb6b   : > { %3507 = vmatprep.subr.bf16.mxu1 %v3598_v3 }
 0xb6e   : > { %3509 = vmatpush3.bf16.msra.mxu1 %v3665_v13 }
 0xb6f   : > { %3516 = vmatprep.subr.bf16.mxu1 %v3598_v3 }
 0xc3c   : > { %v803_v55 = vpop.f32.mrb[4].mxu1 }
 0xc3d   : > { %v808_v56 = vrot.slane %v803_v55, 4  ;;  %v3417_v57 = vpop.f32.mrb[5].mxu1 }
 0xc3f   : > { %v810_v58 = vadd.f32 %v808_v56, %v3695_v18 }
 0xc41   : > { %v3291_v59 = vmul.f32 -1.442695, %v810_v58 }
 0xc43   : > { %3564 = vpow2.f32 %v3291_v59 }
 0xc4d   : > { %v3565_v60 = vpop.eup %3564 }
 0xc4e   : > { %v814_v61 = vadd.f32 1.0, %v3565_v60 }
 0xc50   : > { %3566 = vrcp.f32 %v814_v61 }
 0xc5a   : > { %v3567_v1 = vpop.eup %3566 }
 0xc5b   : > { %v819_v2 = vmul.f32 %v3567_v1, %v817_v63 }
 0xc5d   : > { %v822_v4 = vadd.f32 %v820_v0, %v819_v2 }
 0xc5f   : > { %828 = vrot.lane.b32.xlu1 %v822_v4, %s3601_s13  ;;  %v826_v9 = vmul.f32 %v824_v7, %v822_v4 }
 0xcd1   : > { %v829_v5 = vpop.permute.xlu1 %828 }
 0xcd2   : > { %v831_v6 = vmul.f32 %v829_v5, %v822_v4 }
 0xcd4   : > { %833 = vrot.lane.b32.xlu0 %v831_v6, %s3602_s16 }
 0xd46   : > { %v834_v10 = vpop.permute.xlu0 %833 }
 0xd47   : > { %v836_v12 = vadd.f32 %v834_v10, %v826_v9 }
 0xd49   : > { %3568 = vtanh.f32 %v836_v12  ;;  %v948_v35 = vrot.slane %v836_v12, 7 }
 0xd53   : > { %v3569_v14 = vpop.eup %3568 }
 0xd54   : > { %839 = vrot.lane.b32.xlu1 %v3569_v14, %s3601_s13 }
 0xdc6   : > { %v840_v15 = vpop.permute.xlu1 %839 }
 0xdc7   : > { %v3785_v16 = vmul.f32 %v840_v15, %v822_v4 }
 0xdc9   : > { %v856_v17 = vrot.slane %v3785_v16, 4 }
 0xdcb   : > { %857 = vrot.lane.b32.xlu0 %v856_v17, %s3602_s16  ;;  %v1189_v17 = vrot.slane %v3701_v26, 1 }
 0xe3d   : > { %v858_v19 = vpop.permute.xlu0 %857 }
 0xe3e   : > { %3427 = vmatmul.mubr.msk.f32.vlgmr.msra.gmra.mrb[6].mxu0 %vm147_vm1, %v858_v19  ;;  %v1192_v19 = vrot.slane %v3706_v28, 1 }
 0xe3f   : > { %3512 = vmatpush3.bf16.msra.mxu0 %v3649_v8  ;;  %3448 = vmatprep.mubr.msk.f32.mxu0 %vm3599_vm0, %v3600_v11  ;;  %v944_v8 = vrot.slane %v3706_v28, 3 }
 0xe40   : > { %3513 = vmatprep.subr.bf16.mxu0 %v3598_v3 }
 0xe43   : > { %3515 = vmatpush3.bf16.msra.mxu0 %v3665_v13 }
 0xf11   : > { %v927_v20 = vpop.f32.mrb[6].mxu0 }
 0xf12   : > { %v932_v21 = vrot.slane %v927_v20, 3  ;;  %v3428_v22 = vpop.f32.mrb[7].mxu0 }
 0xf14   : > { %v934_v23 = vadd.f32 %v932_v21, %v3695_v18 }
 0xf16   : > { %v3293_v24 = vmul.f32 -1.442695, %v934_v23  ;;  %v229_v23 = vlaneseq }
 0xf18   : > { %3570 = vpow2.f32 %v3293_v24  ;;  %v3820_v24 = vshrl.u32 %v229_v23, 7 }
 0xf1a   : > { %v3829_v28 = vsub.s32 2, %v3820_v24  ;;  %vm338_vm5 = vcmp.eq.s32.totalorder %v3820_v24, 0  ;;  %vm349_vm9 = vcmp.eq.s32.totalorder %v3820_v24, 7  ;;  %vm465_vm10 = vcmp.eq.s32.totalorder %v3820_v24, 1 }
 0xf1b   : > { %vm476_vm13 = vcmp.eq.s32.totalorder %v3820_v24, 6  ;;  %vm591_vm15 = vcmp.eq.s32.totalorder %v3820_v24, 2 }
 0xf22   : > { %v3571_v25 = vpop.eup %3570 }
 0xf23   : > { %v938_v29 = vadd.f32 1.0, %v3571_v25 }
 0xf25   : > { %3572 = vrcp.f32 %v938_v29 }
 0xf2f   : > { %v3573_v31 = vpop.eup %3572 }
 0xf30   : > { %v943_v32 = vmul.f32 %v3573_v31, %v941_v30  ;;  %v596_v30 = vrot.slane %v3751_v27, %v3829_v28 }
 0xf32   : > { %v946_v33 = vadd.f32 %v944_v8, %v943_v32  ;;  %v3835_v8 = vsub.s32 4, %v3820_v24  ;;  %v3841_v32 = vsub.s32 6, %v3820_v24 }
 0xf34   : > { %952 = vrot.lane.b32.xlu1 %v946_v33, %s3601_s13  ;;  %v950_v36 = vmul.f32 %v948_v35, %v946_v33  ;;  %v847_v31 = vrot.slane %v3785_v16, %v3835_v8  ;;  %v3847_v35 = vsub.s32 1, %v3820_v24  ;;  %v1227_v16 = vld [vmem:[%s4759_s1 + $0x40] sm:$0xff] }
 0xfa6   : > { %v953_v13 = vpop.permute.xlu1 %952 }
 0xfa7   : > { %v955_v34 = vmul.f32 %v953_v13, %v946_v33 }
 0xfa9   : > { %957 = vrot.lane.b32.xlu0 %v955_v34, %s3602_s16 }
0x101b   : > { %v958_v37 = vpop.permute.xlu0 %957 }
0x101c   : > { %v960_v38 = vadd.f32 %v958_v37, %v950_v36  ;;  %v1228_v37 = vld [vmem:[%s4759_s1 + $0x48] sm:$0xff] }
0x101e   : > { %3574 = vtanh.f32 %v960_v38  ;;  %v1072_v59 = vrot.slane %v960_v38, 7  ;;  %v470_v38 = vrot.slane %v3734_v62, %v3847_v35 }
0x1028   : > { %v3575_v39 = vpop.eup %3574 }
0x1029   : > { %963 = vrot.lane.b32.xlu1 %v3575_v39, %s3601_s13  ;;  %v3859_v39 = vsub.s32 3, %v3820_v24 }
0x102b   : > { %v722_v62 = vrot.slane %v3768_v52, %v3859_v39  ;;  %v3603_v52 = vmov -10000.0  }
0x109b   : > { %v964_v41 = vpop.permute.xlu1 %963 }
0x109c   : > { %v3801_v42 = vmul.f32 %v964_v41, %v946_v33  ;;  %v3517_v41 = vpack.c.bf16 %v1228_v37, %v1227_v16 }
0x109e   : > { %v980_v43 = vrot.slane %v3801_v42, 5 }
0x10a0   : > { %981 = vrot.lane.b32.xlu0 %v980_v43, %s3602_s16  ;;  %v1229_v43 = vld [vmem:[%s4759_s1 + $0x50] sm:$0xff] }
0x1112   : > { %v982_v44 = vpop.permute.xlu0 %981 }
0x1113   : > { %3438 = vmatmul.mubr.msk.f32.vlgmr.msra.gmra.mrb[6].mxu1 %vm147_vm1, %v982_v44  ;;  %v1230_v44 = vld [vmem:[%s4759_s1 + $0x58] sm:$0xff] }
0x1114   : > { %3459 = vmatprep.mubr.msk.f32.mxu1 %vm3599_vm0, %v3600_v11  ;;  %3518 = vmatpush3.bf16.msra.mxu1 %v3517_v41 }
0x1115   : > { %3519 = vmatprep.subr.bf16.mxu1 %v3598_v3  ;;  %v3883_v3 = vld [vmem:[%s4759_s1 + $0x60] sm:$0xff] }
0x11e6   : > { %v1051_v45 = vpop.f32.mrb[6].mxu1 }
0x11e7   : > { %v1056_v46 = vrot.slane %v1051_v45, 2  ;;  %v3439_v47 = vpop.f32.mrb[7].mxu1  ;;  %v3520_v45 = vpack.c.bf16 %v1230_v44, %v1229_v43 }
0x11e9   : > { %v1058_v48 = vadd.f32 %v1056_v46, %v3695_v18  ;;  %v3872_v46 = vsub.s32 5, %v3820_v24  ;;  %3521 = vmatpush3.bf16.msra.mxu1 %v3520_v45 }
0x11eb   : > { %v3295_v49 = vmul.f32 -1.442695, %v1058_v48  ;;  %v971_v47 = vrot.slane %v3801_v42, %v3872_v46  ;;  %v3878_v48 = vand.u32 127, %v229_v23  ;;  %v1384_v37 = vrot.slane %v3883_v3, %v3872_v46 }
0x11ed   : > { %3576 = vpow2.f32 %v3295_v49  ;;  %vm4761_vm2 = vcmp.eq.s32.totalorder %v3878_v48, 3  ;;  %vm233_vm4 = vcmp.lt.s32.totalorder %v3878_v48, 16 }
0x11ee   : > { %v1312_v49 = vsel %vm4761_vm2, 0.0, %v3603_v52  ;;  %vm3906_vm7 = vmxor %vm233_vm4, %vm3604_vm6  ;;  %vm602_vm6 = vcmp.eq.s32.totalorder %v3820_v24, 5  ;;  %vm728_vm2 = vcmp.eq.s32.totalorder %v3820_v24, 4 }
0x11ef   : > { %vm339_vm8 = vmand %vm338_vm5, %vm233_vm4 }
0x11f0   : > { %vm350_vm11 = vmand %vm349_vm9, %vm3906_vm7 }
0x11f1   : > { %vm466_vm12 = vmand %vm465_vm10, %vm233_vm4 }
0x11f2   : > { %vm477_vm14 = vmand %vm476_vm13, %vm3906_vm7 }
0x11f3   : > { %vm592_vm0 = vmand %vm591_vm15, %vm233_vm4 }
0x11f7   : > { %v3577_v50 = vpop.eup %3576 }
0x11f8   : > { %v1062_v51 = vadd.f32 1.0, %v3577_v50  ;;  %v3889_v50 = vadd.f32 %v1312_v49, %v3883_v3 }
0x11fa   : > { %3578 = vrcp.f32 %v1062_v51  ;;  %4795 = vst [vmem:[#allocation2_spill] sm:$0xff] %v3889_v50  ;;  %v1315_v42 = vsel %vm4762_vm3, %v3889_v50, -inf  ;;  %v3894_v51 = vsub.s32 7, %v3820_v24 }
0x1204   : > { %v3579_v55 = vpop.eup %3578 }
0x1205   : > { %v1067_v56 = vmul.f32 %v3579_v55, %v1065_v53 }
0x1207   : > { %v1070_v57 = vadd.f32 %v1068_v54, %v1067_v56 }
0x1209   : > { %1076 = vrot.lane.b32.xlu1 %v1070_v57, %s3601_s13  ;;  %v1074_v60 = vmul.f32 %v1072_v59, %v1070_v57 }
0x127b   : > { %v1077_v11 = vpop.permute.xlu1 %1076 }
0x127c   : > { %v1079_v58 = vmul.f32 %v1077_v11, %v1070_v57 }
0x127e   : > { %1081 = vrot.lane.b32.xlu0 %v1079_v58, %s3602_s16 }
0x12f0   : > { %v1082_v61 = vpop.permute.xlu0 %1081 }
0x12f1   : > { %v1084_v63 = vadd.f32 %v1082_v61, %v1074_v60 }
0x12f3   : > { %3580 = vtanh.f32 %v1084_v63  ;;  %v1196_v33 = vrot.slane %v1084_v63, 7 }
0x12fd   : > { %v3581_v0 = vpop.eup %3580 }
0x12fe   : > { %1087 = vrot.lane.b32.xlu1 %v3581_v0, %s3601_s13 }
0x1370   : > { %v1088_v1 = vpop.permute.xlu1 %1087 }
0x1371   : > { %v1090_v2 = vmul.f32 %v1088_v1, %v1070_v57  ;;  %v1356_v57 = vrot.slane %v3883_v3, %v3847_v35 }
0x1373   : > { %v1104_v4 = vrot.slane %v1090_v2, 6 }
0x1375   : > { %1105 = vrot.lane.b32.xlu0 %v1104_v4, %s3602_s16 }
0x13e7   : > { %v1106_v5 = vpop.permute.xlu0 %1105 }
0x13e8   : > { %3449 = vmatmul.mubr.msk.f32.vlgmr.msra.gmra.mrb[8].mxu0 %vm147_vm1, %v1106_v5 }
0x14bb   : > { %v1175_v6 = vpop.f32.mrb[8].mxu0 }
0x14bc   : > { %v1180_v7 = vrot.slane %v1175_v6, 1  ;;  %v3450_v9 = vpop.f32.mrb[9].mxu0 }
0x14be   : > { %v1182_v10 = vadd.f32 %v1180_v7, %v3695_v18  ;;  %v3823_v18 = vsub.s32 0, %v3820_v24 }
0x14c0   : > { %v3297_v12 = vmul.f32 -1.442695, %v1182_v10  ;;  %v343_v26 = vrot.slane %v3717_v40, %v3823_v18  ;;  %v1095_v40 = vrot.slane %v1090_v2, %v3841_v32  ;;  %v1349_v56 = vrot.slane %v3883_v3, %v3823_v18 }
0x14c2   : > { %3582 = vpow2.f32 %v3297_v12 }
0x14cc   : > { %v3583_v14 = vpop.eup %3582 }
0x14cd   : > { %v1186_v15 = vadd.f32 1.0, %v3583_v14 }
0x14cf   : > { %3584 = vrcp.f32 %v1186_v15 }
0x14d9   : > { %v3585_v20 = vpop.eup %3584 }
0x14da   : > { %v1191_v21 = vmul.f32 %v3585_v20, %v1189_v17 }
0x14dc   : > { %v1194_v22 = vadd.f32 %v1192_v19, %v1191_v21 }
0x14de   : > { %1200 = vrot.lane.b32.xlu1 %v1194_v22, %s3601_s13  ;;  %v1198_v13 = vmul.f32 %v1196_v33, %v1194_v22 }
0x1550   : > { %v1201_v25 = vpop.permute.xlu1 %1200 }
0x1551   : > { %v1203_v29 = vmul.f32 %v1201_v25, %v1194_v22 }
0x1553   : > { %1205 = vrot.lane.b32.xlu0 %v1203_v29, %s3602_s16  ;;  %v1363_v29 = vrot.slane %v3883_v3, %v3829_v28 }
0x1557   : > { %345 = vrot.lane.b32.xlu0 %v343_v26, %s3602_s16  ;;  %v1370_v26 = vrot.slane %v3883_v3, %v3859_v39 }
0x155b   : > { %598 = vrot.lane.b32.xlu0 %v596_v30, %s3602_s16  ;;  %v1377_v30 = vrot.slane %v3883_v3, %v3835_v8 }
0x155f   : > { %849 = vrot.lane.b32.xlu0 %v847_v31, %s3602_s16  ;;  %v1398_v31 = vrot.slane %v3883_v3, %v3894_v51 }
0x1563   : > { %1097 = vrot.lane.b32.xlu0 %v1095_v40, %s3602_s16  ;;  %v3298_v40 = vld [vmem:[%s4759_s1 + $0x6b] ss:$0 sm:$0xff] }
0x1582   : > { %1316 = vmax.xlane.f32.xlu0 %v1315_v42 }
0x1598   : > { %1400 = vbcast.lane.b32.xlu0 %v1398_v31, 256 }
0x15c5   : > { %v1206_v27 = vpop.permute.xlu0 %1205 }
0x15c6   : > { %v1208_v34 = vadd.f32 %v1206_v27, %v1198_v13 }
0x15c8   : > { %3586 = vtanh.f32 %v1208_v34  ;;  %v3605_v34 = vmov 0  }
0x15c9   : > { %v346_v58 = vpop.permute.xlu0 %345  ;;  %3538 = vset.pattern.permute.xlu1 %v3605_v34  ;;  %3539 = vset.pattern.permute.xlu0 %v3605_v34 }
0x15ca   : > { %v348_v59 = vsel %vm339_vm8, %v346_v58, 0.0  ;;  %vm603_vm8 = vmand %vm602_vm6, %vm3906_vm7 }
0x15cb   : > { %v351_v61 = vsel %vm350_vm11, %v346_v58, %v348_v59  ;;  %vm717_vm11 = vcmp.eq.s32.totalorder %v3820_v24, 3 }
0x15cc   : > { %vm853_vm3 = vmand %vm717_vm11, %vm3906_vm7 }
0x15cd   : > { %v599_v1 = vpop.permute.xlu0 %598 }
0x15d1   : > { %v850_v9 = vpop.permute.xlu0 %849 }
0x15d2   : > { %v3587_v36 = vpop.eup %3586 }
0x15d3   : > { %1211 = vrot.lane.b32.xlu1 %v3587_v36, %s3601_s13 }
0x15d5   : > { %v1098_v19 = vpop.permute.xlu0 %1097 }
0x15d7   : > { %472 = vrot.lane.b32.xlu1 %v470_v38, %s3602_s16  ;;  %v1391_v38 = vrot.slane %v3883_v3, %v3841_v32 }
0x15db   : > { %724 = vrot.lane.b32.xlu1 %v722_v62, %s3602_s16 }
0x15df   : > { %973 = vrot.lane.b32.xlu1 %v971_v47, %s3602_s16 }
0x160f   : > { %v4003_v47 = vpop.xlane.xlu0 %1316 }
0x1610   : > { %4798 = vst [vmem:[#allocation3_spill] sm:$0xff] %v4003_v47 }
0x1645   : > { %v1212_v53 = vpop.permute.xlu1 %1211 }
0x1646   : > { %v1214_v54 = vmul.f32 %v1212_v53, %v1194_v22 }
0x1648   : > { %v1219_v55 = vrot.slane %v1214_v54, %v3894_v51 }
0x1649   : > { %v473_v60 = vpop.permute.xlu1 %472 }
0x164a   : > { %1221 = vrot.lane.b32.xlu1 %v1219_v55, %s3602_s16  ;;  %v475_v63 = vsel %vm466_vm12, %v473_v60, %v351_v61  ;;  %vm718_vm12 = vmand %vm717_vm11, %vm233_vm4  ;;  %vm4807_vm11 = vcmask 64512  }
0x164b   : > { %v478_v0 = vsel %vm477_vm14, %v473_v60, %v475_v63  ;;  %vm729_vm14 = vmand %vm728_vm2, %vm3906_vm7  ;;  %v4039_v60 = vpop.permute.xlu0 %1400 }
0x164c   : > { %v601_v2 = vsel %vm592_vm0, %v599_v1, %v478_v0  ;;  %vm843_vm0 = vmand %vm728_vm2, %vm233_vm4 }
0x164d   : > { %v604_v4 = vsel %vm603_vm8, %v599_v1, %v601_v2  ;;  %v725_v5 = vpop.permute.xlu1 %724  ;;  %vm967_vm8 = vmand %vm602_vm6, %vm233_vm4 }
0x164e   : > { %1351 = vbcast.lane.b32.xlu1 %v1349_v56, 256  ;;  %v727_v6 = vsel %vm718_vm12, %v725_v5, %v604_v4  ;;  %vm977_vm12 = vmand %vm591_vm15, %vm3906_vm7  ;;  %v4048_v4 = vsub.s32 %v3878_v48, %v3820_v24 }
0x164f   : > { %v730_v7 = vsel %vm729_vm14, %v725_v5, %v727_v6  ;;  %vm1091_vm2 = vmand %vm476_vm13, %vm233_vm4  ;;  %vm1494_vm13 = vcmask 1047559  }
0x1650   : > { %v852_v10 = vsel %vm843_vm0, %v850_v9, %v730_v7  ;;  %vm1215_vm6 = vmand %vm349_vm9, %vm233_vm4  ;;  %vm1484_vm4 = vcmask 1042434   ;;  %vm1490_vm9 = vcmask 1045509  }
0x1651   : > { %v854_v12 = vsel %vm853_vm3, %v850_v9, %v852_v10  ;;  %v974_v14 = vpop.permute.xlu1 %973  ;;  %vm1101_vm3 = vmand %vm465_vm10, %vm3906_vm7  ;;  %vm1492_vm10 = vcmask 1046534  }
0x1652   : > { %1358 = vbcast.lane.b32.xlu1 %v1356_v57, 256  ;;  %v976_v15 = vsel %vm967_vm8, %v974_v14, %v854_v12  ;;  %vm1225_vm15 = vmand %vm338_vm5, %vm3906_vm7  ;;  %vm1486_vm5 = vcmask 1043459   ;;  %vm1488_vm7 = vcmask 1044484  }
0x1653   : > { %v978_v17 = vsel %vm977_vm12, %v974_v14, %v976_v15  ;;  %vm4817_vm14 = vmmov %vm4807_vm11 }
0x1654   : > { %v1100_v20 = vsel %vm1091_vm2, %v1098_v19, %v978_v17  ;;  %vm4827_vm0 = vmmov %vm4807_vm11 }
0x1655   : > { %v1102_v21 = vsel %vm1101_vm3, %v1098_v19, %v1100_v20  ;;  %vm4829_vm8 = vmmov %vm4827_vm0 }
0x1656   : > { %1365 = vbcast.lane.b32.xlu1 %v1363_v29, 256  ;;  %vm4830_vm12 = vmmov %vm4827_vm0 }
0x1657   : > { %vm4831_vm2 = vmmov %vm4827_vm0 }
0x1658   : > { %vm4832_vm3 = vmmov %vm4827_vm0 }
0x165a   : > { %1372 = vbcast.lane.b32.xlu1 %v1370_v26, 256 }
0x165e   : > { %1379 = vbcast.lane.b32.xlu1 %v1377_v30, 256 }
0x16bc   : > { %v1222_v22 = vpop.permute.xlu1 %1221 }
0x16bd   : > { %v1224_v23 = vsel %vm1215_vm6, %v1222_v22, %v1102_v21 }
0x16be   : > { %v1226_v25 = vsel %vm1225_vm15, %v1222_v22, %v1224_v23 }
0x16bf   : > { %3460 = vmatmul.mubr.msk.f32.vlgmr.msra.gmra.mrb[8].mxu1 %vm147_vm1, %v1226_v25  ;;  %vm1482_vm1 = vcmask 1041409  }
0x16c0   : > { %v3993_v41 = vpop.permute.xlu1 %1351 }
0x16c4   : > { %v3995_v43 = vpop.permute.xlu1 %1358 }
0x16c8   : > { %v3997_v44 = vpop.permute.xlu1 %1365 }
0x16cc   : > { %v3999_v45 = vpop.permute.xlu1 %1372 }
0x16d0   : > { %v4001_v62 = vpop.permute.xlu1 %1379 }
0x1792   : > { %v1305_v33 = vpop.f32.mrb[8].mxu1 }
0x1793   : > { %v1306_v13 = vadd.f32 %v3298_v40, %v1305_v33  ;;  %v3461_v27 = vpop.f32.mrb[9].mxu1 }
0x1795   : > { %3588 = vtanh.f32 %v1306_v13 }
0x179f   : > { %v3985_v36 = vpop.eup %3588 }
0x17a0   : > { %v1339_v16 = vrot.slane %v3985_v36, %v3823_v18  ;;  %v1641_v57 = vrot.slane %v3985_v36, %v3847_v35 }
0x17a2   : > { %1341 = vbcast.lane.b32.xlu1 %v1339_v16, 256 }
0x17a6   : > { %1386 = vbcast.lane.b32.xlu1 %v1384_v37, 256 }
0x17aa   : > { %1393 = vbcast.lane.b32.xlu1 %v1391_v38, 256 }
0x1814   : > { %v1342_v52 = vpop.permute.xlu1 %1341 }
0x1815   : > { %v1344_v49 = vadd.f32 %v1342_v52, %v4003_v47 }
0x1817   : > { %v4007_v42 = vadd.f32 %v3993_v41, %v1344_v49  ;;  %v4013_v53 = vadd.f32 %v3995_v43, %v1344_v49  ;;  %v4023_v56 = vadd.f32 %v3997_v44, %v1344_v49  ;;  %v4029_v11 = vadd.f32 %v3999_v45, %v1344_v49 }
0x1818   : > { %v4009_v3 = vpop.permute.xlu1 %1386  ;;  %v4033_v58 = vadd.f32 %v4001_v62, %v1344_v49  ;;  %v4043_v61 = vadd.f32 %v4039_v60, %v1344_v49 }
0x1819   : > { %4799 = vst [vmem:[#allocation4_spill] sm:$0xff] %v4007_v42  ;;  %1427 = vperm.xlu1 %3538, %v4007_v42   ;;  %4800 = vst [vmem:[#allocation5_spill] sm:$0xff] %v4013_v53  ;;  %v4037_v59 = vadd.f32 %v4009_v3, %v1344_v49 }
0x181a   : > { %4802 = vst [vmem:[#allocation7_spill] sm:$0xff] %v4023_v56  ;;  %4803 = vst [vmem:[#allocation8_spill] sm:$0xff] %v4029_v11 }
0x181b   : > { %4804 = vst [vmem:[#allocation9_spill] sm:$0xff] %v4033_v58  ;;  %4805 = vst [vmem:[#allocation10_spill] sm:$0xff] %v4037_v59 }
0x181c   : > { %v4015_v54 = vpop.permute.xlu1 %1393  ;;  %4806 = vst [vmem:[#allocation11_spill] sm:$0xff] %v4043_v61 }
0x181d   : > { %1430 = vperm.xlu1 %3538, %v4013_v53   ;;  %v4019_v55 = vadd.f32 %v4015_v54, %v1344_v49 }
0x181f   : > { %4801 = vst [vmem:[#allocation6_spill] sm:$0xff] %v4019_v55  ;;  %1445 = vperm.xlu0 %3539, %v4019_v55  }
0x1821   : > { %1433 = vperm.xlu1 %3538, %v4023_v56  }
0x1823   : > { %1643 = vbcast.lane.b32.xlu0 %v1641_v57, 256 }
0x1825   : > { %1436 = vperm.xlu1 %3538, %v4029_v11  }
0x1829   : > { %1439 = vperm.xlu1 %3538, %v4033_v58  }
0x182d   : > { %1442 = vperm.xlu1 %3538, %v4037_v59  }
0x1831   : > { %1448 = vperm.xlu1 %3538, %v4043_v61  }
0x1898   : > { %v1428_v63 = vpop.permute.xlu1 %1427 }
0x1899   : > { %v1453_v9 = vrot.slane %v1428_v63, %v4048_v4  ;;  %v1868_v63 = vrot.slane %v3985_v36, %v3829_v28 }
0x189c   : > { %v1431_v0 = vpop.permute.xlu1 %1430 }
0x189d   : > { %v1457_v5 = vrot.slane %v1431_v0, %v4048_v4 }
0x189e   : > { %v1446_v17 = vpop.permute.xlu0 %1445 }
0x189f   : > { %v1483_v14 = vsel %vm1482_vm1, %v1457_v5, %v1453_v9  ;;  %v1477_v23 = vrot.slane %v1446_v17, %v4048_v4 }
0x18a0   : > { %v1434_v1 = vpop.permute.xlu1 %1433 }
0x18a1   : > { %v1461_v6 = vrot.slane %v1434_v1, %v4048_v4 }
0x18a2   : > { %v1644_v40 = vpop.permute.xlu0 %1643 }
0x18a3   : > { %v1485_v24 = vsel %vm1484_vm4, %v1461_v6, %v1483_v14 }
0x18a4   : > { %v1437_v2 = vpop.permute.xlu1 %1436 }
0x18a5   : > { %v1465_v10 = vrot.slane %v1437_v2, %v4048_v4 }
0x18a7   : > { %v1487_v19 = vsel %vm1486_vm5, %v1465_v10, %v1485_v24 }
0x18a8   : > { %v1440_v7 = vpop.permute.xlu1 %1439 }
0x18a9   : > { %v1469_v12 = vrot.slane %v1440_v7, %v4048_v4 }
0x18ab   : > { %v1489_v21 = vsel %vm1488_vm7, %v1469_v12, %v1487_v19 }
0x18ac   : > { %v1443_v15 = vpop.permute.xlu1 %1442 }
0x18ad   : > { %v1473_v20 = vrot.slane %v1443_v15, %v4048_v4 }
0x18af   : > { %v1491_v22 = vsel %vm1490_vm9, %v1473_v20, %v1489_v21 }
0x18b0   : > { %v1449_v25 = vpop.permute.xlu1 %1448  ;;  %v1493_v26 = vsel %vm1492_vm10, %v1477_v23, %v1491_v22 }
0x18b1   : > { %v1481_v29 = vrot.slane %v1449_v25, %v4048_v4 }
0x18b3   : > { %v1495_v30 = vsel %vm1494_vm13, %v1481_v29, %v1493_v26 }
0x18b4   : > { %v1497_v31 = vsel %vm4807_vm11, %v1495_v30, -inf }
0x18b5   : > { %1498 = vmax.xlane.f32.xlu1 %v1497_v31 }
0x1942   : > { %v4066_v33 = vpop.xlane.xlu1 %1498 }
0x1943   : > { %4808 = vst [vmem:[#allocation12_spill] sm:$0xff] %v4066_v33  ;;  %v1646_v13 = vadd.f32 %v1644_v40, %v4066_v33 }
0x1945   : > { %v4070_v27 = vadd.f32 %v1646_v13, %v3993_v41  ;;  %v4074_v34 = vadd.f32 %v1646_v13, %v3995_v43  ;;  %v4078_v16 = vadd.f32 %v1646_v13, %v3997_v44  ;;  %v4082_v37 = vadd.f32 %v1646_v13, %v3999_v45 }
0x1946   : > { %v4086_v38 = vadd.f32 %v1646_v13, %v4001_v62  ;;  %v4090_v52 = vadd.f32 %v1646_v13, %v4009_v3  ;;  %v4094_v49 = vadd.f32 %v1646_v13, %v4015_v54  ;;  %v4098_v57 = vadd.f32 %v1646_v13, %v4039_v60 }
0x1947   : > { %4809 = vst [vmem:[#allocation13_spill] sm:$0xff] %v4070_v27  ;;  %1664 = vperm.xlu0 %3539, %v4070_v27   ;;  %4810 = vst [vmem:[#allocation14_spill] sm:$0xff] %v4074_v34 }
0x1948   : > { %4811 = vst [vmem:[#allocation15_spill] sm:$0xff] %v4078_v16  ;;  %4812 = vst [vmem:[#allocation16_spill] sm:$0xff] %v4082_v37 }
0x1949   : > { %4813 = vst [vmem:[#allocation17_spill] sm:$0xff] %v4086_v38  ;;  %4814 = vst [vmem:[#allocation18_spill] sm:$0xff] %v4090_v52 }
0x194a   : > { %4815 = vst [vmem:[#allocation19_spill] sm:$0xff] %v4094_v49  ;;  %4816 = vst [vmem:[#allocation20_spill] sm:$0xff] %v4098_v57 }
0x194b   : > { %1667 = vperm.xlu0 %3539, %v4074_v34  }
0x194f   : > { %1670 = vperm.xlu0 %3539, %v4078_v16  }
0x1953   : > { %1673 = vperm.xlu0 %3539, %v4082_v37  }
0x1957   : > { %1676 = vperm.xlu0 %3539, %v4086_v38  }
0x195b   : > { %1679 = vperm.xlu0 %3539, %v4090_v52  }
0x195f   : > { %1682 = vperm.xlu0 %3539, %v4094_v49  }
0x1963   : > { %1685 = vperm.xlu0 %3539, %v4098_v57  }
0x1967   : > { %1870 = vbcast.lane.b32.xlu0 %v1868_v63, 256 }
0x19c6   : > { %v1665_v0 = vpop.permute.xlu0 %1664 }
0x19c7   : > { %v1690_v12 = vrot.slane %v1665_v0, %v4048_v4 }
0x19ca   : > { %v1668_v1 = vpop.permute.xlu0 %1667 }
0x19cb   : > { %v1694_v9 = vrot.slane %v1668_v1, %v4048_v4 }
0x19cd   : > { %v1719_v17 = vsel %vm1482_vm1, %v1694_v9, %v1690_v12 }
0x19ce   : > { %v1671_v2 = vpop.permute.xlu0 %1670 }
0x19cf   : > { %v1698_v10 = vrot.slane %v1671_v2, %v4048_v4 }
0x19d1   : > { %v1720_v20 = vsel %vm1484_vm4, %v1698_v10, %v1719_v17 }
0x19d2   : > { %v1674_v5 = vpop.permute.xlu0 %1673 }
0x19d3   : > { %v1702_v14 = vrot.slane %v1674_v5, %v4048_v4 }
0x19d5   : > { %v1721_v22 = vsel %vm1486_vm5, %v1702_v14, %v1720_v20  ;;  %v2095_v14 = vrot.slane %v3985_v36, %v3859_v39 }
0x19d6   : > { %v1677_v6 = vpop.permute.xlu0 %1676 }
0x19d7   : > { %v1706_v24 = vrot.slane %v1677_v6, %v4048_v4 }
0x19d9   : > { %v1722_v23 = vsel %vm1488_vm7, %v1706_v24, %v1721_v22 }
0x19da   : > { %v1680_v7 = vpop.permute.xlu0 %1679 }
0x19db   : > { %v1710_v19 = vrot.slane %v1680_v7, %v4048_v4 }
0x19dd   : > { %v1723_v26 = vsel %vm1490_vm9, %v1710_v19, %v1722_v23 }
0x19de   : > { %v1683_v15 = vpop.permute.xlu0 %1682 }
0x19df   : > { %v1714_v21 = vrot.slane %v1683_v15, %v4048_v4 }
0x19e1   : > { %v1724_v30 = vsel %vm1492_vm10, %v1714_v21, %v1723_v26 }
0x19e2   : > { %v1686_v25 = vpop.permute.xlu0 %1685 }
0x19e3   : > { %v1718_v29 = vrot.slane %v1686_v25, %v4048_v4 }
0x19e5   : > { %v1725_v31 = vsel %vm1494_vm13, %v1718_v29, %v1724_v30 }
0x19e6   : > { %v1727_v40 = vsel %vm4817_vm14, %v1725_v31, -inf  ;;  %v1871_v13 = vpop.permute.xlu0 %1870 }
0x19e7   : > { %1728 = vmax.xlane.f32.xlu1 %v1727_v40 }
0x1a74   : > { %v4119_v63 = vpop.xlane.xlu1 %1728 }
0x1a75   : > { %4818 = vst [vmem:[#allocation21_spill] sm:$0xff] %v4119_v63  ;;  %v1873_v0 = vadd.f32 %v1871_v13, %v4119_v63 }
0x1a77   : > { %v4123_v1 = vadd.f32 %v1873_v0, %v3995_v43  ;;  %v4126_v2 = vadd.f32 %v1873_v0, %v3993_v41  ;;  %v4131_v5 = vadd.f32 %v1873_v0, %v3997_v44  ;;  %v4134_v6 = vadd.f32 %v1873_v0, %v4015_v54 }
0x1a78   : > { %v4139_v7 = vadd.f32 %v1873_v0, %v3999_v45  ;;  %v4143_v9 = vadd.f32 %v1873_v0, %v4001_v62  ;;  %v4147_v10 = vadd.f32 %v1873_v0, %v4009_v3  ;;  %v4151_v12 = vadd.f32 %v1873_v0, %v4039_v60 }
0x1a79   : > { %4819 = vst [vmem:[#allocation22_spill] sm:$0xff] %v4123_v1  ;;  %4820 = vst [vmem:[#allocation23_spill] sm:$0xff] %v4126_v2  ;;  %1894 = vperm.xlu0 %3539, %v4123_v1   ;;  %1891 = vperm.xlu1 %3538, %v4126_v2  }
0x1a7a   : > { %4821 = vst [vmem:[#allocation24_spill] sm:$0xff] %v4131_v5  ;;  %4822 = vst [vmem:[#allocation25_spill] sm:$0xff] %v4134_v6 }
0x1a7b   : > { %4823 = vst [vmem:[#allocation26_spill] sm:$0xff] %v4139_v7  ;;  %4824 = vst [vmem:[#allocation27_spill] sm:$0xff] %v4143_v9 }
0x1a7c   : > { %4825 = vst [vmem:[#allocation28_spill] sm:$0xff] %v4147_v10  ;;  %4826 = vst [vmem:[#allocation29_spill] sm:$0xff] %v4151_v12 }
0x1a7d   : > { %1897 = vperm.xlu0 %3539, %v4131_v5   ;;  %1909 = vperm.xlu1 %3538, %v4134_v6  }
0x1a81   : > { %1900 = vperm.xlu0 %3539, %v4139_v7  }
0x1a85   : > { %1903 = vperm.xlu0 %3539, %v4143_v9  }
0x1a89   : > { %1906 = vperm.xlu0 %3539, %v4147_v10  }
0x1a8d   : > { %1912 = vperm.xlu0 %3539, %v4151_v12  }
0x1a91   : > { %2097 = vbcast.lane.b32.xlu0 %v2095_v14, 256 }
0x1af8   : > { %v1895_v24 = vpop.permute.xlu0 %1894  ;;  %v1892_v17 = vpop.permute.xlu1 %1891 }
0x1af9   : > { %v1921_v20 = vrot.slane %v1895_v24, %v4048_v4  ;;  %v1917_v21 = vrot.slane %v1892_v17, %v4048_v4 }
0x1afb   : > { %v1946_v26 = vsel %vm1482_vm1, %v1921_v20, %v1917_v21 }
0x1afc   : > { %v1898_v15 = vpop.permute.xlu0 %1897  ;;  %v1910_v40 = vpop.permute.xlu1 %1909 }
0x1afd   : > { %v1925_v22 = vrot.slane %v1898_v15, %v4048_v4  ;;  %v1941_v15 = vrot.slane %v1910_v40, %v4048_v4 }
0x1aff   : > { %v1947_v30 = vsel %vm1484_vm4, %v1925_v22, %v1946_v26 }
0x1b00   : > { %v1901_v19 = vpop.permute.xlu0 %1900 }
0x1b01   : > { %v1929_v25 = vrot.slane %v1901_v19, %v4048_v4 }
0x1b03   : > { %v1948_v13 = vsel %vm1486_vm5, %v1929_v25, %v1947_v30 }
0x1b04   : > { %v1904_v23 = vpop.permute.xlu0 %1903 }
0x1b05   : > { %v1933_v29 = vrot.slane %v1904_v23, %v4048_v4 }
0x1b07   : > { %v1949_v14 = vsel %vm1488_vm7, %v1933_v29, %v1948_v13 }
0x1b08   : > { %v1907_v31 = vpop.permute.xlu0 %1906 }
0x1b09   : > { %v1937_v0 = vrot.slane %v1907_v31, %v4048_v4 }
0x1b0b   : > { %v1950_v24 = vsel %vm1490_vm9, %v1937_v0, %v1949_v14 }
0x1b0c   : > { %v1913_v17 = vpop.permute.xlu0 %1912  ;;  %v1951_v23 = vsel %vm1492_vm10, %v1941_v15, %v1950_v24  ;;  %v2322_v15 = vrot.slane %v3985_v36, %v3835_v8 }
0x1b0d   : > { %v1945_v19 = vrot.slane %v1913_v17, %v4048_v4 }
0x1b0f   : > { %v1952_v20 = vsel %vm1494_vm13, %v1945_v19, %v1951_v23 }
0x1b10   : > { %v1954_v21 = vsel %vm4827_vm0, %v1952_v20, -inf  ;;  %v2098_v22 = vpop.permute.xlu0 %2097 }
0x1b11   : > { %1955 = vmax.xlane.f32.xlu1 %v1954_v21 }
0x1b9e   : > { %v4172_v25 = vpop.xlane.xlu1 %1955 }
0x1b9f   : > { %4828 = vst [vmem:[#allocation30_spill] sm:$0xff] %v4172_v25  ;;  %v2100_v26 = vadd.f32 %v2098_v22, %v4172_v25 }
0x1ba1   : > { %v4176_v29 = vadd.f32 %v2100_v26, %v3993_v41  ;;  %v4180_v30 = vadd.f32 %v2100_v26, %v3995_v43  ;;  %v4184_v31 = vadd.f32 %v2100_v26, %v3997_v44  ;;  %v4188_v40 = vadd.f32 %v2100_v26, %v3999_v45 }
0x1ba2   : > { %v4192_v13 = vadd.f32 %v2100_v26, %v4001_v62  ;;  %v4196_v0 = vadd.f32 %v2100_v26, %v4009_v3  ;;  %v4200_v14 = vadd.f32 %v2100_v26, %v4015_v54  ;;  %v4204_v24 = vadd.f32 %v2100_v26, %v4039_v60 }
0x1ba3   : > { %2118 = vperm.xlu0 %3539, %v4176_v29  }
0x1ba7   : > { %2121 = vperm.xlu0 %3539, %v4180_v30  }
0x1bab   : > { %2124 = vperm.xlu0 %3539, %v4184_v31  }
0x1baf   : > { %2127 = vperm.xlu0 %3539, %v4188_v40  }
0x1bb3   : > { %2130 = vperm.xlu0 %3539, %v4192_v13  }
0x1bb7   : > { %2133 = vperm.xlu0 %3539, %v4196_v0  }
0x1bbb   : > { %2136 = vperm.xlu0 %3539, %v4200_v14  }
0x1bbf   : > { %2139 = vperm.xlu0 %3539, %v4204_v24  }
0x1bc3   : > { %2324 = vbcast.lane.b32.xlu0 %v2322_v15, 256 }
0x1c22   : > { %v2119_v17 = vpop.permute.xlu0 %2118 }
0x1c23   : > { %v2144_v55 = vrot.slane %v2119_v17, %v4048_v4 }
0x1c26   : > { %v2122_v19 = vpop.permute.xlu0 %2121 }
0x1c27   : > { %v2148_v50 = vrot.slane %v2122_v19, %v4048_v4 }
0x1c29   : > { %v2173_v61 = vsel %vm1482_vm1, %v2148_v50, %v2144_v55 }
0x1c2a   : > { %v2125_v23 = vpop.permute.xlu0 %2124 }
0x1c2b   : > { %v2152_v47 = vrot.slane %v2125_v23, %v4048_v4 }
0x1c2d   : > { %v2174_v59 = vsel %vm1484_vm4, %v2152_v47, %v2173_v61 }
0x1c2e   : > { %v2128_v20 = vpop.permute.xlu0 %2127 }
0x1c2f   : > { %v2156_v26 = vrot.slane %v2128_v20, %v4048_v4 }
0x1c31   : > { %v2175_v56 = vsel %vm1486_vm5, %v2156_v26, %v2174_v59  ;;  %v2549_v26 = vrot.slane %v3985_v36, %v3872_v46 }
0x1c32   : > { %v2131_v21 = vpop.permute.xlu0 %2130 }
0x1c33   : > { %v2160_v58 = vrot.slane %v2131_v21, %v4048_v4 }
0x1c35   : > { %v2176_v19 = vsel %vm1488_vm7, %v2160_v58, %v2175_v56 }
0x1c36   : > { %v2134_v22 = vpop.permute.xlu0 %2133 }
0x1c37   : > { %v2164_v15 = vrot.slane %v2134_v22, %v4048_v4 }
0x1c39   : > { %v2177_v20 = vsel %vm1490_vm9, %v2164_v15, %v2176_v19 }
0x1c3a   : > { %v2137_v53 = vpop.permute.xlu0 %2136 }
0x1c3b   : > { %v2168_v11 = vrot.slane %v2137_v53, %v4048_v4 }
0x1c3d   : > { %v2178_v21 = vsel %vm1492_vm10, %v2168_v11, %v2177_v20 }
0x1c3e   : > { %v2140_v23 = vpop.permute.xlu0 %2139 }
0x1c3f   : > { %v2172_v17 = vrot.slane %v2140_v23, %v4048_v4 }
0x1c41   : > { %v2179_v42 = vsel %vm1494_vm13, %v2172_v17, %v2178_v21 }
0x1c42   : > { %v2181_v50 = vsel %vm4829_vm8, %v2179_v42, -inf  ;;  %v2325_v55 = vpop.permute.xlu0 %2324 }
0x1c43   : > { %2182 = vmax.xlane.f32.xlu1 %v2181_v50 }
0x1cd0   : > { %v4225_v47 = vpop.xlane.xlu1 %2182 }
0x1cd1   : > { %v2327_v53 = vadd.f32 %v2325_v55, %v4225_v47 }
0x1cd3   : > { %v4229_v59 = vadd.f32 %v2327_v53, %v3995_v43  ;;  %v4232_v56 = vadd.f32 %v2327_v53, %v3993_v41  ;;  %v4237_v11 = vadd.f32 %v2327_v53, %v3997_v44  ;;  %v4240_v42 = vadd.f32 %v2327_v53, %v4009_v3 }
0x1cd4   : > { %v4245_v58 = vadd.f32 %v2327_v53, %v3999_v45  ;;  %v4248_v61 = vadd.f32 %v2327_v53, %v4039_v60  ;;  %v4253_v22 = vadd.f32 %v2327_v53, %v4001_v62  ;;  %v4259_v15 = vadd.f32 %v2327_v53, %v4015_v54 }
0x1cd5   : > { %2348 = vperm.xlu0 %3539, %v4229_v59   ;;  %2345 = vperm.xlu1 %3538, %v4232_v56  }
0x1cd9   : > { %2351 = vperm.xlu0 %3539, %v4237_v11   ;;  %2360 = vperm.xlu1 %3538, %v4240_v42  }
0x1cdd   : > { %2354 = vperm.xlu0 %3539, %v4245_v58   ;;  %2366 = vperm.xlu1 %3538, %v4248_v61  }
0x1ce1   : > { %2357 = vperm.xlu0 %3539, %v4253_v22   ;;  %2551 = vbcast.lane.b32.xlu1 %v2549_v26, 256 }
0x1ce5   : > { %2363 = vperm.xlu0 %3539, %v4259_v15  }
0x1d54   : > { %v2349_v19 = vpop.permute.xlu0 %2348  ;;  %v2346_v23 = vpop.permute.xlu1 %2345 }
0x1d55   : > { %v2375_v20 = vrot.slane %v2349_v19, %v4048_v4  ;;  %v2371_v21 = vrot.slane %v2346_v23, %v4048_v4 }
0x1d57   : > { %v2400_v26 = vsel %vm1482_vm1, %v2375_v20, %v2371_v21 }
0x1d58   : > { %v2352_v17 = vpop.permute.xlu0 %2351  ;;  %v2361_v33 = vpop.permute.xlu1 %2360 }
0x1d59   : > { %v2379_v55 = vrot.slane %v2352_v17, %v4048_v4  ;;  %v2391_v23 = vrot.slane %v2361_v33, %v4048_v4 }
0x1d5b   : > { %v2401_v53 = vsel %vm1484_vm4, %v2379_v55, %v2400_v26 }
0x1d5c   : > { %v2355_v50 = vpop.permute.xlu0 %2354  ;;  %v2367_v52 = vpop.permute.xlu1 %2366 }
0x1d5d   : > { %v2383_v49 = vrot.slane %v2355_v50, %v4048_v4  ;;  %v2399_v16 = vrot.slane %v2367_v52, %v4048_v4 }
0x1d5f   : > { %v2402_v57 = vsel %vm1486_vm5, %v2383_v49, %v2401_v53 }
0x1d60   : > { %v2358_v38 = vpop.permute.xlu0 %2357  ;;  %v2552_v49 = vpop.permute.xlu1 %2551 }
0x1d61   : > { %v2387_v34 = vrot.slane %v2358_v38, %v4048_v4 }
0x1d63   : > { %v2403_v19 = vsel %vm1488_vm7, %v2387_v34, %v2402_v57 }
0x1d64   : > { %v2364_v37 = vpop.permute.xlu0 %2363  ;;  %v2404_v50 = vsel %vm1490_vm9, %v2391_v23, %v2403_v19 }
0x1d65   : > { %v2395_v17 = vrot.slane %v2364_v37, %v4048_v4 }
0x1d67   : > { %v2405_v20 = vsel %vm1492_vm10, %v2395_v17, %v2404_v50 }
0x1d68   : > { %v2406_v21 = vsel %vm1494_vm13, %v2399_v16, %v2405_v20  ;;  %v2776_v16 = vrot.slane %v3985_v36, %v3841_v32 }
0x1d69   : > { %v2408_v38 = vsel %vm4830_vm12, %v2406_v21, -inf }
0x1d6a   : > { %2409 = vmax.xlane.f32.xlu0 %v2408_v38 }
0x1df7   : > { %v4278_v55 = vpop.xlane.xlu0 %2409 }
0x1df8   : > { %v2554_v34 = vadd.f32 %v2552_v49, %v4278_v55 }
0x1dfa   : > { %v4282_v33 = vadd.f32 %v2554_v34, %v4039_v60  ;;  %v4285_v37 = vadd.f32 %v2554_v34, %v3993_v41  ;;  %v4292_v52 = vadd.f32 %v2554_v34, %v3995_v43  ;;  %v4296_v57 = vadd.f32 %v2554_v34, %v3997_v44 }
0x1dfb   : > { %v4300_v26 = vadd.f32 %v2554_v34, %v3999_v45  ;;  %v4304_v53 = vadd.f32 %v2554_v34, %v4001_v62  ;;  %v4308_v19 = vadd.f32 %v2554_v34, %v4009_v3  ;;  %v4312_v23 = vadd.f32 %v2554_v34, %v4015_v54 }
0x1dfc   : > { %2593 = vperm.xlu0 %3539, %v4282_v33   ;;  %2572 = vperm.xlu1 %3538, %v4285_v37  }
0x1e00   : > { %2778 = vbcast.lane.b32.xlu0 %v2776_v16, 256  ;;  %2575 = vperm.xlu1 %3538, %v4292_v52  }
0x1e04   : > { %2578 = vperm.xlu1 %3538, %v4296_v57  }
0x1e08   : > { %2581 = vperm.xlu1 %3538, %v4300_v26  }
0x1e0c   : > { %2584 = vperm.xlu1 %3538, %v4304_v53  }
0x1e10   : > { %2587 = vperm.xlu1 %3538, %v4308_v19  }
0x1e14   : > { %2590 = vperm.xlu1 %3538, %v4312_v23  }
0x1e7b   : > { %v2573_v17 = vpop.permute.xlu1 %2572  ;;  %v2594_v12 = vpop.permute.xlu0 %2593 }
0x1e7c   : > { %v2598_v27 = vrot.slane %v2573_v17, %v4048_v4  ;;  %v2626_v17 = vrot.slane %v2594_v12, %v4048_v4 }
0x1e7f   : > { %v2576_v50 = vpop.permute.xlu1 %2575 }
0x1e80   : > { %v2602_v49 = vrot.slane %v2576_v50, %v4048_v4 }
0x1e82   : > { %v2627_v34 = vsel %vm1482_vm1, %v2602_v49, %v2598_v27  ;;  %v2779_v49 = vpop.permute.xlu0 %2778 }
0x1e83   : > { %v2579_v20 = vpop.permute.xlu1 %2578 }
0x1e84   : > { %v2606_v16 = vrot.slane %v2579_v20, %v4048_v4 }
0x1e86   : > { %v2628_v10 = vsel %vm1484_vm4, %v2606_v16, %v2627_v34 }
0x1e87   : > { %v2582_v21 = vpop.permute.xlu1 %2581 }
0x1e88   : > { %v2610_v63 = vrot.slane %v2582_v21, %v4048_v4 }
0x1e8a   : > { %v2629_v7 = vsel %vm1486_vm5, %v2610_v63, %v2628_v10 }
0x1e8b   : > { %v2585_v38 = vpop.permute.xlu1 %2584 }
0x1e8c   : > { %v2614_v9 = vrot.slane %v2585_v38, %v4048_v4 }
0x1e8e   : > { %v2630_v50 = vsel %vm1488_vm7, %v2614_v9, %v2629_v7 }
0x1e8f   : > { %v2588_v6 = vpop.permute.xlu1 %2587 }
0x1e90   : > { %v2618_v1 = vrot.slane %v2588_v6, %v4048_v4 }
0x1e92   : > { %v2631_v21 = vsel %vm1490_vm9, %v2618_v1, %v2630_v50 }
0x1e93   : > { %v2591_v5 = vpop.permute.xlu1 %2590 }
0x1e94   : > { %v2622_v20 = vrot.slane %v2591_v5, %v4048_v4 }
0x1e96   : > { %v2632_v38 = vsel %vm1492_vm10, %v2622_v20, %v2631_v21 }
0x1e97   : > { %v2633_v27 = vsel %vm1494_vm13, %v2626_v17, %v2632_v38 }
0x1e98   : > { %v2635_v6 = vsel %vm4831_vm2, %v2633_v27, -inf }
0x1e99   : > { %2636 = vmax.xlane.f32.xlu1 %v2635_v6 }
0x1f26   : > { %v4331_v16 = vpop.xlane.xlu1 %2636 }
0x1f27   : > { %v2781_v63 = vadd.f32 %v2779_v49, %v4331_v16 }
0x1f29   : > { %v4335_v7 = vadd.f32 %v2781_v63, %v4001_v62  ;;  %v2782_v5 = vadd.f32 %v2781_v63, %v3993_v41  ;;  %v2783_v1 = vadd.f32 %v2781_v63, %v3995_v43  ;;  %v2784_v9 = vadd.f32 %v2781_v63, %v3997_v44 }
0x1f2a   : > { %v2785_v10 = vadd.f32 %v2781_v63, %v3999_v45  ;;  %v2787_v12 = vadd.f32 %v2781_v63, %v4009_v3  ;;  %v2788_v34 = vadd.f32 %v2781_v63, %v4015_v54  ;;  %v2789_v41 = vadd.f32 %v2781_v63, %v4039_v60 }
0x1f2b   : > { %2811 = vperm.xlu1 %3538, %v4335_v7   ;;  %2799 = vperm.xlu0 %3539, %v2782_v5  }
0x1f2f   : > { %2802 = vperm.xlu0 %3539, %v2783_v1   ;;  %1550 = vbcast.lane.b32.xlu1 %v3878_v48, 256 }
0x1f33   : > { %2805 = vperm.xlu0 %3539, %v2784_v9  }
0x1f37   : > { %2808 = vperm.xlu0 %3539, %v2785_v10  }
0x1f3b   : > { %2814 = vperm.xlu0 %3539, %v2787_v12  }
0x1f3f   : > { %2817 = vperm.xlu0 %3539, %v2788_v34  }
0x1f43   : > { %2820 = vperm.xlu0 %3539, %v2789_v41  }
0x1faa   : > { %v2800_v50 = vpop.permute.xlu0 %2799  ;;  %v2812_v27 = vpop.permute.xlu1 %2811 }
0x1fab   : > { %v2825_v45 = vrot.slane %v2800_v50, %v4048_v4  ;;  %v2841_v2 = vrot.slane %v2812_v27, %v4048_v4 }
0x1fae   : > { %v2803_v43 = vpop.permute.xlu0 %2802 }
0x1faf   : > { %v2829_v21 = vrot.slane %v2803_v43, %v4048_v4 }
0x1fb1   : > { %v2854_v54 = vsel %vm1482_vm1, %v2829_v21, %v2825_v45 }
0x1fb2   : > { %v2806_v20 = vpop.permute.xlu0 %2805 }
0x1fb3   : > { %v2833_v44 = vrot.slane %v2806_v20, %v4048_v4 }
0x1fb5   : > { %v2855_v6 = vsel %vm1484_vm4, %v2833_v44, %v2854_v54 }
0x1fb6   : > { %v2809_v17 = vpop.permute.xlu0 %2808 }
0x1fb7   : > { %v2837_v3 = vrot.slane %v2809_v17, %v4048_v4 }
0x1fb9   : > { %v2856_v49 = vsel %vm1486_vm5, %v2837_v3, %v2855_v6 }
0x1fba   : > { %v2815_v38 = vpop.permute.xlu0 %2814  ;;  %v2857_v20 = vsel %vm1488_vm7, %v2841_v2, %v2856_v49  ;;  %v4365_v2 = vpop.permute.xlu1 %1550 }
0x1fbb   : > { %v2845_v63 = vrot.slane %v2815_v38, %v4048_v4 }
0x1fbd   : > { %v2858_v50 = vsel %vm1490_vm9, %v2845_v63, %v2857_v20 }
0x1fbe   : > { %v2818_v60 = vpop.permute.xlu0 %2817 }
0x1fbf   : > { %v2849_v43 = vrot.slane %v2818_v60, %v4048_v4 }
0x1fc1   : > { %v2859_v21 = vsel %vm1492_vm10, %v2849_v43, %v2858_v50 }
0x1fc2   : > { %v2821_v25 = vpop.permute.xlu0 %2820 }
0x1fc3   : > { %v2853_v17 = vrot.slane %v2821_v25, %v4048_v4 }
0x1fc5   : > { %v2860_v44 = vsel %vm1494_vm13, %v2853_v17, %v2859_v21  ;;  %v3003_v17 = vrot.slane %v3985_v36, %v3894_v51 }
0x1fc6   : > { %v2862_v45 = vsel %vm4832_vm3, %v2860_v44, -inf }
0x1fc7   : > { %2863 = vmax.xlane.f32.xlu0 %v2862_v45 }
0x2054   : > { %v2864_v3 = vpop.xlane.xlu0 %2863 }
0x2055   : > { %v2897_v38 = vrot.slane %v2864_v3, %v3894_v51  ;;  %v2869_v27 = vrot.slane %v2864_v3, %v3823_v18  ;;  %v2873_v54 = vrot.slane %v2864_v3, %v3847_v35  ;;  %v2877_v60 = vrot.slane %v2864_v3, %v3829_v28 }
0x2056   : > { %v2881_v63 = vrot.slane %v2864_v3, %v3859_v39 }
0x2057   : > { %vm2913_vm6 = vcmp.eq.f32.partialorder %v2789_v41, %v2897_v38  ;;  %vm2906_vm15 = vcmp.eq.f32.partialorder %v2782_v5, %v2869_v27  ;;  %vm2907_vm11 = vcmp.eq.f32.partialorder %v2783_v1, %v2873_v54  ;;  %vm2908_vm14 = vcmp.eq.f32.partialorder %v2784_v9, %v2877_v60 }
0x2058   : > { %v2921_v25 = vsel %vm2913_vm6, %v4365_v2, 8  ;;  %v2914_v6 = vsel %vm2906_vm15, %v4365_v2, 8  ;;  %v2915_v49 = vsel %vm2907_vm11, %v4365_v2, 8  ;;  %v2916_v43 = vsel %vm2908_vm14, %v4365_v2, 8 }
0x2059   : > { %2944 = vperm.xlu0 %3539, %v2921_v25   ;;  %2923 = vperm.xlu1 %3538, %v2914_v6   ;;  %vm2909_vm0 = vcmp.eq.f32.partialorder %v2785_v10, %v2881_v63  ;;  %v2885_v5 = vrot.slane %v2864_v3, %v3835_v8  ;;  %v2889_v1 = vrot.slane %v2864_v3, %v3872_v46  ;;  %vm3010_vm6 = vcmask 7168  }
0x205a   : > { %v2917_v41 = vsel %vm2909_vm0, %v4365_v2, 8  ;;  %v2893_v9 = vrot.slane %v2864_v3, %v3841_v32 }
0x205b   : > { %vm2910_vm8 = vcmp.eq.f32.partialorder %v4335_v7, %v2885_v5  ;;  %vm2911_vm12 = vcmp.eq.f32.partialorder %v2787_v12, %v2889_v1 }
0x205c   : > { %v2918_v20 = vsel %vm2910_vm8, %v4365_v2, 8  ;;  %v2919_v50 = vsel %vm2911_vm12, %v4365_v2, 8  ;;  %vm2912_vm2 = vcmp.eq.f32.partialorder %v2788_v34, %v2893_v9 }
0x205d   : > { %2926 = vperm.xlu1 %3538, %v2915_v49   ;;  %v2920_v10 = vsel %vm2912_vm2, %v4365_v2, 8 }
0x2061   : > { %2929 = vperm.xlu1 %3538, %v2916_v43  }
0x2065   : > { %2932 = vperm.xlu1 %3538, %v2917_v41  }
0x2069   : > { %2935 = vperm.xlu1 %3538, %v2918_v20  }
0x206d   : > { %2938 = vperm.xlu1 %3538, %v2919_v50  }
0x2071   : > { %2941 = vperm.xlu1 %3538, %v2920_v10  }
0x2075   : > { %3005 = vbcast.lane.b32.xlu1 %v3003_v17, 256 }
0x20d8   : > { %v2924_v7 = vpop.permute.xlu1 %2923  ;;  %v2945_v49 = vpop.permute.xlu0 %2944 }
0x20d9   : > { %v2949_v54 = vrot.slane %v2924_v7, %v4048_v4  ;;  %v2977_v20 = vrot.slane %v2945_v49, %v4048_v4  ;;  %v2650_v49 = vrot.slane %v4331_v16, %v3829_v28 }
0x20db   : > { %vm2681_vm14 = vcmp.eq.f32.partialorder %v4296_v57, %v2650_v49 }
0x20dc   : > { %v2927_v21 = vpop.permute.xlu1 %2926 }
0x20dd   : > { %v2953_v12 = vrot.slane %v2927_v21, %v4048_v4 }
0x20df   : > { %v2978_v60 = vsel %vm1482_vm1, %v2953_v12, %v2949_v54 }
0x20e0   : > { %v2930_v44 = vpop.permute.xlu1 %2929 }
0x20e1   : > { %v2957_v27 = vrot.slane %v2930_v44, %v4048_v4 }
0x20e3   : > { %v2979_v63 = vsel %vm1484_vm4, %v2957_v27, %v2978_v60 }
0x20e4   : > { %v2933_v45 = vpop.permute.xlu1 %2932 }
0x20e5   : > { %v2961_v34 = vrot.slane %v2933_v45, %v4048_v4 }
0x20e7   : > { %v2980_v43 = vsel %vm1486_vm5, %v2961_v34, %v2979_v63 }
0x20e8   : > { %v2936_v38 = vpop.permute.xlu1 %2935 }
0x20e9   : > { %v2965_v6 = vrot.slane %v2936_v38, %v4048_v4 }
0x20eb   : > { %v2981_v41 = vsel %vm1488_vm7, %v2965_v6, %v2980_v43  ;;  %v2654_v43 = vrot.slane %v4331_v16, %v3859_v39 }
0x20ec   : > { %v2939_v25 = vpop.permute.xlu1 %2938 }
0x20ed   : > { %v2969_v36 = vrot.slane %v2939_v25, %v4048_v4  ;;  %vm2682_vm0 = vcmp.eq.f32.partialorder %v4300_v26, %v2654_v43 }
0x20ef   : > { %v2982_v9 = vsel %vm1490_vm9, %v2969_v36, %v2981_v41  ;;  %v2646_v36 = vrot.slane %v4331_v16, %v3847_v35  ;;  %v2662_v41 = vrot.slane %v4331_v16, %v3872_v46 }
0x20f0   : > { %v2942_v5 = vpop.permute.xlu1 %2941 }
0x20f1   : > { %v2973_v1 = vrot.slane %v2942_v5, %v4048_v4  ;;  %vm2680_vm15 = vcmp.eq.f32.partialorder %v4292_v52, %v2646_v36  ;;  %v2689_v5 = vsel %vm2681_vm14, %v4365_v2, 8  ;;  %v2690_v52 = vsel %vm2682_vm0, %v4365_v2, 8 }
0x20f2   : > { %vm2684_vm12 = vcmp.eq.f32.partialorder %v4308_v19, %v2662_v41 }
0x20f3   : > { %v2983_v50 = vsel %vm1492_vm10, %v2973_v1, %v2982_v9  ;;  %v2666_v1 = vrot.slane %v4331_v16, %v3841_v32  ;;  %v2692_v26 = vsel %vm2684_vm12, %v4365_v2, 8 }
0x20f4   : > { %v3006_v10 = vpop.permute.xlu1 %3005  ;;  %v2984_v17 = vsel %vm1494_vm13, %v2977_v20, %v2983_v50 }
0x20f5   : > { %v3008_v7 = vadd.f32 %v3006_v10, %v2864_v3  ;;  %v2985_v21 = vsel %vm4832_vm3, %v2984_v17, 2147483647  ;;  %v2642_v3 = vrot.slane %v4331_v16, %v3823_v18  ;;  %vm2685_vm2 = vcmp.eq.f32.partialorder %v4312_v23, %v2666_v1 }
0x20f6   : > { %v2987_v44 = vshra.s32 %v2985_v21, 16  ;;  %v2693_v20 = vsel %vm2685_vm2, %v4365_v2, 8  ;;  %vm4833_vm2 = vcmask 64512  }
0x20f7   : > { %v3009_v45 = vadd.f32 %v3008_v7, %v4001_v62  ;;  %v2688_v62 = vsel %vm2680_vm15, %v4365_v2, 8  ;;  %vm2679_vm11 = vcmp.eq.f32.partialorder %v4285_v37, %v2642_v3  ;;  %v2658_v37 = vrot.slane %v4331_v16, %v3835_v8 }
0x20f8   : > { %v2989_v38 = vcvt.s32.f32 %v2987_v44  ;;  %v2687_v63 = vsel %vm2679_vm11, %v4365_v2, 8 }
0x20f9   : > { %v3011_v12 = vsel %vm3010_vm6, %v3009_v45, -inf  ;;  %vm2683_vm8 = vcmp.eq.f32.partialorder %v4304_v53, %v2658_v37  ;;  %v2986_v53 = vand.u32 65535, %v2985_v21 }
0x20fa   : > { %v3012_v27 = vrot.slane %v3011_v12, 4  ;;  %2990 = vmin.xlane.f32.xlu1 %v2989_v38  ;;  %v2691_v57 = vsel %vm2683_vm8, %v4365_v2, 8 }
0x20fb   : > { %v2988_v19 = vcvt.s32.f32 %v2986_v53 }
0x20fc   : > { %v3013_v54 = vmax.f32 %v3011_v12, %v3012_v27 }
0x20fe   : > { %v3014_v34 = vrot.slane %v3013_v54, 2 }
0x2100   : > { %v3015_v25 = vmax.f32 %v3013_v54, %v3014_v34 }
0x2102   : > { %v3016_v6 = vrot.slane %v3015_v25, 1 }
0x2104   : > { %v3017_v60 = vmax.f32 %v3015_v25, %v3016_v6 }
0x2106   : > { %3020 = vperm.xlu0 %3539, %v3017_v60  }
0x210a   : > { %2699 = vperm.xlu0 %3539, %v2688_v62  }
0x210b   : > { %2696 = vperm.xlu1 %3538, %v2687_v63  }
0x210f   : > { %2702 = vperm.xlu1 %3538, %v2689_v5  }
0x2113   : > { %2705 = vperm.xlu1 %3538, %v2690_v52  }
0x2117   : > { %2708 = vperm.xlu1 %3538, %v2691_v57  }
0x211b   : > { %2711 = vperm.xlu1 %3538, %v2692_v26  }
0x211f   : > { %2714 = vperm.xlu1 %3538, %v2693_v20  }
0x2185   : > { %v4429_v9 = vpop.permute.xlu0 %3020 }
0x2186   : > { %vm3023_vm3 = vcmp.eq.f32.partialorder %v3009_v45, %v4429_v9  ;;  %v2670_v45 = vrot.slane %v4331_v16, %v3894_v51 }
0x2187   : > { %v3024_v50 = vsel %vm3023_vm3, %v4365_v2, 8  ;;  %v2991_v10 = vpop.xlane.xlu1 %2990 }
0x2188   : > { %v3025_v17 = vsel %vm3010_vm6, %v3024_v50, 2147483647  ;;  %vm2992_vm15 = vcmp.eq.f32.partialorder %v2989_v38, %v2991_v10  ;;  %vm2686_vm8 = vcmp.eq.f32.partialorder %v4282_v33, %v2670_v45  ;;  %v2997_v62 = vcvt.f32.s32 %v2991_v10 }
0x2189   : > { %v3026_v7 = vrot.slane %v3025_v17, 4  ;;  %v2993_v44 = vsel %vm2992_vm15, %v2988_v19, inf  ;;  %v2694_v34 = vsel %vm2686_vm8, %v4365_v2, 8  ;;  %v2700_v3 = vpop.permute.xlu0 %2699  ;;  %vm3046_vm6 = vcmask 57344  }
0x218a   : > { %2994 = vmin.xlane.f32.xlu0 %v2993_v44  ;;  %v2998_v43 = vshll.u32 %v2997_v62, 16  ;;  %v2726_v33 = vrot.slane %v2700_v3, %v4048_v4  ;;  %v2427_v62 = vrot.slane %v4278_v55, %v3859_v39 }
0x218b   : > { %vm3027_vm11 = vcmp.lt.s32.totalorder %v3025_v17, %v3026_v7  ;;  %v2697_v38 = vpop.permute.xlu1 %2696 }
0x218c   : > { %v3028_v23 = vsel %vm3027_vm11, %v3025_v17, %v3026_v7  ;;  %v2722_v5 = vrot.slane %v2697_v38, %v4048_v4  ;;  %vm2455_vm11 = vcmp.eq.f32.partialorder %v4245_v58, %v2427_v62 }
0x218d   : > { %v3029_v12 = vrot.slane %v3028_v23, 2 }
0x218e   : > { %v2751_v26 = vsel %vm1482_vm1, %v2726_v33, %v2722_v5 }
0x218f   : > { %vm3030_vm14 = vcmp.lt.s32.totalorder %v3028_v23, %v3029_v12  ;;  %v2703_v25 = vpop.permute.xlu1 %2702 }
0x2190   : > { %v3031_v27 = vsel %vm3030_vm14, %v3028_v23, %v3029_v12  ;;  %v2730_v16 = vrot.slane %v2703_v25, %v4048_v4 }
0x2191   : > { %v3032_v21 = vrot.slane %v3031_v27, 1 }
0x2192   : > { %v2752_v50 = vsel %vm1484_vm4, %v2730_v16, %v2751_v26 }
0x2193   : > { %vm3033_vm0 = vcmp.lt.s32.totalorder %v3031_v27, %v3032_v21  ;;  %v2706_v6 = vpop.permute.xlu1 %2705 }
0x2194   : > { %v3034_v54 = vsel %vm3033_vm0, %v3031_v27, %v3032_v21  ;;  %v2734_v52 = vrot.slane %v2706_v6, %v4048_v4 }
0x2195   : > { %3037 = vperm.xlu1 %3538, %v3034_v54  }
0x2196   : > { %v2753_v19 = vsel %vm1486_vm5, %v2734_v52, %v2752_v50  ;;  %v2431_v52 = vrot.slane %v4278_v55, %v3835_v8 }
0x2197   : > { %v2709_v60 = vpop.permute.xlu1 %2708 }
0x2198   : > { %v2738_v1 = vrot.slane %v2709_v60, %v4048_v4  ;;  %v2415_v60 = vrot.slane %v4278_v55, %v3823_v18 }
0x219a   : > { %v2754_v7 = vsel %vm1488_vm7, %v2738_v1, %v2753_v19  ;;  %vm2452_vm3 = vcmp.eq.f32.partialorder %v4232_v56, %v2415_v60  ;;  %v2463_v56 = vsel %vm2455_vm11, %v4365_v2, 8 }
0x219b   : > { %v2712_v36 = vpop.permute.xlu1 %2711  ;;  %v2460_v3 = vsel %vm2452_vm3, %v4365_v2, 8 }
0x219c   : > { %v2742_v20 = vrot.slane %v2712_v36, %v4048_v4  ;;  %v2423_v36 = vrot.slane %v4278_v55, %v3829_v28 }
0x219e   : > { %v2755_v12 = vsel %vm1490_vm9, %v2742_v20, %v2754_v7  ;;  %vm2454_vm15 = vcmp.eq.f32.partialorder %v4237_v11, %v2423_v36 }
0x219f   : > { %v2715_v49 = vpop.permute.xlu1 %2714 }
0x21a0   : > { %2717 = vperm.xlu0 %3539, %v2694_v34   ;;  %v2746_v10 = vrot.slane %v2715_v49, %v4048_v4  ;;  %v2462_v49 = vsel %vm2454_vm15, %v4365_v2, 8 }
0x21a2   : > { %v2756_v54 = vsel %vm1492_vm10, %v2746_v10, %v2755_v12 }
0x2214   : > { %v4442_v41 = vpop.permute.xlu1 %3037 }
0x2215   : > { %vm3040_vm12 = vcmp.eq.s32.totalorder %v3878_v48, %v4442_v41 }
0x2217   : > { %v2995_v63 = vpop.xlane.xlu0 %2994 }
0x2218   : > { %v2996_v37 = vcvt.f32.s32 %v2995_v63  ;;  %v2435_v63 = vrot.slane %v4278_v55, %v3872_v46 }
0x221a   : > { %v2999_v57 = vadd.s32 %v2998_v43, %v2996_v37  ;;  %vm2457_vm14 = vcmp.eq.f32.partialorder %v4240_v42, %v2435_v63  ;;  %v2443_v43 = vrot.slane %v4278_v55, %v3894_v51  ;;  %v2419_v42 = vrot.slane %v4278_v55, %v3847_v35 }
0x221b   : > { %v2465_v11 = vsel %vm2457_vm14, %v4365_v2, 8  ;;  %vm4834_vm14 = vcmask 64512  }
0x221c   : > { %v3044_v53 = vrot.slane %v2999_v57, %v4048_v4  ;;  %vm2459_vm0 = vcmp.eq.f32.partialorder %v4248_v61, %v2443_v43 }
0x221d   : > { %v2467_v5 = vsel %vm2459_vm0, %v4365_v2, 8 }
0x221e   : > { %v3045_v17 = vsel %vm3040_vm12, %v3044_v53, 4294967295  ;;  %vm2453_vm12 = vcmp.eq.f32.partialorder %v4229_v59, %v2419_v42  ;;  %v2439_v59 = vrot.slane %v4278_v55, %v3841_v32 }
0x221f   : > { %v2718_v44 = vpop.permute.xlu0 %2717  ;;  %v3047_v23 = vsel %vm3046_vm6, %v3045_v17, 2147483648  ;;  %v2461_v57 = vsel %vm2453_vm12, %v4365_v2, 8 }
0x2220   : > { %v2750_v27 = vrot.slane %v2718_v44, %v4048_v4  ;;  %v3049_v21 = vshra.s32 %v3047_v23, 16  ;;  %v3048_v26 = vand.u32 65535, %v3047_v23  ;;  %vm2458_vm15 = vcmp.eq.f32.partialorder %v4259_v15, %v2439_v59 }
0x2221   : > { %v2466_v50 = vsel %vm2458_vm15, %v4365_v2, 8 }
0x2222   : > { %v2757_v45 = vsel %vm1494_vm13, %v2750_v27, %v2756_v54  ;;  %v3051_v34 = vcvt.s32.f32 %v3049_v21  ;;  %v3050_v20 = vcvt.s32.f32 %v3048_v26 }
0x2223   : > { %v2758_v38 = vsel %vm4833_vm2, %v2757_v45, 2147483647  ;;  %vm2456_vm2 = vcmp.eq.f32.partialorder %v4253_v22, %v2431_v52 }
0x2224   : > { %3052 = vmax.xlane.f32.xlu1 %v3051_v34  ;;  %v2760_v25 = vshra.s32 %v2758_v38, 16  ;;  %v2759_v58 = vand.u32 65535, %v2758_v38  ;;  %v2464_v61 = vsel %vm2456_vm2, %v4365_v2, 8 }
0x2226   : > { %v2762_v6 = vcvt.s32.f32 %v2760_v25  ;;  %v2761_v16 = vcvt.s32.f32 %v2759_v58 }
0x2228   : > { %2763 = vmin.xlane.f32.xlu0 %v2762_v6 }
0x2235   : > { %2469 = vperm.xlu1 %3538, %v2460_v3  }
0x2239   : > { %2475 = vperm.xlu1 %3538, %v2462_v49  }
0x223d   : > { %2478 = vperm.xlu1 %3538, %v2463_v56  }
0x2241   : > { %2484 = vperm.xlu1 %3538, %v2465_v11  }
0x2245   : > { %2490 = vperm.xlu1 %3538, %v2467_v5  }
0x22b1   : > { %v3053_v1 = vpop.xlane.xlu1 %3052 }
0x22b2   : > { %vm3054_vm3 = vcmp.eq.f32.partialorder %v3051_v34, %v3053_v1  ;;  %v3059_v54 = vcvt.f32.s32 %v3053_v1 }
0x22b3   : > { %v3055_v53 = vsel %vm3054_vm3, %v3050_v20, -inf }
0x22b4   : > { %v3060_v25 = vshll.u32 %v3059_v54, 16  ;;  %v2204_v54 = vrot.slane %v4225_v47, %v3835_v8 }
0x22b5   : > { %v2764_v37 = vpop.xlane.xlu0 %2763  ;;  %v2470_v10 = vpop.permute.xlu1 %2469 }
0x22b6   : > { %vm2765_vm8 = vcmp.eq.f32.partialorder %v2762_v6, %v2764_v37  ;;  %v2770_v7 = vcvt.f32.s32 %v2764_v37  ;;  %v2495_v12 = vrot.slane %v2470_v10, %v4048_v4  ;;  %v2196_v10 = vrot.slane %v4225_v47, %v3829_v28 }
0x22b7   : > { %v2766_v33 = vsel %vm2765_vm8, %v2761_v16, inf }
0x22b8   : > { %2767 = vmin.xlane.f32.xlu0 %v2766_v33  ;;  %v2771_v45 = vshll.u32 %v2770_v7, 16  ;;  %vm2227_vm8 = vcmp.eq.f32.partialorder %v4184_v31, %v2196_v10  ;;  %v2208_v7 = vrot.slane %v4225_v47, %v3872_v46 }
0x22b9   : > { %v2476_v22 = vpop.permute.xlu1 %2475 }
0x22ba   : > { %v2503_v15 = vrot.slane %v2476_v22, %v4048_v4  ;;  %v2200_v22 = vrot.slane %v4225_v47, %v3859_v39  ;;  %vm2230_vm2 = vcmp.eq.f32.partialorder %v4196_v0, %v2208_v7  ;;  %v2192_v0 = vrot.slane %v4225_v47, %v3847_v35 }
0x22bb   : > { %v2238_v31 = vsel %vm2230_vm2, %v4365_v2, 8  ;;  %vm3062_vm2 = vcmp.eq.s32.totalorder %v3878_v48, 6 }
0x22bc   : > { %vm2228_vm12 = vcmp.eq.f32.partialorder %v4188_v40, %v2200_v22 }
0x22bd   : > { %v2479_v23 = vpop.permute.xlu1 %2478 }
0x22be   : > { %v2507_v3 = vrot.slane %v2479_v23, %v4048_v4 }
0x22c1   : > { %v2485_v6 = vpop.permute.xlu1 %2484 }
0x22c2   : > { %v2515_v37 = vrot.slane %v2485_v6, %v4048_v4 }
0x22c5   : > { %v2491_v11 = vpop.permute.xlu1 %2490 }
0x22c6   : > { %v2523_v52 = vrot.slane %v2491_v11, %v4048_v4 }
0x22ce   : > { %2472 = vperm.xlu0 %3539, %v2461_v57  }
0x22d2   : > { %2481 = vperm.xlu0 %3539, %v2464_v61  }
0x22f1   : > { %3056 = vmax.xlane.f32.xlu0 %v3055_v53 }
0x2307   : > { %2487 = vperm.xlu0 %3539, %v2466_v50   ;;  %v2188_v50 = vrot.slane %v4225_v47, %v3823_v18 }
0x2309   : > { %vm2225_vm0 = vcmp.eq.f32.partialorder %v4176_v29, %v2188_v50  ;;  %v2236_v29 = vsel %vm2228_vm12, %v4365_v2, 8  ;;  %vm3035_vm12 = vcmp.eq.s32.totalorder %v3878_v48, 7 }
0x2345   : > { %v2768_v19 = vpop.xlane.xlu0 %2767 }
0x2346   : > { %v2769_v27 = vcvt.f32.s32 %v2768_v19  ;;  %v2233_v19 = vsel %vm2225_vm0, %v4365_v2, 8 }
0x2348   : > { %v2772_v34 = vadd.s32 %v2771_v45, %v2769_v27 }
0x234a   : > { %v3068_v63 = vrot.slane %v2772_v34, %v4048_v4 }
0x234d   : > { %v2473_v17 = vpop.permute.xlu0 %2472 }
0x234e   : > { %v2499_v44 = vrot.slane %v2473_v17, %v4048_v4  ;;  %v2235_v17 = vsel %vm2227_vm8, %v4365_v2, 8 }
0x2350   : > { %v2524_v55 = vsel %vm1482_vm1, %v2499_v44, %v2495_v12  ;;  %v2216_v44 = vrot.slane %v4225_v47, %v3894_v51 }
0x2351   : > { %v2482_v21 = vpop.permute.xlu0 %2481  ;;  %v2525_v60 = vsel %vm1484_vm4, %v2503_v15, %v2524_v55 }
0x2352   : > { %v2511_v62 = vrot.slane %v2482_v21, %v4048_v4  ;;  %v2526_v56 = vsel %vm1486_vm5, %v2507_v3, %v2525_v60  ;;  %vm2232_vm3 = vcmp.eq.f32.partialorder %v4204_v24, %v2216_v44 }
0x2353   : > { %v2240_v23 = vsel %vm2232_vm3, %v4365_v2, 8  ;;  %vm3085_vm3 = vcmp.eq.s32.totalorder %v3878_v48, 5 }
0x2354   : > { %v2527_v5 = vsel %vm1488_vm7, %v2511_v62, %v2526_v56 }
0x2355   : > { %v2528_v57 = vsel %vm1490_vm9, %v2515_v37, %v2527_v5 }
0x237e   : > { %v3057_v38 = vpop.xlane.xlu0 %3056 }
0x237f   : > { %v3058_v36 = vcvt.f32.s32 %v3057_v38 }
0x2381   : > { %v4499_v49 = vadd.s32 %v3060_v25, %v3058_v36 }
0x2383   : > { %vm3064_vm11 = vcmp.eq.s32.totalorder %v3878_v48, %v4499_v49 }
0x2384   : > { %v3069_v43 = vsel %vm3064_vm11, %v3068_v63, 4294967295  ;;  %vm2226_vm11 = vcmp.eq.f32.partialorder %v4180_v30, %v2192_v0  ;;  %v2212_v30 = vrot.slane %v4225_v47, %v3841_v32 }
0x2385   : > { %v3070_v58 = vsel %vm3046_vm6, %v3069_v43, 2147483648  ;;  %v2234_v45 = vsel %vm2226_vm11, %v4365_v2, 8  ;;  %vm4835_vm11 = vcmask 64512  }
0x2386   : > { %v2488_v16 = vpop.permute.xlu0 %2487  ;;  %v3072_v33 = vshra.s32 %v3070_v58, 16  ;;  %v3071_v15 = vand.u32 65535, %v3070_v58  ;;  %vm2231_vm8 = vcmp.eq.f32.partialorder %v4200_v14, %v2212_v30 }
0x2387   : > { %v2519_v42 = vrot.slane %v2488_v16, %v4048_v4  ;;  %v2239_v25 = vsel %vm2231_vm8, %v4365_v2, 8 }
0x2388   : > { %v3074_v61 = vcvt.s32.f32 %v3072_v33  ;;  %v3073_v34 = vcvt.s32.f32 %v3071_v15 }
0x2389   : > { %v2529_v1 = vsel %vm1492_vm10, %v2519_v42, %v2528_v57 }
0x238a   : > { %3075 = vmax.xlane.f32.xlu1 %v3074_v61  ;;  %v2530_v26 = vsel %vm1494_vm13, %v2523_v52, %v2529_v1  ;;  %v3039_v1 = vsel %vm3035_vm12, %v4442_v41, 0 }
0x238b   : > { %v2531_v20 = vsel %vm4834_vm14, %v2530_v26, 2147483647  ;;  %vm2229_vm14 = vcmp.eq.f32.partialorder %v4192_v13, %v2204_v54 }
0x238c   : > { %v2533_v53 = vshra.s32 %v2531_v20, 16  ;;  %v2532_v40 = vand.u32 65535, %v2531_v20  ;;  %v2237_v24 = vsel %vm2229_vm14, %v4365_v2, 8 }
0x238e   : > { %v2535_v59 = vcvt.s32.f32 %v2533_v53  ;;  %v2534_v27 = vcvt.s32.f32 %v2532_v40  ;;  %v3063_v53 = vsel %vm3062_vm2, %v4499_v49, %v3039_v1 }
0x2390   : > { %2536 = vmin.xlane.f32.xlu0 %v2535_v59 }
0x239b   : > { %2242 = vperm.xlu1 %3538, %v2233_v19  }
0x239f   : > { %2248 = vperm.xlu1 %3538, %v2235_v17  }
0x23a3   : > { %2251 = vperm.xlu1 %3538, %v2236_v29  }
0x23a7   : > { %2257 = vperm.xlu1 %3538, %v2238_v31  }
0x23ab   : > { %2263 = vperm.xlu1 %3538, %v2240_v23  }
0x2417   : > { %v3076_v55 = vpop.xlane.xlu1 %3075 }
0x2418   : > { %vm3077_vm0 = vcmp.eq.f32.partialorder %v3074_v61, %v3076_v55  ;;  %v3082_v5 = vcvt.f32.s32 %v3076_v55  ;;  %v4837_v55 = vld [vmem:[#allocation23_spill] sm:$0xff] }
0x2419   : > { %v3078_v38 = vsel %vm3077_vm0, %v3073_v34, -inf }
0x241a   : > { %v3083_v33 = vshll.u32 %v3082_v5, 16 }
0x241b   : > { %v2243_v6 = vpop.permute.xlu1 %2242 }
0x241c   : > { %v2268_v56 = vrot.slane %v2243_v6, %v4048_v4  ;;  %v4839_v6 = vld [vmem:[#allocation26_spill] sm:$0xff] }
0x241d   : > { %v2537_v12 = vpop.xlane.xlu0 %2536 }
0x241e   : > { %vm2538_vm15 = vcmp.eq.f32.partialorder %v2535_v59, %v2537_v12  ;;  %v2543_v3 = vcvt.f32.s32 %v2537_v12 }
0x241f   : > { %v2539_v21 = vsel %vm2538_vm15, %v2534_v27, inf  ;;  %v2249_v13 = vpop.permute.xlu1 %2248 }
0x2420   : > { %2540 = vmin.xlane.f32.xlu0 %v2539_v21  ;;  %v2544_v58 = vshll.u32 %v2543_v3, 16  ;;  %v2276_v14 = vrot.slane %v2249_v13, %v4048_v4 }
0x2423   : > { %v2252_v63 = vpop.permute.xlu1 %2251 }
0x2424   : > { %v2280_v61 = vrot.slane %v2252_v63, %v4048_v4  ;;  %v4841_v63 = vld [vmem:[#allocation29_spill] sm:$0xff] }
0x2427   : > { %v2258_v42 = vpop.permute.xlu1 %2257 }
0x2428   : > { %v2288_v41 = vrot.slane %v2258_v42, %v4048_v4 }
0x242b   : > { %v2264_v22 = vpop.permute.xlu1 %2263 }
0x242c   : > { %v2296_v31 = vrot.slane %v2264_v22, %v4048_v4 }
0x2436   : > { %2245 = vperm.xlu0 %3539, %v2234_v45   ;;  %v4836_v45 = vld [vmem:[#allocation30_spill] sm:$0xff] }
0x2437   : > { %v1969_v15 = vrot.slane %v4836_v45, %v3829_v28  ;;  %v1973_v30 = vrot.slane %v4836_v45, %v3859_v39  ;;  %v1989_v3 = vrot.slane %v4836_v45, %v3894_v51 }
0x2439   : > { %vm2001_vm8 = vcmp.eq.f32.partialorder %v4839_v6, %v1973_v30  ;;  %vm2005_vm2 = vcmp.eq.f32.partialorder %v4841_v63, %v1989_v3 }
0x243a   : > { %2254 = vperm.xlu0 %3539, %v2237_v24   ;;  %v1961_v24 = vrot.slane %v4836_v45, %v3823_v18  ;;  %v2009_v13 = vsel %vm2001_vm8, %v4365_v2, 8  ;;  %vm3108_vm8 = vcmp.eq.s32.totalorder %v3878_v48, 4 }
0x243c   : > { %vm1998_vm14 = vcmp.eq.f32.partialorder %v4837_v55, %v1961_v24 }
0x243d   : > { %v2006_v34 = vsel %vm1998_vm14, %v4365_v2, 8 }
0x2459   : > { %3079 = vmax.xlane.f32.xlu0 %v3078_v38  ;;  %v4838_v38 = vld [vmem:[#allocation24_spill] sm:$0xff] }
0x245a   : > { %vm2000_vm0 = vcmp.eq.f32.partialorder %v4838_v38, %v1969_v15 }
0x246f   : > { %2260 = vperm.xlu0 %3539, %v2239_v25   ;;  %v2008_v25 = vsel %vm2000_vm0, %v4365_v2, 8 }
0x24ad   : > { %v2541_v60 = vpop.xlane.xlu0 %2540 }
0x24ae   : > { %v2542_v43 = vcvt.f32.s32 %v2541_v60  ;;  %v1981_v60 = vrot.slane %v4836_v45, %v3872_v46 }
0x24b0   : > { %v2545_v37 = vadd.s32 %v2544_v58, %v2542_v43 }
0x24b2   : > { %v3091_v59 = vrot.slane %v2545_v37, %v4048_v4  ;;  %v1977_v37 = vrot.slane %v4836_v45, %v3835_v8 }
0x24b5   : > { %v2246_v36 = vpop.permute.xlu0 %2245 }
0x24b6   : > { %v2272_v62 = vrot.slane %v2246_v36, %v4048_v4  ;;  %v4840_v36 = vld [vmem:[#allocation28_spill] sm:$0xff] }
0x24b7   : > { %vm2003_vm12 = vcmp.eq.f32.partialorder %v4840_v36, %v1981_v60 }
0x24b8   : > { %v2297_v47 = vsel %vm1482_vm1, %v2272_v62, %v2268_v56  ;;  %v2011_v62 = vsel %vm2003_vm12, %v4365_v2, 8  ;;  %v2013_v56 = vsel %vm2005_vm2, %v4365_v2, 8  ;;  %vm4845_vm2 = vcmask 64512  }
0x24b9   : > { %v2255_v11 = vpop.permute.xlu0 %2254  ;;  %v2298_v52 = vsel %vm1484_vm4, %v2276_v14, %v2297_v47  ;;  %v1965_v47 = vrot.slane %v4836_v45, %v3847_v35  ;;  %v4842_v14 = vld [vmem:[#allocation22_spill] sm:$0xff] }
0x24ba   : > { %v2284_v26 = vrot.slane %v2255_v11, %v4048_v4  ;;  %v2299_v50 = vsel %vm1486_vm5, %v2280_v61, %v2298_v52 }
0x24bc   : > { %v2300_v17 = vsel %vm1488_vm7, %v2284_v26, %v2299_v50  ;;  %v1985_v26 = vrot.slane %v4836_v45, %v3841_v32 }
0x24bd   : > { %v2301_v23 = vsel %vm1490_vm9, %v2288_v41, %v2300_v17 }
0x24e6   : > { %v3080_v16 = vpop.xlane.xlu0 %3079 }
0x24e7   : > { %v3081_v57 = vcvt.f32.s32 %v3080_v16 }
0x24e9   : > { %v3084_v20 = vadd.s32 %v3083_v33, %v3081_v57  ;;  %v4843_v33 = vld [vmem:[#allocation27_spill] sm:$0xff] }
0x24eb   : > { %v4560_v10 = vsel %vm3085_vm3, %v3084_v20, %v3063_v53  ;;  %vm3087_vm15 = vcmp.eq.s32.totalorder %v3878_v48, %v3084_v20  ;;  %v4844_v20 = vld [vmem:[#allocation25_spill] sm:$0xff] }
0x24ec   : > { %v3092_v19 = vsel %vm3087_vm15, %v3091_v59, 4294967295  ;;  %vm1999_vm15 = vcmp.eq.f32.partialorder %v4842_v14, %v1965_v47  ;;  %vm2004_vm0 = vcmp.eq.f32.partialorder %v4844_v20, %v1985_v26  ;;  %v4849_v20 = vld [vmem:[#allocation16_spill] sm:$0xff] }
0x24ed   : > { %v3093_v7 = vsel %vm3046_vm6, %v3092_v19, 2147483648  ;;  %v2007_v16 = vsel %vm1999_vm15, %v4365_v2, 8  ;;  %v2012_v53 = vsel %vm2004_vm0, %v4365_v2, 8 }
0x24ee   : > { %v2261_v29 = vpop.permute.xlu0 %2260  ;;  %v3095_v44 = vshra.s32 %v3093_v7, 16  ;;  %v3094_v57 = vand.u32 65535, %v3093_v7 }
0x24ef   : > { %v2292_v49 = vrot.slane %v2261_v29, %v4048_v4 }
0x24f0   : > { %v3097_v40 = vcvt.s32.f32 %v3095_v44  ;;  %v3096_v61 = vcvt.s32.f32 %v3094_v57 }
0x24f1   : > { %v2302_v12 = vsel %vm1492_vm10, %v2292_v49, %v2301_v23 }
0x24f2   : > { %3098 = vmax.xlane.f32.xlu1 %v3097_v40  ;;  %v2303_v27 = vsel %vm1494_vm13, %v2296_v31, %v2302_v12 }
0x24f3   : > { %v2304_v21 = vsel %vm4835_vm11, %v2303_v27, 2147483647  ;;  %vm2002_vm11 = vcmp.eq.f32.partialorder %v4843_v33, %v1977_v37 }
0x24f4   : > { %v2306_v0 = vshra.s32 %v2304_v21, 16  ;;  %v2305_v43 = vand.u32 65535, %v2304_v21  ;;  %v2010_v42 = vsel %vm2002_vm11, %v4365_v2, 8 }
0x24f6   : > { %v2308_v54 = vcvt.s32.f32 %v2306_v0  ;;  %v2307_v5 = vcvt.s32.f32 %v2305_v43 }
0x24f8   : > { %2309 = vmin.xlane.f32.xlu0 %v2308_v54 }
0x2503   : > { %2015 = vperm.xlu1 %3538, %v2006_v34  }
0x2507   : > { %2021 = vperm.xlu1 %3538, %v2008_v25  }
0x250b   : > { %2024 = vperm.xlu1 %3538, %v2009_v13  }
0x250f   : > { %2030 = vperm.xlu1 %3538, %v2011_v62  }
0x2513   : > { %2036 = vperm.xlu1 %3538, %v2013_v56  }
0x257f   : > { %v3099_v52 = vpop.xlane.xlu1 %3098 }
0x2580   : > { %vm3100_vm14 = vcmp.eq.f32.partialorder %v3097_v40, %v3099_v52  ;;  %v3105_v31 = vcvt.f32.s32 %v3099_v52 }
0x2581   : > { %v3101_v1 = vsel %vm3100_vm14, %v3096_v61, -inf  ;;  %v4848_v61 = vld [vmem:[#allocation15_spill] sm:$0xff] }
0x2582   : > { %v3106_v0 = vshll.u32 %v3105_v31, 16 }
0x2583   : > { %v2016_v59 = vpop.permute.xlu1 %2015 }
0x2584   : > { %v2041_v29 = vrot.slane %v2016_v59, %v4048_v4 }
0x2585   : > { %v2310_v11 = vpop.xlane.xlu0 %2309 }
0x2586   : > { %vm2311_vm3 = vcmp.eq.f32.partialorder %v2308_v54, %v2310_v11  ;;  %v2316_v17 = vcvt.f32.s32 %v2310_v11 }
0x2587   : > { %v2312_v58 = vsel %vm2311_vm3, %v2307_v5, inf  ;;  %v2022_v19 = vpop.permute.xlu1 %2021 }
0x2588   : > { %2313 = vmin.xlane.f32.xlu0 %v2312_v58  ;;  %v2317_v23 = vshll.u32 %v2316_v17, 16  ;;  %v2049_v12 = vrot.slane %v2022_v19, %v4048_v4  ;;  %v4851_v17 = vld [vmem:[#allocation20_spill] sm:$0xff] }
0x258b   : > { %v2025_v7 = vpop.permute.xlu1 %2024 }
0x258c   : > { %v2053_v55 = vrot.slane %v2025_v7, %v4048_v4 }
0x258f   : > { %v2031_v54 = vpop.permute.xlu1 %2030 }
0x2590   : > { %v2061_v3 = vrot.slane %v2031_v54, %v4048_v4 }
0x2593   : > { %v2037_v60 = vpop.permute.xlu1 %2036 }
0x2594   : > { %v2069_v43 = vrot.slane %v2037_v60, %v4048_v4 }
0x259e   : > { %2018 = vperm.xlu0 %3539, %v2007_v16   ;;  %v4846_v16 = vld [vmem:[#allocation21_spill] sm:$0xff] }
0x259f   : > { %v1734_v33 = vrot.slane %v4846_v16, %v3823_v18  ;;  %v1742_v52 = vrot.slane %v4846_v16, %v3829_v28  ;;  %v1762_v19 = vrot.slane %v4846_v16, %v3894_v51  ;;  %v1738_v31 = vrot.slane %v4846_v16, %v3847_v35 }
0x25a1   : > { %vm1773_vm15 = vcmp.eq.f32.partialorder %v4848_v61, %v1742_v52  ;;  %vm1778_vm0 = vcmp.eq.f32.partialorder %v4851_v17, %v1762_v19 }
0x25a2   : > { %2027 = vperm.xlu0 %3539, %v2010_v42   ;;  %v4847_v42 = vld [vmem:[#allocation13_spill] sm:$0xff]  ;;  %v1781_v26 = vsel %vm1773_vm15, %v4365_v2, 8 }
0x25a3   : > { %vm1771_vm3 = vcmp.eq.f32.partialorder %v4847_v42, %v1734_v33 }
0x25a4   : > { %v1779_v57 = vsel %vm1771_vm3, %v4365_v2, 8 }
0x25c1   : > { %3102 = vmax.xlane.f32.xlu0 %v3101_v1  ;;  %v1746_v1 = vrot.slane %v4846_v16, %v3859_v39 }
0x25c3   : > { %vm1774_vm11 = vcmp.eq.f32.partialorder %v4849_v20, %v1746_v1 }
0x25c4   : > { %v1782_v59 = vsel %vm1774_vm11, %v4365_v2, 8  ;;  %vm4855_vm11 = vcmp.eq.s32.totalorder %v3878_v48, 3 }
0x25d7   : > { %2033 = vperm.xlu0 %3539, %v2012_v53   ;;  %v1754_v53 = vrot.slane %v4846_v16, %v3872_v46 }
0x2615   : > { %v2314_v50 = vpop.xlane.xlu0 %2313 }
0x2616   : > { %v2315_v44 = vcvt.f32.s32 %v2314_v50  ;;  %v4850_v50 = vld [vmem:[#allocation18_spill] sm:$0xff] }
0x2617   : > { %vm1776_vm14 = vcmp.eq.f32.partialorder %v4850_v50, %v1754_v53 }
0x2618   : > { %v2318_v27 = vadd.s32 %v2317_v23, %v2315_v44  ;;  %v4852_v23 = vld [vmem:[#allocation14_spill] sm:$0xff] }
0x261a   : > { %v3114_v38 = vrot.slane %v2318_v27, %v4048_v4  ;;  %v4853_v27 = vld [vmem:[#allocation17_spill] sm:$0xff] }
0x261d   : > { %v2019_v22 = vpop.permute.xlu0 %2018 }
0x261e   : > { %v2045_v41 = vrot.slane %v2019_v22, %v4048_v4  ;;  %v1784_v22 = vsel %vm1776_vm14, %v4365_v2, 8 }
0x2620   : > { %v2070_v40 = vsel %vm1482_vm1, %v2045_v41, %v2041_v29  ;;  %v1786_v41 = vsel %vm1778_vm0, %v4365_v2, 8  ;;  %vm4856_vm0 = vcmask 64512  }
0x2621   : > { %v2028_v49 = vpop.permute.xlu0 %2027  ;;  %v2071_v45 = vsel %vm1484_vm4, %v2049_v12, %v2070_v40  ;;  %v1750_v40 = vrot.slane %v4846_v16, %v3835_v8 }
0x2622   : > { %v2057_v15 = vrot.slane %v2028_v49, %v4048_v4  ;;  %v2072_v30 = vsel %vm1486_vm5, %v2053_v55, %v2071_v45  ;;  %v1758_v55 = vrot.slane %v4846_v16, %v3841_v32 }
0x2624   : > { %v2073_v13 = vsel %vm1488_vm7, %v2057_v15, %v2072_v30  ;;  %v4854_v15 = vld [vmem:[#allocation19_spill] sm:$0xff] }
0x2625   : > { %v2074_v11 = vsel %vm1490_vm9, %v2061_v3, %v2073_v13  ;;  %vm1777_vm15 = vcmp.eq.f32.partialorder %v4854_v15, %v1758_v55  ;;  %v4860_v15 = vld [vmem:[#allocation8_spill] sm:$0xff] }
0x264e   : > { %v3103_v21 = vpop.xlane.xlu0 %3102 }
0x264f   : > { %v3104_v24 = vcvt.f32.s32 %v3103_v21 }
0x2651   : > { %v3107_v34 = vadd.s32 %v3106_v0, %v3104_v24 }
0x2653   : > { %v4615_v25 = vsel %vm3108_vm8, %v3107_v34, %v4560_v10  ;;  %vm3110_vm12 = vcmp.eq.s32.totalorder %v3878_v48, %v3107_v34  ;;  %v1785_v34 = vsel %vm1777_vm15, %v4365_v2, 8 }
0x2654   : > { %v3115_v6 = vsel %vm3110_vm12, %v3114_v38, 4294967295  ;;  %vm1772_vm12 = vcmp.eq.f32.partialorder %v4852_v23, %v1738_v31 }
0x2655   : > { %v3116_v36 = vsel %vm3046_vm6, %v3115_v6, 2147483648  ;;  %v1780_v12 = vsel %vm1772_vm12, %v4365_v2, 8 }
0x2656   : > { %v2034_v62 = vpop.permute.xlu0 %2033  ;;  %v3118_v63 = vshra.s32 %v3116_v36, 16  ;;  %v3117_v54 = vand.u32 65535, %v3116_v36 }
0x2657   : > { %v2065_v56 = vrot.slane %v2034_v62, %v4048_v4 }
0x2658   : > { %v3120_v10 = vcvt.s32.f32 %v3118_v63  ;;  %v3119_v45 = vcvt.s32.f32 %v3117_v54 }
0x2659   : > { %v2075_v5 = vsel %vm1492_vm10, %v2065_v56, %v2074_v11 }
0x265a   : > { %3121 = vmax.xlane.f32.xlu1 %v3120_v10  ;;  %v2076_v58 = vsel %vm1494_vm13, %v2069_v43, %v2075_v5 }
0x265b   : > { %v2077_v47 = vsel %vm4845_vm2, %v2076_v58, 2147483647  ;;  %vm1775_vm2 = vcmp.eq.f32.partialorder %v4853_v27, %v1750_v40 }
0x265c   : > { %v2079_v14 = vshra.s32 %v2077_v47, 16  ;;  %v2078_v7 = vand.u32 65535, %v2077_v47  ;;  %v1783_v21 = vsel %vm1775_vm2, %v4365_v2, 8 }
0x265e   : > { %v2081_v37 = vcvt.s32.f32 %v2079_v14  ;;  %v2080_v44 = vcvt.s32.f32 %v2078_v7 }
0x2660   : > { %2082 = vmin.xlane.f32.xlu0 %v2081_v37 }
0x266b   : > { %1788 = vperm.xlu1 %3538, %v1779_v57  }
0x266f   : > { %1794 = vperm.xlu1 %3538, %v1781_v26  }
0x2673   : > { %1797 = vperm.xlu1 %3538, %v1782_v59  }
0x2677   : > { %1803 = vperm.xlu1 %3538, %v1784_v22  }
0x267b   : > { %1809 = vperm.xlu1 %3538, %v1786_v41  }
0x26e7   : > { %v3122_v0 = vpop.xlane.xlu1 %3121 }
0x26e8   : > { %vm3123_vm3 = vcmp.eq.f32.partialorder %v3120_v10, %v3122_v0  ;;  %v3128_v43 = vcvt.f32.s32 %v3122_v0 }
0x26e9   : > { %v3124_v24 = vsel %vm3123_vm3, %v3119_v45, -inf  ;;  %v4859_v45 = vld [vmem:[#allocation7_spill] sm:$0xff] }
0x26ea   : > { %v3129_v14 = vshll.u32 %v3128_v43, 16 }
0x26eb   : > { %v1789_v38 = vpop.permute.xlu1 %1788 }
0x26ec   : > { %v1814_v62 = vrot.slane %v1789_v38, %v4048_v4 }
0x26ed   : > { %v2083_v29 = vpop.xlane.xlu0 %2082 }
0x26ee   : > { %vm2084_vm8 = vcmp.eq.f32.partialorder %v2081_v37, %v2083_v29  ;;  %v2089_v13 = vcvt.f32.s32 %v2083_v29 }
0x26ef   : > { %v2085_v49 = vsel %vm2084_vm8, %v2080_v44, inf  ;;  %v1795_v6 = vpop.permute.xlu1 %1794 }
0x26f0   : > { %2086 = vmin.xlane.f32.xlu0 %v2085_v49  ;;  %v2090_v11 = vshll.u32 %v2089_v13, 16  ;;  %v1822_v5 = vrot.slane %v1795_v6, %v4048_v4 }
0x26f3   : > { %v1798_v36 = vpop.permute.xlu1 %1797 }
0x26f4   : > { %v1826_v42 = vrot.slane %v1798_v36, %v4048_v4 }
0x26f7   : > { %v1804_v37 = vpop.permute.xlu1 %1803 }
0x26f8   : > { %v1834_v19 = vrot.slane %v1804_v37, %v4048_v4 }
0x26fb   : > { %v1810_v53 = vpop.permute.xlu1 %1809 }
0x26fc   : > { %v1842_v7 = vrot.slane %v1810_v53, %v4048_v4 }
0x2706   : > { %1791 = vperm.xlu0 %3539, %v1780_v12   ;;  %v4857_v12 = vld [vmem:[#allocation12_spill] sm:$0xff] }
0x2707   : > { %v1504_v27 = vrot.slane %v4857_v12, %v3823_v18  ;;  %v1512_v0 = vrot.slane %v4857_v12, %v3829_v28  ;;  %v1524_v18 = vrot.slane %v4857_v12, %v3872_v46  ;;  %v4861_v28 = vld [vmem:[#allocation10_spill] sm:$0xff]  ;;  %v1532_v38 = vrot.slane %v4857_v12, %v3894_v51 }
0x2708   : > { %v1508_v36 = vrot.slane %v4857_v12, %v3847_v35  ;;  %v1520_v51 = vrot.slane %v4857_v12, %v3835_v8  ;;  %v1528_v35 = vrot.slane %v4857_v12, %v3841_v32 }
0x2709   : > { %vm1543_vm12 = vcmp.eq.f32.partialorder %v4859_v45, %v1512_v0  ;;  %vm1546_vm3 = vcmp.eq.f32.partialorder %v4861_v28, %v1524_v18 }
0x270a   : > { %1800 = vperm.xlu0 %3539, %v1783_v21   ;;  %v4858_v21 = vld [vmem:[#allocation4_spill] sm:$0xff]  ;;  %v1554_v55 = vsel %vm1543_vm12, %v4365_v2, 8 }
0x270b   : > { %vm1541_vm8 = vcmp.eq.f32.partialorder %v4858_v21, %v1504_v27 }
0x270c   : > { %v1552_v54 = vsel %vm1541_vm8, %v4365_v2, 8 }
0x2729   : > { %3125 = vmax.xlane.f32.xlu0 %v3124_v24  ;;  %v1516_v24 = vrot.slane %v4857_v12, %v3859_v39  ;;  %v4862_v39 = vld [vmem:[#allocation11_spill] sm:$0xff] }
0x272a   : > { %vm1548_vm15 = vcmp.eq.f32.partialorder %v4862_v39, %v1532_v38 }
0x272b   : > { %vm1544_vm2 = vcmp.eq.f32.partialorder %v4860_v15, %v1516_v24  ;;  %v1559_v6 = vsel %vm1548_vm15, %v4365_v2, 8 }
0x273f   : > { %1806 = vperm.xlu0 %3539, %v1785_v34   ;;  %v1555_v34 = vsel %vm1544_vm2, %v4365_v2, 8 }
0x277d   : > { %v2087_v30 = vpop.xlane.xlu0 %2086 }
0x277e   : > { %v2088_v63 = vcvt.f32.s32 %v2087_v30  ;;  %v1557_v30 = vsel %vm1546_vm3, %v4365_v2, 8  ;;  %vm3153_vm3 = vcmp.eq.s32.totalorder %v3878_v48, 2 }
0x2780   : > { %v2091_v58 = vadd.s32 %v2090_v11, %v2088_v63 }
0x2782   : > { %v3136_v61 = vrot.slane %v2091_v58, %v4048_v4 }
0x2785   : > { %v1792_v60 = vpop.permute.xlu0 %1791 }
0x2786   : > { %v1818_v3 = vrot.slane %v1792_v60, %v4048_v4 }
0x2788   : > { %v1843_v10 = vsel %vm1482_vm1, %v1818_v3, %v1814_v62  ;;  %v4863_v62 = vld [vmem:[#allocation5_spill] sm:$0xff] }
0x2789   : > { %v1801_v56 = vpop.permute.xlu0 %1800  ;;  %v1844_v16 = vsel %vm1484_vm4, %v1822_v5, %v1843_v10 }
0x278a   : > { %v1830_v52 = vrot.slane %v1801_v56, %v4048_v4  ;;  %v1845_v1 = vsel %vm1486_vm5, %v1826_v42, %v1844_v16  ;;  %v4864_v56 = vld [vmem:[#allocation9_spill] sm:$0xff] }
0x278c   : > { %v1846_v59 = vsel %vm1488_vm7, %v1830_v52, %v1845_v1 }
0x278d   : > { %v1847_v29 = vsel %vm1490_vm9, %v1834_v19, %v1846_v59 }
0x27b6   : > { %v3126_v47 = vpop.xlane.xlu0 %3125 }
0x27b7   : > { %v3127_v33 = vcvt.f32.s32 %v3126_v47  ;;  %v4865_v47 = vld [vmem:[#allocation6_spill] sm:$0xff] }
0x27b8   : > { %vm1547_vm12 = vcmp.eq.f32.partialorder %v4865_v47, %v1528_v35 }
0x27b9   : > { %v3130_v57 = vadd.s32 %v3129_v14, %v3127_v33  ;;  %v1558_v8 = vsel %vm1547_vm12, %v4365_v2, 8  ;;  %vm3222_vm12 = vcmp.eq.s32.totalorder %v3878_v48, 8 }
0x27bb   : > { %v4671_v26 = vsel %vm4855_vm11, %v3130_v57, %v4615_v25  ;;  %vm3132_vm14 = vcmp.eq.s32.totalorder %v3878_v48, %v3130_v57 }
0x27bc   : > { %v3137_v20 = vsel %vm3132_vm14, %v3136_v61, 4294967295  ;;  %vm1542_vm14 = vcmp.eq.f32.partialorder %v4863_v62, %v1508_v36 }
0x27bd   : > { %v3138_v50 = vsel %vm3046_vm6, %v3137_v20, 2147483648  ;;  %v1553_v63 = vsel %vm1542_vm14, %v4365_v2, 8  ;;  %vm3199_vm14 = vcmp.eq.s32.totalorder %v3878_v48, 0 }
0x27be   : > { %v1807_v22 = vpop.permute.xlu0 %1806  ;;  %v3140_v17 = vshra.s32 %v3138_v50, 16  ;;  %v3139_v10 = vand.u32 65535, %v3138_v50 }
0x27bf   : > { %v1838_v41 = vrot.slane %v1807_v22, %v4048_v4  ;;  %v4866_v22 = vld [vmem:[#allocation3_spill] sm:$0xff] }
0x27c0   : > { %v3142_v25 = vcvt.s32.f32 %v3140_v17  ;;  %v3141_v5 = vcvt.s32.f32 %v3139_v10  ;;  %v4867_v17 = vld [vmem:[#allocation2_spill] sm:$0xff] }
0x27c1   : > { %v1848_v44 = vsel %vm1492_vm10, %v1838_v41, %v1847_v29  ;;  %vm1318_vm2 = vcmp.eq.f32.partialorder %v4867_v17, %v4866_v22 }
0x27c2   : > { %3143 = vmax.xlane.f32.xlu1 %v3142_v25  ;;  %v1849_v49 = vsel %vm1494_vm13, %v1842_v7, %v1848_v44 }
0x27c3   : > { %v1850_v31 = vsel %vm4856_vm0, %v1849_v49, 2147483647  ;;  %vm1545_vm0 = vcmp.eq.f32.partialorder %v4864_v56, %v1520_v51 }
0x27c4   : > { %v1852_v23 = vshra.s32 %v1850_v31, 16  ;;  %v1851_v60 = vand.u32 65535, %v1850_v31  ;;  %v1556_v43 = vsel %vm1545_vm0, %v4365_v2, 8 }
0x27c6   : > { %v1854_v40 = vcvt.s32.f32 %v1852_v23  ;;  %v1853_v3 = vcvt.s32.f32 %v1851_v60  ;;  %v1319_v23 = vsel %vm1318_vm2, %v3878_v48, 8  ;;  %vm3224_vm2 = vcmp.eq.s32.totalorder %v3878_v48, 9 }
0x27c8   : > { %1855 = vmin.xlane.f32.xlu0 %v1854_v40 }
0x27d3   : > { %1561 = vperm.xlu1 %3538, %v1552_v54  }
0x27d7   : > { %1567 = vperm.xlu1 %3538, %v1554_v55  }
0x27db   : > { %1570 = vperm.xlu1 %3538, %v1555_v34  }
0x27df   : > { %1576 = vperm.xlu1 %3538, %v1557_v30  }
0x27e3   : > { %1582 = vperm.xlu1 %3538, %v1559_v6  }
0x284f   : > { %v3144_v11 = vpop.xlane.xlu1 %3143 }
0x2850   : > { %vm3145_vm8 = vcmp.eq.f32.partialorder %v3142_v25, %v3144_v11  ;;  %v3150_v53 = vcvt.f32.s32 %v3144_v11 }
0x2851   : > { %v3146_v58 = vsel %vm3145_vm8, %v3141_v5, -inf }
0x2852   : > { %v3151_v41 = vshll.u32 %v3150_v53, 16 }
0x2853   : > { %v1562_v14 = vpop.permute.xlu1 %1561 }
0x2854   : > { %v1587_v61 = vrot.slane %v1562_v14, %v4048_v4 }
0x2855   : > { %v1856_v13 = vpop.xlane.xlu0 %1855 }
0x2856   : > { %vm1857_vm11 = vcmp.eq.f32.partialorder %v1854_v40, %v1856_v13  ;;  %v1862_v42 = vcvt.f32.s32 %v1856_v13 }
0x2857   : > { %v1858_v46 = vsel %vm1857_vm11, %v1853_v3, inf  ;;  %v1568_v16 = vpop.permute.xlu1 %1567 }
0x2858   : > { %1859 = vmin.xlane.f32.xlu0 %v1858_v46  ;;  %v1863_v59 = vshll.u32 %v1862_v42, 16  ;;  %v1595_v50 = vrot.slane %v1568_v16, %v4048_v4 }
0x285b   : > { %v1571_v57 = vpop.permute.xlu1 %1570 }
0x285c   : > { %v1599_v44 = vrot.slane %v1571_v57, %v4048_v4 }
0x285f   : > { %v1577_v7 = vpop.permute.xlu1 %1576 }
0x2860   : > { %v1607_v55 = vrot.slane %v1577_v7, %v4048_v4 }
0x2863   : > { %v1583_v0 = vpop.permute.xlu1 %1582 }
0x2864   : > { %v1615_v28 = vrot.slane %v1583_v0, %v4048_v4 }
0x286e   : > { %1564 = vperm.xlu0 %3539, %v1553_v63  }
0x2872   : > { %1573 = vperm.xlu0 %3539, %v1556_v43  }
0x2891   : > { %3147 = vmax.xlane.f32.xlu0 %v3146_v58 }
0x28a7   : > { %1579 = vperm.xlu0 %3539, %v1558_v8  }
0x28e5   : > { %v1860_v37 = vpop.xlane.xlu0 %1859 }
0x28e6   : > { %v1861_v1 = vcvt.f32.s32 %v1860_v37 }
0x28e8   : > { %v1864_v2 = vadd.s32 %v1863_v59, %v1861_v1 }
0x28ea   : > { %v3159_v40 = vrot.slane %v1864_v2, %v4048_v4 }
0x28ed   : > { %v1565_v33 = vpop.permute.xlu0 %1564 }
0x28ee   : > { %v1591_v52 = vrot.slane %v1565_v33, %v4048_v4 }
0x28f0   : > { %v1616_v32 = vsel %vm1482_vm1, %v1591_v52, %v1587_v61 }
0x28f1   : > { %v1574_v20 = vpop.permute.xlu0 %1573  ;;  %v1617_v29 = vsel %vm1484_vm4, %v1595_v50, %v1616_v32  ;;  %vm4868_vm4 = vcmask 64512  }
0x28f2   : > { %v1603_v49 = vrot.slane %v1574_v20, %v4048_v4  ;;  %v1618_v12 = vsel %vm1486_vm5, %v1599_v44, %v1617_v29  ;;  %v1320_v24 = vsel %vm4868_vm4, %v1319_v23, 2147483647  ;;  %vm4869_vm5 = vmmov %vm4868_vm4 }
0x28f3   : > { %v1322_v30 = vshra.s32 %v1320_v24, 16  ;;  %v1321_v62 = vand.u32 65535, %v1320_v24 }
0x28f4   : > { %v1619_v54 = vsel %vm1488_vm7, %v1603_v49, %v1618_v12 }
0x28f5   : > { %v1324_v13 = vcvt.s32.f32 %v1322_v30  ;;  %v1323_v56 = vcvt.s32.f32 %v1321_v62 }
0x291e   : > { %v3148_v19 = vpop.xlane.xlu0 %3147 }
0x291f   : > { %v3149_v25 = vcvt.f32.s32 %v3148_v19 }
0x2921   : > { %v3152_v31 = vadd.s32 %v3151_v41, %v3149_v25 }
0x2923   : > { %v3154_v27 = vsel %vm3153_vm3, %v3152_v31, %v4671_v26  ;;  %vm3155_vm1 = vcmp.eq.s32.totalorder %v3878_v48, %v3152_v31  ;;  %v1620_v26 = vsel %vm1490_vm9, %v1607_v55, %v1619_v54 }
0x2924   : > { %v3160_v21 = vsel %vm3155_vm1, %v3159_v40, 4294967295 }
0x2925   : > { %v3161_v45 = vsel %vm3046_vm6, %v3160_v21, 2147483648 }
0x2926   : > { %v1580_v15 = vpop.permute.xlu0 %1579  ;;  %v3163_v18 = vshra.s32 %v3161_v45, 16  ;;  %v3162_v5 = vand.u32 65535, %v3161_v45 }
0x2927   : > { %v1611_v34 = vrot.slane %v1580_v15, %v4048_v4 }
0x2928   : > { %v3165_v38 = vcvt.s32.f32 %v3163_v18  ;;  %v3164_v35 = vcvt.s32.f32 %v3162_v5 }
0x2929   : > { %v1621_v39 = vsel %vm1492_vm10, %v1611_v34, %v1620_v26 }
0x292a   : > { %3166 = vmax.xlane.f32.xlu1 %v3165_v38  ;;  %v1622_v6 = vsel %vm1494_vm13, %v1615_v28, %v1621_v39  ;;  %vm3176_vm13 = vcmp.eq.s32.totalorder %v3878_v48, 1 }
0x292b   : > { %v1623_v60 = vsel %vm4869_vm5, %v1622_v6, 2147483647 }
0x292c   : > { %v1625_v3 = vshra.s32 %v1623_v60, 16  ;;  %v1624_v51 = vand.u32 65535, %v1623_v60 }
0x292e   : > { %1325 = vmin.xlane.f32.xlu1 %v1324_v13  ;;  %v1627_v46 = vcvt.s32.f32 %v1625_v3  ;;  %v1626_v10 = vcvt.s32.f32 %v1624_v51 }
0x2930   : > { %1628 = vmin.xlane.f32.xlu0 %v1627_v46 }
0x29b7   : > { %v3167_v36 = vpop.xlane.xlu1 %3166 }
0x29b8   : > { %vm3168_vm10 = vcmp.eq.f32.partialorder %v3165_v38, %v3167_v36  ;;  %v3173_v37 = vcvt.f32.s32 %v3167_v36 }
0x29b9   : > { %v3169_v47 = vsel %vm3168_vm10, %v3164_v35, -inf }
0x29ba   : > { %v3174_v57 = vshll.u32 %v3173_v37, 16 }
0x29bb   : > { %v1326_v63 = vpop.xlane.xlu1 %1325 }
0x29bc   : > { %vm1327_vm7 = vcmp.eq.f32.partialorder %v1324_v13, %v1326_v63  ;;  %v1332_v29 = vcvt.f32.s32 %v1326_v63 }
0x29bd   : > { %v1629_v43 = vpop.xlane.xlu0 %1628  ;;  %v1328_v11 = vsel %vm1327_vm7, %v1323_v56, inf }
0x29be   : > { %vm1630_vm9 = vcmp.eq.f32.partialorder %v1627_v46, %v1629_v43  ;;  %1329 = vmin.xlane.f32.xlu1 %v1328_v11  ;;  %v1635_v8 = vcvt.f32.s32 %v1629_v43  ;;  %v1333_v49 = vshll.u32 %v1332_v29, 16 }
0x29bf   : > { %v1631_v58 = vsel %vm1630_vm9, %v1626_v10, inf }
0x29c0   : > { %1632 = vmin.xlane.f32.xlu0 %v1631_v58  ;;  %v1636_v33 = vshll.u32 %v1635_v8, 16 }
0x29c4   : > { %3170 = vmax.xlane.f32.xlu0 %v3169_v47 }
0x2a4b   : > { %v1330_v7 = vpop.xlane.xlu1 %1329 }
0x2a4c   : > { %v1331_v25 = vcvt.f32.s32 %v1330_v7 }
0x2a4d   : > { %v1633_v14 = vpop.xlane.xlu0 %1632 }
0x2a4e   : > { %v1634_v16 = vcvt.f32.s32 %v1633_v14  ;;  %v1334_v31 = vadd.s32 %v1333_v49, %v1331_v25 }
0x2a50   : > { %v1637_v42 = vadd.s32 %v1636_v33, %v1634_v16  ;;  %v3205_v21 = vrot.slane %v1334_v31, %v4048_v4 }
0x2a51   : > { %v3171_v52 = vpop.xlane.xlu0 %3170 }
0x2a52   : > { %v3172_v61 = vcvt.f32.s32 %v3171_v52  ;;  %v3182_v20 = vrot.slane %v1637_v42, %v4048_v4 }
0x2a54   : > { %v3175_v1 = vadd.s32 %v3174_v57, %v3172_v61 }
0x2a56   : > { %v3177_v53 = vsel %vm3176_vm13, %v3175_v1, %v3154_v27  ;;  %vm3178_vm15 = vcmp.eq.s32.totalorder %v3878_v48, %v3175_v1 }
0x2a57   : > { %v3183_v59 = vsel %vm3178_vm15, %v3182_v20, 4294967295 }
0x2a58   : > { %v3184_v32 = vsel %vm3046_vm6, %v3183_v59, 2147483648 }
0x2a59   : > { %v3186_v50 = vshra.s32 %v3184_v32, 16  ;;  %v3185_v19 = vand.u32 65535, %v3184_v32 }
0x2a5b   : > { %v3188_v2 = vcvt.s32.f32 %v3186_v50  ;;  %v3187_v17 = vcvt.s32.f32 %v3185_v19 }
0x2a5d   : > { %3189 = vmax.xlane.f32.xlu0 %v3188_v2 }
0x2aea   : > { %v3190_v22 = vpop.xlane.xlu0 %3189 }
0x2aeb   : > { %vm3191_vm11 = vcmp.eq.f32.partialorder %v3188_v2, %v3190_v22  ;;  %v3196_v44 = vcvt.f32.s32 %v3190_v22 }
0x2aec   : > { %v3192_v41 = vsel %vm3191_vm11, %v3187_v17, -inf }
0x2aed   : > { %3193 = vmax.xlane.f32.xlu0 %v3192_v41  ;;  %v3197_v40 = vshll.u32 %v3196_v44, 16 }
0x2b7a   : > { %v3194_v23 = vpop.xlane.xlu0 %3193 }
0x2b7b   : > { %v3195_v12 = vcvt.f32.s32 %v3194_v23 }
0x2b7d   : > { %v3198_v27 = vadd.s32 %v3197_v40, %v3195_v12 }
0x2b7f   : > { %v3200_v0 = vsel %vm3199_vm14, %v3198_v27, %v3177_v53  ;;  %vm3201_vm0 = vcmp.eq.s32.totalorder %v3878_v48, %v3198_v27 }
0x2b80   : > { %v3206_v54 = vsel %vm3201_vm0, %v3205_v21, 4294967295 }
0x2b81   : > { %v3207_v45 = vsel %vm3046_vm6, %v3206_v54, 2147483648 }
0x2b82   : > { %v3209_v24 = vshra.s32 %v3207_v45, 16  ;;  %v3208_v15 = vand.u32 65535, %v3207_v45 }
0x2b84   : > { %v3211_v55 = vcvt.s32.f32 %v3209_v24  ;;  %v3210_v34 = vcvt.s32.f32 %v3208_v15 }
0x2b86   : > { %3212 = vmax.xlane.f32.xlu1 %v3211_v55 }
0x2c13   : > { %v3213_v18 = vpop.xlane.xlu1 %3212 }
0x2c14   : > { %vm3214_vm8 = vcmp.eq.f32.partialorder %v3211_v55, %v3213_v18  ;;  %v3219_v26 = vcvt.f32.s32 %v3213_v18 }
0x2c15   : > { %v3215_v28 = vsel %vm3214_vm8, %v3210_v34, -inf }
0x2c16   : > { %3216 = vmax.xlane.f32.xlu0 %v3215_v28  ;;  %v3220_v30 = vshll.u32 %v3219_v26, 16 }
0x2ca3   : > { %v3217_v38 = vpop.xlane.xlu0 %3216 }
0x2ca4   : > { %v3218_v4 = vcvt.f32.s32 %v3217_v38 }
0x2ca6   : > { %v3221_v39 = vadd.s32 %v3220_v30, %v3218_v4 }
0x2ca8   : > { %v3223_v6 = vsel %vm3222_vm12, %v3221_v39, %v3200_v0 }
0x2ca9   : > { %v3225_v60 = vsel %vm3224_vm2, %v4429_v9, %v3223_v6 }
0x2caa   : > { %3226 = vst [vmem:[%s136_s3] sm:$0x1] %v3225_v60 }
0x2cab PF: > { %s12_s9 = sadd.s32 1, %s3596_s9  }
0x2cac   : > { %p9_p4 = scmp.ge.s32.totalorder %s12_s9, 4  }
0x2cae   :  { %11 = sbr.rel (!%p9_p4) target bundleno = 1 (0x1), region = 58 }

</bundles_post_ra>
